<compile_context>
chip_gen: v5e
topology: v5e:2x2
jax: 0.10.0
libtpu: 0.0.40
codegen_flags: <defaults>
</compile_context>

<pallas_src>
import jax
import jax.numpy as jnp
from jax import lax
from jax.experimental import pallas as pl
from jax.experimental.pallas import tpu as pltpu


# ----------------------------------------------------------------------------- kernel

def make_seq2seq_kernel(num_layers, seq_in, seq_out, hidden, batch):
    L, H, B = num_layers, hidden, batch
    f32 = jnp.float32
    bf16 = jnp.bfloat16

    def kernel(*refs):
        it = iter(refs)
        x_ref = next(it)                                  # (T_in*B, I_pad)    bf16
        enc_wih0_ref = next(it)                           # (I_pad, 4H)        bf16
        enc_b0_ref = next(it)                             # (1, 4H)            f32
        enc_whh0_ref = next(it)                           # (H, 4H)            bf16
        enc_rest = [(next(it), next(it)) for _ in range(L - 1)]   # (2H,4H) bf16, (1,4H) f32
        dec_whh0_ref = next(it)                           # (H, 4H)            bf16
        dec_w0f_ref = next(it)                            # (2H, 4H)           bf16  [W_comb; Whh0]
        dec_b0_ref = next(it)                             # (1, 4H)            f32
        dec_b0c_ref = next(it)                            # (1, 4H)            f32  (b0 + b_comb)
        dec_rest = [(next(it), next(it)) for _ in range(L - 1)]
        outW_ref = next(it)                               # (H, O_pad)         bf16
        outb_ref = next(it)                               # (1, O_pad)         f32
        out_ref = next(it)                                # (T_out*B, O_pad)   f32

        def apply_gates(gates, c_prev):
            # Full-width nonlinearities (EUP slot otherwise idle), then static lane slices.
            sg = jax.nn.sigmoid(gates)
            th = jnp.tanh(gates)
            i = sg[:, 0 * H:1 * H]
            f = sg[:, 1 * H:2 * H]
            g = th[:, 2 * H:3 * H]
            o = sg[:, 3 * H:4 * H]
            c_new = f * c_prev + i * g
            h_new = o * jnp.tanh(c_new)
            return h_new, c_new

        def cell_fused(inp, h_l, c_l, wf, b):
            # One MXU op per cell: concat([inp, h]) @ [Wih; Whh]  (K = 2H = 64).
            z = jnp.concatenate([inp, h_l], axis=-1).astype(bf16)
            gates = jnp.dot(z, wf, preferred_element_type=f32) + b
            return apply_gates(gates, c_l)

        # ---------------- encoder ----------------
        # Encoder weight loads are scoped to this section only.
        enc_whh0 = enc_whh0_ref[...]
        enc_w = [(w[...], b[...]) for (w, b) in enc_rest]

        # Layer-0 input projection for ALL time steps in one matmul (independent of the
        # recurrence, so it sits off the critical path).
        gin0 = (jnp.dot(x_ref[...], enc_wih0_ref[...], preferred_element_type=f32)
                + enc_b0_ref[...])                        # (T_in*B, 4H) f32

        # Recurrent state lives in vregs -- loops fully unrolled.
        h = [jnp.zeros((B, H), f32) for _ in range(L)]
        c = [jnp.zeros((B, H), f32) for _ in range(L)]

        for t in range(seq_in):
            g0 = gin0[t * B:(t + 1) * B, :] + jnp.dot(
                h[0].astype(bf16), enc_whh0, preferred_element_type=f32)
            h[0], c[0] = apply_gates(g0, c[0])
            inp = h[0]
            for l in range(1, L):
                wf, b = enc_w[l - 1]
                h[l], c[l] = cell_fused(inp, h[l], c[l], wf, b)
                inp = h[l]

        # ---------------- decoder ----------------
        # Decoder weights are loaded only now (bounds vreg live ranges).
        dec_whh0 = dec_whh0_ref[...]
        dec_w0f = dec_w0f_ref[...]
        dec_b0 = dec_b0_ref[...]
        dec_b0c = dec_b0c_ref[...]
        dec_w = [(w[...], b[...]) for (w, b) in dec_rest]
        outW = outW_ref[...]
        outb = outb_ref[...]

        preds = []
        h_top_prev = None
        for t in range(seq_out):
            if t == 0:
                # pred_{-1} == 0  =>  no W_comb / b_comb contribution.
                g0 = jnp.dot(h[0].astype(bf16), dec_whh0,
                             preferred_element_type=f32) + dec_b0
            else:
                # Folded feedback: pred_{t-1}@Wih0 == h_top(t-1)@W_comb + b_comb.
                z = jnp.concatenate([h_top_prev, h[0]], axis=-1).astype(bf16)
                g0 = jnp.dot(z, dec_w0f, preferred_element_type=f32) + dec_b0c
            h[0], c[0] = apply_gates(g0, c[0])
            inp = h[0]
            for l in range(1, L):
                wf, b = dec_w[l - 1]
                h[l], c[l] = cell_fused(inp, h[l], c[l], wf, b)
                inp = h[l]
            h_top_prev = inp
            # Output projection: only feeds the store now (off the recurrent chain).
            pred = jnp.dot(inp.astype(bf16), outW, preferred_element_type=f32) + outb
            preds.append(pred)

        # Single dense, lane-aligned store of all predictions.
        out_ref[...] = jnp.concatenate(preds, axis=0)

    return kernel


def _full_spec(shape):
    n = len(shape)
    return pl.BlockSpec(shape, lambda i, n=n: (0,) * n)


# ----------------------------------------------------------------------------- wrapper

def seq2seq_forward(x, params, target_length):
    """x: (B, C, T_in, F) float32 -> (B, 3, target_length, output_dim // 3)."""
    B, C, T_in, F = x.shape
    input_dim = C * F
    H = params["enc"][0][1].shape[0]          # Whh_T: (H, 4H)
    O = params["out_w"].shape[1]              # out_w: (H, O)
    L = len(params["enc"])
    O_pad = ((O + 127) // 128) * 128          # lane-dense output width
    I_pad = ((input_dim + 127) // 128) * 128  # lane-dense / aligned-K input width
    bf16, f32 = jnp.bfloat16, jnp.float32

    # permute(0,2,1,3) + reshape(B, T_in, -1), time-major, flatten (T_in, B) -> rows.
    x_seq = jnp.transpose(x, (0, 2, 1, 3)).reshape(B, T_in, input_dim)
    x_flat = jnp.transpose(x_seq, (1, 0, 2)).reshape(T_in * B, input_dim)
    x_pad = jnp.zeros((T_in * B, I_pad), f32).at[:, :input_dim].set(x_flat).astype(bf16)

    # Encoder layer 0 (input projection done in-kernel; pad Wih rows to I_pad).
    wih0_e, whh0_e, b0_e = params["enc"][0]
    wih0_e_pad = jnp.zeros((I_pad, 4 * H), f32).at[:input_dim, :].set(wih0_e).astype(bf16)

    inputs = [x_pad, wih0_e_pad, b0_e.astype(f32), whh0_e.astype(bf16)]
    for l in range(1, L):
        wih, whh, b = params["enc"][l]
        wfused = jnp.concatenate([wih, whh], axis=0).astype(bf16)      # (2H, 4H)
        inputs += [wfused, b.astype(f32)]

    # Decoder layer 0: fold the output projection into next-step layer-0 gates.
    wih0_d, whh0_d, b0_d = params["dec"][0]
    w_comb = jnp.dot(params["out_w"], wih0_d, precision=lax.Precision.HIGHEST)   # (H, 4H)
    b_comb = jnp.dot(params["out_b"], wih0_d, precision=lax.Precision.HIGHEST)   # (1, 4H)
    dec_w0f = jnp.concatenate([w_comb, whh0_d], axis=0).astype(bf16)             # (2H, 4H)
    inputs += [whh0_d.astype(bf16), dec_w0f, b0_d.astype(f32), (b0_d + b_comb).astype(f32)]
    for l in range(1, L):
        wih, whh, b = params["dec"][l]
        wfused = jnp.concatenate([wih, whh], axis=0).astype(bf16)
        inputs += [wfused, b.astype(f32)]

    out_w_pad = jnp.zeros((H, O_pad), f32).at[:, :O].set(params["out_w"]).astype(bf16)
    out_b_pad = jnp.zeros((1, O_pad), f32).at[:, :O].set(params["out_b"])
    inputs += [out_w_pad, out_b_pad]

    kernel = make_seq2seq_kernel(L, T_in, target_length, H, B)

    out_flat = pl.pallas_call(
        kernel,
        out_shape=jax.ShapeDtypeStruct((target_length * B, O_pad), jnp.float32),
        grid=(1,),
        in_specs=[_full_spec(a.shape) for a in inputs],
        out_specs=_full_spec((target_length * B, O_pad)),
        compiler_params=pltpu.CompilerParams(dimension_semantics=("arbitrary",)),
    )(*inputs)

    out = out_flat[:, :O].reshape(target_length, B, O)      # drop lane padding
    out = jnp.transpose(out, (1, 0, 2))                     # (B, T_out, O)
    out = out.reshape(B, target_length, 3, -1)              # (B, T_out, 3, O//3)
    out = jnp.transpose(out, (0, 2, 1, 3))                  # (B, 3, T_out, O//3)
    return out


# ----------------------------------------------------------------------------- reference

def seq2seq_reference(x, params, target_length):
    B, C, T_in, F = x.shape
    xs = jnp.transpose(x, (0, 2, 1, 3)).reshape(B, T_in, C * F)
    L = len(params["enc"])
    H = params["enc"][0][1].shape[0]
    O = params["out_w"].shape[1]
    h = [jnp.zeros((B, H), jnp.float32) for _ in range(L)]
    c = [jnp.zeros((B, H), jnp.float32) for _ in range(L)]

    def cell(inp, l, w):
        wih, whh, b = w
        gates = (jnp.dot(inp, wih, precision=lax.Precision.HIGHEST)
                 + jnp.dot(h[l], whh, precision=lax.Precision.HIGHEST) + b)
        i = jax.nn.sigmoid(gates[:, :H]); f = jax.nn.sigmoid(gates[:, H:2 * H])
        g = jnp.tanh(gates[:, 2 * H:3 * H]); o = jax.nn.sigmoid(gates[:, 3 * H:])
        c[l] = f * c[l] + i * g
        h[l] = o * jnp.tanh(c[l])
        return h[l]

    for t in range(T_in):
        inp = xs[:, t]
        for l in range(L):
            inp = cell(inp, l, params["enc"][l])

    dec_in = jnp.zeros((B, O), jnp.float32)
    outs = []
    for _ in range(target_length):
        inp = dec_in
        for l in range(L):
            inp = cell(inp, l, params["dec"][l])
        pred = jnp.dot(inp, params["out_w"], precision=lax.Precision.HIGHEST) + params["out_b"]
        outs.append(pred)
        dec_in = pred
    out = jnp.stack(outs, axis=1)
    out = out.reshape(B, target_length, 3, -1)
    return jnp.transpose(out, (0, 2, 1, 3))


# ----------------------------------------------------------------------------- params

def init_params(key, input_dim, hidden, output_dim, num_layers):
    """Weights stored pre-transposed: Wih_T (in, 4H), Whh_T (H, 4H), bias (1, 4H)."""
    H = hidden
    scale = 1.0 / jnp.sqrt(jnp.float32(H))

    def u(k, shape):
        return jax.random.uniform(k, shape, jnp.float32, -scale, scale)

    keys = iter(jax.random.split(key, 6 * num_layers + 2))
    enc, dec = [], []
    for l in range(num_layers):
        in_l = input_dim if l == 0 else H
        enc.append((u(next(keys), (in_l, 4 * H)),
                    u(next(keys), (H, 4 * H)),
                    u(next(keys), (1, 4 * H))))
    for l in range(num_layers):
        in_l = output_dim if l == 0 else H
        dec.append((u(next(keys), (in_l, 4 * H)),
                    u(next(keys), (H, 4 * H)),
                    u(next(keys), (1, 4 * H))))
    out_w = u(next(keys), (H, output_dim))
    out_b = u(next(keys), (1, output_dim))
    return {"enc": enc, "dec": dec, "out_w": out_w, "out_b": out_b}


# ----------------------------------------------------------------------------- main

if __name__ == "__main__":
    B, C, T_in, F = 2, 3, 8, 8          # C must be 3 (final reshape into 3 channels)
    hidden = 32
    num_layers = 2
    input_dim = C * F                    # 24
    output_dim = C * F                   # 24 (divisible by 3)
    target_length = 6

    key = jax.random.PRNGKey(0)
    kx, kp = jax.random.split(key)
    x = jax.random.normal(kx, (B, C, T_in, F), jnp.float32)
    params = init_params(kp, input_dim, hidden, output_dim, num_layers)

    out = seq2seq_forward(x, params, target_length)
    out = jax.block_until_ready(out)

    ref = seq2seq_reference(x, params, target_length)
    assert out.shape == (B, 3, target_length, output_dim // 3), out.shape
    assert jnp.allclose(out, ref, rtol=1e-2, atol=1e-2), float(jnp.max(jnp.abs(out - ref)))

    print("KERNEL_OK")
</pallas_src>

<mosaic_0001>
module attributes {stable_mosaic.version = 11 : i64} {
  func.func @kernel(%arg0: i32, %arg1: memref<16x128xbf16, #tpu.memory_space<vmem>>, %arg2: memref<128x128xbf16, #tpu.memory_space<vmem>>, %arg3: memref<1x128xf32, #tpu.memory_space<vmem>>, %arg4: memref<32x128xbf16, #tpu.memory_space<vmem>>, %arg5: memref<64x128xbf16, #tpu.memory_space<vmem>>, %arg6: memref<1x128xf32, #tpu.memory_space<vmem>>, %arg7: memref<32x128xbf16, #tpu.memory_space<vmem>>, %arg8: memref<64x128xbf16, #tpu.memory_space<vmem>>, %arg9: memref<1x128xf32, #tpu.memory_space<vmem>>, %arg10: memref<1x128xf32, #tpu.memory_space<vmem>>, %arg11: memref<64x128xbf16, #tpu.memory_space<vmem>>, %arg12: memref<1x128xf32, #tpu.memory_space<vmem>>, %arg13: memref<32x128xbf16, #tpu.memory_space<vmem>>, %arg14: memref<1x128xf32, #tpu.memory_space<vmem>>, %arg15: memref<12x128xf32, #tpu.memory_space<vmem>>) attributes {dimension_semantics = [#tpu.dimension_semantics<arbitrary>], iteration_bounds = array<i64: 1>, scalar_prefetch = 0 : i64, scratch_operands = 0 : i64, tpu.core_type = #tpu.core_type<tc>, window_params = [{pipeline_mode = #tpu.pipeline_mode<synchronous>, transform_indices = @transform_0, window_bounds = array<i64: 16, 128>}, {pipeline_mode = #tpu.pipeline_mode<synchronous>, transform_indices = @transform_1, window_bounds = array<i64: 128, 128>}, {pipeline_mode = #tpu.pipeline_mode<synchronous>, transform_indices = @transform_2, window_bounds = array<i64: 1, 128>}, {pipeline_mode = #tpu.pipeline_mode<synchronous>, transform_indices = @transform_3, window_bounds = array<i64: 32, 128>}, {pipeline_mode = #tpu.pipeline_mode<synchronous>, transform_indices = @transform_4, window_bounds = array<i64: 64, 128>}, {pipeline_mode = #tpu.pipeline_mode<synchronous>, transform_indices = @transform_5, window_bounds = array<i64: 1, 128>}, {pipeline_mode = #tpu.pipeline_mode<synchronous>, transform_indices = @transform_6, window_bounds = array<i64: 32, 128>}, {pipeline_mode = #tpu.pipeline_mode<synchronous>, transform_indices = @transform_7, window_bounds = array<i64: 64, 128>}, {pipeline_mode = #tpu.pipeline_mode<synchronous>, transform_indices = @transform_8, window_bounds = array<i64: 1, 128>}, {pipeline_mode = #tpu.pipeline_mode<synchronous>, transform_indices = @transform_9, window_bounds = array<i64: 1, 128>}, {pipeline_mode = #tpu.pipeline_mode<synchronous>, transform_indices = @transform_10, window_bounds = array<i64: 64, 128>}, {pipeline_mode = #tpu.pipeline_mode<synchronous>, transform_indices = @transform_11, window_bounds = array<i64: 1, 128>}, {pipeline_mode = #tpu.pipeline_mode<synchronous>, transform_indices = @transform_12, window_bounds = array<i64: 32, 128>}, {pipeline_mode = #tpu.pipeline_mode<synchronous>, transform_indices = @transform_13, window_bounds = array<i64: 1, 128>}, {pipeline_mode = #tpu.pipeline_mode<synchronous>, transform_indices = @transform_14, window_bounds = array<i64: 12, 128>}]} {
    %c0 = arith.constant 0 : index
    %c0_0 = arith.constant 0 : index
    %0 = vector.load %arg4[%c0, %c0_0] : memref<32x128xbf16, #tpu.memory_space<vmem>>, vector<32x128xbf16>
    %c0_1 = arith.constant 0 : index
    %c0_2 = arith.constant 0 : index
    %1 = vector.load %arg5[%c0_1, %c0_2] : memref<64x128xbf16, #tpu.memory_space<vmem>>, vector<64x128xbf16>
    %c0_3 = arith.constant 0 : index
    %c0_4 = arith.constant 0 : index
    %2 = vector.load %arg6[%c0_3, %c0_4] : memref<1x128xf32, #tpu.memory_space<vmem>>, vector<1x128xf32>
    %c0_5 = arith.constant 0 : index
    %c0_6 = arith.constant 0 : index
    %3 = vector.load %arg1[%c0_5, %c0_6] : memref<16x128xbf16, #tpu.memory_space<vmem>>, vector<16x128xbf16>
    %c0_7 = arith.constant 0 : index
    %c0_8 = arith.constant 0 : index
    %4 = vector.load %arg2[%c0_7, %c0_8] : memref<128x128xbf16, #tpu.memory_space<vmem>>, vector<128x128xbf16>
    %cst = arith.constant dense<0.000000e+00> : vector<16x128xf32>
    %5 = tpu.matmul %3, %4, %cst {dimension_numbers = #tpu.dot_dimension_numbers<[1], [0], [0], [1], [0, 0, 1, 1], [], []>} : vector<16x128xbf16>, vector<128x128xbf16>, vector<16x128xf32> -> vector<16x128xf32>
    %c0_9 = arith.constant 0 : index
    %c0_10 = arith.constant 0 : index
    %6 = vector.load %arg3[%c0_9, %c0_10] : memref<1x128xf32, #tpu.memory_space<vmem>>, vector<1x128xf32>
    %7 = vector.broadcast %6 : vector<1x128xf32> to vector<16x128xf32>
    %8 = arith.addf %5, %7 : vector<16x128xf32>
    %cst_11 = arith.constant 0.000000e+00 : f32
    %9 = vector.broadcast %cst_11 : f32 to vector<2x32xf32>
    %cst_12 = arith.constant 0.000000e+00 : f32
    %10 = vector.broadcast %cst_12 : f32 to vector<2x32xf32>
    %cst_13 = arith.constant 0.000000e+00 : f32
    %11 = vector.broadcast %cst_13 : f32 to vector<2x32xf32>
    %cst_14 = arith.constant 0.000000e+00 : f32
    %12 = vector.broadcast %cst_14 : f32 to vector<2x32xf32>
    %13 = vector.extract_strided_slice %8 {offsets = [0, 0], sizes = [2, 128], strides = [1, 1]} : vector<16x128xf32> to vector<2x128xf32>
    %14 = arith.truncf %9 : vector<2x32xf32> to vector<2x32xbf16>
    %cst_15 = arith.constant dense<0.000000e+00> : vector<2x128xf32>
    %15 = tpu.matmul %14, %0, %cst_15 {dimension_numbers = #tpu.dot_dimension_numbers<[1], [0], [0], [1], [0, 0, 1, 1], [], []>} : vector<2x32xbf16>, vector<32x128xbf16>, vector<2x128xf32> -> vector<2x128xf32>
    %16 = arith.addf %13, %15 : vector<2x128xf32>
    %17 = arith.negf %16 : vector<2x128xf32>
    %18 = math.exp %17 : vector<2x128xf32>
    %cst_16 = arith.constant 1.000000e+00 : f32
    %19 = vector.broadcast %cst_16 : f32 to vector<2x128xf32>
    %20 = arith.addf %19, %18 : vector<2x128xf32>
    %21 = arith.divf %19, %20 : vector<2x128xf32>
    %22 = math.tanh %16 : vector<2x128xf32>
    %23 = vector.extract_strided_slice %21 {offsets = [0, 0], sizes = [2, 32], strides = [1, 1]} : vector<2x128xf32> to vector<2x32xf32>
    %24 = vector.extract_strided_slice %21 {offsets = [0, 32], sizes = [2, 32], strides = [1, 1]} : vector<2x128xf32> to vector<2x32xf32>
    %25 = vector.extract_strided_slice %22 {offsets = [0, 64], sizes = [2, 32], strides = [1, 1]} : vector<2x128xf32> to vector<2x32xf32>
    %26 = vector.extract_strided_slice %21 {offsets = [0, 96], sizes = [2, 32], strides = [1, 1]} : vector<2x128xf32> to vector<2x32xf32>
    %27 = arith.mulf %24, %11 : vector<2x32xf32>
    %28 = arith.mulf %23, %25 : vector<2x32xf32>
    %29 = arith.addf %27, %28 : vector<2x32xf32>
    %30 = math.tanh %29 : vector<2x32xf32>
    %31 = arith.mulf %26, %30 : vector<2x32xf32>
    %32 = tpu.concatenate %31, %10 in 1 : vector<2x32xf32>, vector<2x32xf32> -> vector<2x64xf32>
    %33 = arith.truncf %32 : vector<2x64xf32> to vector<2x64xbf16>
    %cst_17 = arith.constant dense<0.000000e+00> : vector<2x128xf32>
    %34 = tpu.matmul %33, %1, %cst_17 {dimension_numbers = #tpu.dot_dimension_numbers<[1], [0], [0], [1], [0, 0, 1, 1], [], []>} : vector<2x64xbf16>, vector<64x128xbf16>, vector<2x128xf32> -> vector<2x128xf32>
    %35 = vector.broadcast %2 : vector<1x128xf32> to vector<2x128xf32>
    %36 = arith.addf %34, %35 : vector<2x128xf32>
    %37 = arith.negf %36 : vector<2x128xf32>
    %38 = math.exp %37 : vector<2x128xf32>
    %cst_18 = arith.constant 1.000000e+00 : f32
    %39 = vector.broadcast %cst_18 : f32 to vector<2x128xf32>
    %40 = arith.addf %39, %38 : vector<2x128xf32>
    %41 = arith.divf %39, %40 : vector<2x128xf32>
    %42 = math.tanh %36 : vector<2x128xf32>
    %43 = vector.extract_strided_slice %41 {offsets = [0, 0], sizes = [2, 32], strides = [1, 1]} : vector<2x128xf32> to vector<2x32xf32>
    %44 = vector.extract_strided_slice %41 {offsets = [0, 32], sizes = [2, 32], strides = [1, 1]} : vector<2x128xf32> to vector<2x32xf32>
    %45 = vector.extract_strided_slice %42 {offsets = [0, 64], sizes = [2, 32], strides = [1, 1]} : vector<2x128xf32> to vector<2x32xf32>
    %46 = vector.extract_strided_slice %41 {offsets = [0, 96], sizes = [2, 32], strides = [1, 1]} : vector<2x128xf32> to vector<2x32xf32>
    %47 = arith.mulf %44, %12 : vector<2x32xf32>
    %48 = arith.mulf %43, %45 : vector<2x32xf32>
    %49 = arith.addf %47, %48 : vector<2x32xf32>
    %50 = math.tanh %49 : vector<2x32xf32>
    %51 = arith.mulf %46, %50 : vector<2x32xf32>
    %52 = vector.extract_strided_slice %8 {offsets = [2, 0], sizes = [2, 128], strides = [1, 1]} : vector<16x128xf32> to vector<2x128xf32>
    %53 = arith.truncf %31 : vector<2x32xf32> to vector<2x32xbf16>
    %cst_19 = arith.constant dense<0.000000e+00> : vector<2x128xf32>
    %54 = tpu.matmul %53, %0, %cst_19 {dimension_numbers = #tpu.dot_dimension_numbers<[1], [0], [0], [1], [0, 0, 1, 1], [], []>} : vector<2x32xbf16>, vector<32x128xbf16>, vector<2x128xf32> -> vector<2x128xf32>
    %55 = arith.addf %52, %54 : vector<2x128xf32>
    %56 = arith.negf %55 : vector<2x128xf32>
    %57 = math.exp %56 : vector<2x128xf32>
    %cst_20 = arith.constant 1.000000e+00 : f32
    %58 = vector.broadcast %cst_20 : f32 to vector<2x128xf32>
    %59 = arith.addf %58, %57 : vector<2x128xf32>
    %60 = arith.divf %58, %59 : vector<2x128xf32>
    %61 = math.tanh %55 : vector<2x128xf32>
    %62 = vector.extract_strided_slice %60 {offsets = [0, 0], sizes = [2, 32], strides = [1, 1]} : vector<2x128xf32> to vector<2x32xf32>
    %63 = vector.extract_strided_slice %60 {offsets = [0, 32], sizes = [2, 32], strides = [1, 1]} : vector<2x128xf32> to vector<2x32xf32>
    %64 = vector.extract_strided_slice %61 {offsets = [0, 64], sizes = [2, 32], strides = [1, 1]} : vector<2x128xf32> to vector<2x32xf32>
    %65 = vector.extract_strided_slice %60 {offsets = [0, 96], sizes = [2, 32], strides = [1, 1]} : vector<2x128xf32> to vector<2x32xf32>
    %66 = arith.mulf %63, %29 : vector<2x32xf32>
    %67 = arith.mulf %62, %64 : vector<2x32xf32>
    %68 = arith.addf %66, %67 : vector<2x32xf32>
    %69 = math.tanh %68 : vector<2x32xf32>
    %70 = arith.mulf %65, %69 : vector<2x32xf32>
    %71 = tpu.concatenate %70, %51 in 1 : vector<2x32xf32>, vector<2x32xf32> -> vector<2x64xf32>
    %72 = arith.truncf %71 : vector<2x64xf32> to vector<2x64xbf16>
    %cst_21 = arith.constant dense<0.000000e+00> : vector<2x128xf32>
    %73 = tpu.matmul %72, %1, %cst_21 {dimension_numbers = #tpu.dot_dimension_numbers<[1], [0], [0], [1], [0, 0, 1, 1], [], []>} : vector<2x64xbf16>, vector<64x128xbf16>, vector<2x128xf32> -> vector<2x128xf32>
    %74 = vector.broadcast %2 : vector<1x128xf32> to vector<2x128xf32>
    %75 = arith.addf %73, %74 : vector<2x128xf32>
    %76 = arith.negf %75 : vector<2x128xf32>
    %77 = math.exp %76 : vector<2x128xf32>
    %cst_22 = arith.constant 1.000000e+00 : f32
    %78 = vector.broadcast %cst_22 : f32 to vector<2x128xf32>
    %79 = arith.addf %78, %77 : vector<2x128xf32>
    %80 = arith.divf %78, %79 : vector<2x128xf32>
    %81 = math.tanh %75 : vector<2x128xf32>
    %82 = vector.extract_strided_slice %80 {offsets = [0, 0], sizes = [2, 32], strides = [1, 1]} : vector<2x128xf32> to vector<2x32xf32>
    %83 = vector.extract_strided_slice %80 {offsets = [0, 32], sizes = [2, 32], strides = [1, 1]} : vector<2x128xf32> to vector<2x32xf32>
    %84 = vector.extract_strided_slice %81 {offsets = [0, 64], sizes = [2, 32], strides = [1, 1]} : vector<2x128xf32> to vector<2x32xf32>
    %85 = vector.extract_strided_slice %80 {offsets = [0, 96], sizes = [2, 32], strides = [1, 1]} : vector<2x128xf32> to vector<2x32xf32>
    %86 = arith.mulf %83, %49 : vector<2x32xf32>
    %87 = arith.mulf %82, %84 : vector<2x32xf32>
    %88 = arith.addf %86, %87 : vector<2x32xf32>
    %89 = math.tanh %88 : vector<2x32xf32>
    %90 = arith.mulf %85, %89 : vector<2x32xf32>
    %91 = vector.extract_strided_slice %8 {offsets = [4, 0], sizes = [2, 128], strides = [1, 1]} : vector<16x128xf32> to vector<2x128xf32>
    %92 = arith.truncf %70 : vector<2x32xf32> to vector<2x32xbf16>
    %cst_23 = arith.constant dense<0.000000e+00> : vector<2x128xf32>
    %93 = tpu.matmul %92, %0, %cst_23 {dimension_numbers = #tpu.dot_dimension_numbers<[1], [0], [0], [1], [0, 0, 1, 1], [], []>} : vector<2x32xbf16>, vector<32x128xbf16>, vector<2x128xf32> -> vector<2x128xf32>
    %94 = arith.addf %91, %93 : vector<2x128xf32>
    %95 = arith.negf %94 : vector<2x128xf32>
    %96 = math.exp %95 : vector<2x128xf32>
    %cst_24 = arith.constant 1.000000e+00 : f32
    %97 = vector.broadcast %cst_24 : f32 to vector<2x128xf32>
    %98 = arith.addf %97, %96 : vector<2x128xf32>
    %99 = arith.divf %97, %98 : vector<2x128xf32>
    %100 = math.tanh %94 : vector<2x128xf32>
    %101 = vector.extract_strided_slice %99 {offsets = [0, 0], sizes = [2, 32], strides = [1, 1]} : vector<2x128xf32> to vector<2x32xf32>
    %102 = vector.extract_strided_slice %99 {offsets = [0, 32], sizes = [2, 32], strides = [1, 1]} : vector<2x128xf32> to vector<2x32xf32>
    %103 = vector.extract_strided_slice %100 {offsets = [0, 64], sizes = [2, 32], strides = [1, 1]} : vector<2x128xf32> to vector<2x32xf32>
    %104 = vector.extract_strided_slice %99 {offsets = [0, 96], sizes = [2, 32], strides = [1, 1]} : vector<2x128xf32> to vector<2x32xf32>
    %105 = arith.mulf %102, %68 : vector<2x32xf32>
    %106 = arith.mulf %101, %103 : vector<2x32xf32>
    %107 = arith.addf %105, %106 : vector<2x32xf32>
    %108 = math.tanh %107 : vector<2x32xf32>
    %109 = arith.mulf %104, %108 : vector<2x32xf32>
    %110 = tpu.concatenate %109, %90 in 1 : vector<2x32xf32>, vector<2x32xf32> -> vector<2x64xf32>
    %111 = arith.truncf %110 : vector<2x64xf32> to vector<2x64xbf16>
    %cst_25 = arith.constant dense<0.000000e+00> : vector<2x128xf32>
    %112 = tpu.matmul %111, %1, %cst_25 {dimension_numbers = #tpu.dot_dimension_numbers<[1], [0], [0], [1], [0, 0, 1, 1], [], []>} : vector<2x64xbf16>, vector<64x128xbf16>, vector<2x128xf32> -> vector<2x128xf32>
    %113 = vector.broadcast %2 : vector<1x128xf32> to vector<2x128xf32>
    %114 = arith.addf %112, %113 : vector<2x128xf32>
    %115 = arith.negf %114 : vector<2x128xf32>
    %116 = math.exp %115 : vector<2x128xf32>
    %cst_26 = arith.constant 1.000000e+00 : f32
    %117 = vector.broadcast %cst_26 : f32 to vector<2x128xf32>
    %118 = arith.addf %117, %116 : vector<2x128xf32>
    %119 = arith.divf %117, %118 : vector<2x128xf32>
    %120 = math.tanh %114 : vector<2x128xf32>
    %121 = vector.extract_strided_slice %119 {offsets = [0, 0], sizes = [2, 32], strides = [1, 1]} : vector<2x128xf32> to vector<2x32xf32>
    %122 = vector.extract_strided_slice %119 {offsets = [0, 32], sizes = [2, 32], strides = [1, 1]} : vector<2x128xf32> to vector<2x32xf32>
    %123 = vector.extract_strided_slice %120 {offsets = [0, 64], sizes = [2, 32], strides = [1, 1]} : vector<2x128xf32> to vector<2x32xf32>
    %124 = vector.extract_strided_slice %119 {offsets = [0, 96], sizes = [2, 32], strides = [1, 1]} : vector<2x128xf32> to vector<2x32xf32>
    %125 = arith.mulf %122, %88 : vector<2x32xf32>
    %126 = arith.mulf %121, %123 : vector<2x32xf32>
    %127 = arith.addf %125, %126 : vector<2x32xf32>
    %128 = math.tanh %127 : vector<2x32xf32>
    %129 = arith.mulf %124, %128 : vector<2x32xf32>
    %130 = vector.extract_strided_slice %8 {offsets = [6, 0], sizes = [2, 128], strides = [1, 1]} : vector<16x128xf32> to vector<2x128xf32>
    %131 = arith.truncf %109 : vector<2x32xf32> to vector<2x32xbf16>
    %cst_27 = arith.constant dense<0.000000e+00> : vector<2x128xf32>
    %132 = tpu.matmul %131, %0, %cst_27 {dimension_numbers = #tpu.dot_dimension_numbers<[1], [0], [0], [1], [0, 0, 1, 1], [], []>} : vector<2x32xbf16>, vector<32x128xbf16>, vector<2x128xf32> -> vector<2x128xf32>
    %133 = arith.addf %130, %132 : vector<2x128xf32>
    %134 = arith.negf %133 : vector<2x128xf32>
    %135 = math.exp %134 : vector<2x128xf32>
    %cst_28 = arith.constant 1.000000e+00 : f32
    %136 = vector.broadcast %cst_28 : f32 to vector<2x128xf32>
    %137 = arith.addf %136, %135 : vector<2x128xf32>
    %138 = arith.divf %136, %137 : vector<2x128xf32>
    %139 = math.tanh %133 : vector<2x128xf32>
    %140 = vector.extract_strided_slice %138 {offsets = [0, 0], sizes = [2, 32], strides = [1, 1]} : vector<2x128xf32> to vector<2x32xf32>
    %141 = vector.extract_strided_slice %138 {offsets = [0, 32], sizes = [2, 32], strides = [1, 1]} : vector<2x128xf32> to vector<2x32xf32>
    %142 = vector.extract_strided_slice %139 {offsets = [0, 64], sizes = [2, 32], strides = [1, 1]} : vector<2x128xf32> to vector<2x32xf32>
    %143 = vector.extract_strided_slice %138 {offsets = [0, 96], sizes = [2, 32], strides = [1, 1]} : vector<2x128xf32> to vector<2x32xf32>
    %144 = arith.mulf %141, %107 : vector<2x32xf32>
    %145 = arith.mulf %140, %142 : vector<2x32xf32>
    %146 = arith.addf %144, %145 : vector<2x32xf32>
    %147 = math.tanh %146 : vector<2x32xf32>
    %148 = arith.mulf %143, %147 : vector<2x32xf32>
    %149 = tpu.concatenate %148, %129 in 1 : vector<2x32xf32>, vector<2x32xf32> -> vector<2x64xf32>
    %150 = arith.truncf %149 : vector<2x64xf32> to vector<2x64xbf16>
    %cst_29 = arith.constant dense<0.000000e+00> : vector<2x128xf32>
    %151 = tpu.matmul %150, %1, %cst_29 {dimension_numbers = #tpu.dot_dimension_numbers<[1], [0], [0], [1], [0, 0, 1, 1], [], []>} : vector<2x64xbf16>, vector<64x128xbf16>, vector<2x128xf32> -> vector<2x128xf32>
    %152 = vector.broadcast %2 : vector<1x128xf32> to vector<2x128xf32>
    %153 = arith.addf %151, %152 : vector<2x128xf32>
    %154 = arith.negf %153 : vector<2x128xf32>
    %155 = math.exp %154 : vector<2x128xf32>
    %cst_30 = arith.constant 1.000000e+00 : f32
    %156 = vector.broadcast %cst_30 : f32 to vector<2x128xf32>
    %157 = arith.addf %156, %155 : vector<2x128xf32>
    %158 = arith.divf %156, %157 : vector<2x128xf32>
    %159 = math.tanh %153 : vector<2x128xf32>
    %160 = vector.extract_strided_slice %158 {offsets = [0, 0], sizes = [2, 32], strides = [1, 1]} : vector<2x128xf32> to vector<2x32xf32>
    %161 = vector.extract_strided_slice %158 {offsets = [0, 32], sizes = [2, 32], strides = [1, 1]} : vector<2x128xf32> to vector<2x32xf32>
    %162 = vector.extract_strided_slice %159 {offsets = [0, 64], sizes = [2, 32], strides = [1, 1]} : vector<2x128xf32> to vector<2x32xf32>
    %163 = vector.extract_strided_slice %158 {offsets = [0, 96], sizes = [2, 32], strides = [1, 1]} : vector<2x128xf32> to vector<2x32xf32>
    %164 = arith.mulf %161, %127 : vector<2x32xf32>
    %165 = arith.mulf %160, %162 : vector<2x32xf32>
    %166 = arith.addf %164, %165 : vector<2x32xf32>
    %167 = math.tanh %166 : vector<2x32xf32>
    %168 = arith.mulf %163, %167 : vector<2x32xf32>
    %169 = vector.extract_strided_slice %8 {offsets = [8, 0], sizes = [2, 128], strides = [1, 1]} : vector<16x128xf32> to vector<2x128xf32>
    %170 = arith.truncf %148 : vector<2x32xf32> to vector<2x32xbf16>
    %cst_31 = arith.constant dense<0.000000e+00> : vector<2x128xf32>
    %171 = tpu.matmul %170, %0, %cst_31 {dimension_numbers = #tpu.dot_dimension_numbers<[1], [0], [0], [1], [0, 0, 1, 1], [], []>} : vector<2x32xbf16>, vector<32x128xbf16>, vector<2x128xf32> -> vector<2x128xf32>
    %172 = arith.addf %169, %171 : vector<2x128xf32>
    %173 = arith.negf %172 : vector<2x128xf32>
    %174 = math.exp %173 : vector<2x128xf32>
    %cst_32 = arith.constant 1.000000e+00 : f32
    %175 = vector.broadcast %cst_32 : f32 to vector<2x128xf32>
    %176 = arith.addf %175, %174 : vector<2x128xf32>
    %177 = arith.divf %175, %176 : vector<2x128xf32>
    %178 = math.tanh %172 : vector<2x128xf32>
    %179 = vector.extract_strided_slice %177 {offsets = [0, 0], sizes = [2, 32], strides = [1, 1]} : vector<2x128xf32> to vector<2x32xf32>
    %180 = vector.extract_strided_slice %177 {offsets = [0, 32], sizes = [2, 32], strides = [1, 1]} : vector<2x128xf32> to vector<2x32xf32>
    %181 = vector.extract_strided_slice %178 {offsets = [0, 64], sizes = [2, 32], strides = [1, 1]} : vector<2x128xf32> to vector<2x32xf32>
    %182 = vector.extract_strided_slice %177 {offsets = [0, 96], sizes = [2, 32], strides = [1, 1]} : vector<2x128xf32> to vector<2x32xf32>
    %183 = arith.mulf %180, %146 : vector<2x32xf32>
    %184 = arith.mulf %179, %181 : vector<2x32xf32>
    %185 = arith.addf %183, %184 : vector<2x32xf32>
    %186 = math.tanh %185 : vector<2x32xf32>
    %187 = arith.mulf %182, %186 : vector<2x32xf32>
    %188 = tpu.concatenate %187, %168 in 1 : vector<2x32xf32>, vector<2x32xf32> -> vector<2x64xf32>
    %189 = arith.truncf %188 : vector<2x64xf32> to vector<2x64xbf16>
    %cst_33 = arith.constant dense<0.000000e+00> : vector<2x128xf32>
    %190 = tpu.matmul %189, %1, %cst_33 {dimension_numbers = #tpu.dot_dimension_numbers<[1], [0], [0], [1], [0, 0, 1, 1], [], []>} : vector<2x64xbf16>, vector<64x128xbf16>, vector<2x128xf32> -> vector<2x128xf32>
    %191 = vector.broadcast %2 : vector<1x128xf32> to vector<2x128xf32>
    %192 = arith.addf %190, %191 : vector<2x128xf32>
    %193 = arith.negf %192 : vector<2x128xf32>
    %194 = math.exp %193 : vector<2x128xf32>
    %cst_34 = arith.constant 1.000000e+00 : f32
    %195 = vector.broadcast %cst_34 : f32 to vector<2x128xf32>
    %196 = arith.addf %195, %194 : vector<2x128xf32>
    %197 = arith.divf %195, %196 : vector<2x128xf32>
    %198 = math.tanh %192 : vector<2x128xf32>
    %199 = vector.extract_strided_slice %197 {offsets = [0, 0], sizes = [2, 32], strides = [1, 1]} : vector<2x128xf32> to vector<2x32xf32>
    %200 = vector.extract_strided_slice %197 {offsets = [0, 32], sizes = [2, 32], strides = [1, 1]} : vector<2x128xf32> to vector<2x32xf32>
    %201 = vector.extract_strided_slice %198 {offsets = [0, 64], sizes = [2, 32], strides = [1, 1]} : vector<2x128xf32> to vector<2x32xf32>
    %202 = vector.extract_strided_slice %197 {offsets = [0, 96], sizes = [2, 32], strides = [1, 1]} : vector<2x128xf32> to vector<2x32xf32>
    %203 = arith.mulf %200, %166 : vector<2x32xf32>
    %204 = arith.mulf %199, %201 : vector<2x32xf32>
    %205 = arith.addf %203, %204 : vector<2x32xf32>
    %206 = math.tanh %205 : vector<2x32xf32>
    %207 = arith.mulf %202, %206 : vector<2x32xf32>
    %208 = vector.extract_strided_slice %8 {offsets = [10, 0], sizes = [2, 128], strides = [1, 1]} : vector<16x128xf32> to vector<2x128xf32>
    %209 = arith.truncf %187 : vector<2x32xf32> to vector<2x32xbf16>
    %cst_35 = arith.constant dense<0.000000e+00> : vector<2x128xf32>
    %210 = tpu.matmul %209, %0, %cst_35 {dimension_numbers = #tpu.dot_dimension_numbers<[1], [0], [0], [1], [0, 0, 1, 1], [], []>} : vector<2x32xbf16>, vector<32x128xbf16>, vector<2x128xf32> -> vector<2x128xf32>
    %211 = arith.addf %208, %210 : vector<2x128xf32>
    %212 = arith.negf %211 : vector<2x128xf32>
    %213 = math.exp %212 : vector<2x128xf32>
    %cst_36 = arith.constant 1.000000e+00 : f32
    %214 = vector.broadcast %cst_36 : f32 to vector<2x128xf32>
    %215 = arith.addf %214, %213 : vector<2x128xf32>
    %216 = arith.divf %214, %215 : vector<2x128xf32>
    %217 = math.tanh %211 : vector<2x128xf32>
    %218 = vector.extract_strided_slice %216 {offsets = [0, 0], sizes = [2, 32], strides = [1, 1]} : vector<2x128xf32> to vector<2x32xf32>
    %219 = vector.extract_strided_slice %216 {offsets = [0, 32], sizes = [2, 32], strides = [1, 1]} : vector<2x128xf32> to vector<2x32xf32>
    %220 = vector.extract_strided_slice %217 {offsets = [0, 64], sizes = [2, 32], strides = [1, 1]} : vector<2x128xf32> to vector<2x32xf32>
    %221 = vector.extract_strided_slice %216 {offsets = [0, 96], sizes = [2, 32], strides = [1, 1]} : vector<2x128xf32> to vector<2x32xf32>
    %222 = arith.mulf %219, %185 : vector<2x32xf32>
    %223 = arith.mulf %218, %220 : vector<2x32xf32>
    %224 = arith.addf %222, %223 : vector<2x32xf32>
    %225 = math.tanh %224 : vector<2x32xf32>
    %226 = arith.mulf %221, %225 : vector<2x32xf32>
    %227 = tpu.concatenate %226, %207 in 1 : vector<2x32xf32>, vector<2x32xf32> -> vector<2x64xf32>
    %228 = arith.truncf %227 : vector<2x64xf32> to vector<2x64xbf16>
    %cst_37 = arith.constant dense<0.000000e+00> : vector<2x128xf32>
    %229 = tpu.matmul %228, %1, %cst_37 {dimension_numbers = #tpu.dot_dimension_numbers<[1], [0], [0], [1], [0, 0, 1, 1], [], []>} : vector<2x64xbf16>, vector<64x128xbf16>, vector<2x128xf32> -> vector<2x128xf32>
    %230 = vector.broadcast %2 : vector<1x128xf32> to vector<2x128xf32>
    %231 = arith.addf %229, %230 : vector<2x128xf32>
    %232 = arith.negf %231 : vector<2x128xf32>
    %233 = math.exp %232 : vector<2x128xf32>
    %cst_38 = arith.constant 1.000000e+00 : f32
    %234 = vector.broadcast %cst_38 : f32 to vector<2x128xf32>
    %235 = arith.addf %234, %233 : vector<2x128xf32>
    %236 = arith.divf %234, %235 : vector<2x128xf32>
    %237 = math.tanh %231 : vector<2x128xf32>
    %238 = vector.extract_strided_slice %236 {offsets = [0, 0], sizes = [2, 32], strides = [1, 1]} : vector<2x128xf32> to vector<2x32xf32>
    %239 = vector.extract_strided_slice %236 {offsets = [0, 32], sizes = [2, 32], strides = [1, 1]} : vector<2x128xf32> to vector<2x32xf32>
    %240 = vector.extract_strided_slice %237 {offsets = [0, 64], sizes = [2, 32], strides = [1, 1]} : vector<2x128xf32> to vector<2x32xf32>
    %241 = vector.extract_strided_slice %236 {offsets = [0, 96], sizes = [2, 32], strides = [1, 1]} : vector<2x128xf32> to vector<2x32xf32>
    %242 = arith.mulf %239, %205 : vector<2x32xf32>
    %243 = arith.mulf %238, %240 : vector<2x32xf32>
    %244 = arith.addf %242, %243 : vector<2x32xf32>
    %245 = math.tanh %244 : vector<2x32xf32>
    %246 = arith.mulf %241, %245 : vector<2x32xf32>
    %247 = vector.extract_strided_slice %8 {offsets = [12, 0], sizes = [2, 128], strides = [1, 1]} : vector<16x128xf32> to vector<2x128xf32>
    %248 = arith.truncf %226 : vector<2x32xf32> to vector<2x32xbf16>
    %cst_39 = arith.constant dense<0.000000e+00> : vector<2x128xf32>
    %249 = tpu.matmul %248, %0, %cst_39 {dimension_numbers = #tpu.dot_dimension_numbers<[1], [0], [0], [1], [0, 0, 1, 1], [], []>} : vector<2x32xbf16>, vector<32x128xbf16>, vector<2x128xf32> -> vector<2x128xf32>
    %250 = arith.addf %247, %249 : vector<2x128xf32>
    %251 = arith.negf %250 : vector<2x128xf32>
    %252 = math.exp %251 : vector<2x128xf32>
    %cst_40 = arith.constant 1.000000e+00 : f32
    %253 = vector.broadcast %cst_40 : f32 to vector<2x128xf32>
    %254 = arith.addf %253, %252 : vector<2x128xf32>
    %255 = arith.divf %253, %254 : vector<2x128xf32>
    %256 = math.tanh %250 : vector<2x128xf32>
    %257 = vector.extract_strided_slice %255 {offsets = [0, 0], sizes = [2, 32], strides = [1, 1]} : vector<2x128xf32> to vector<2x32xf32>
    %258 = vector.extract_strided_slice %255 {offsets = [0, 32], sizes = [2, 32], strides = [1, 1]} : vector<2x128xf32> to vector<2x32xf32>
    %259 = vector.extract_strided_slice %256 {offsets = [0, 64], sizes = [2, 32], strides = [1, 1]} : vector<2x128xf32> to vector<2x32xf32>
    %260 = vector.extract_strided_slice %255 {offsets = [0, 96], sizes = [2, 32], strides = [1, 1]} : vector<2x128xf32> to vector<2x32xf32>
    %261 = arith.mulf %258, %224 : vector<2x32xf32>
    %262 = arith.mulf %257, %259 : vector<2x32xf32>
    %263 = arith.addf %261, %262 : vector<2x32xf32>
    %264 = math.tanh %263 : vector<2x32xf32>
    %265 = arith.mulf %260, %264 : vector<2x32xf32>
    %266 = tpu.concatenate %265, %246 in 1 : vector<2x32xf32>, vector<2x32xf32> -> vector<2x64xf32>
    %267 = arith.truncf %266 : vector<2x64xf32> to vector<2x64xbf16>
    %cst_41 = arith.constant dense<0.000000e+00> : vector<2x128xf32>
    %268 = tpu.matmul %267, %1, %cst_41 {dimension_numbers = #tpu.dot_dimension_numbers<[1], [0], [0], [1], [0, 0, 1, 1], [], []>} : vector<2x64xbf16>, vector<64x128xbf16>, vector<2x128xf32> -> vector<2x128xf32>
    %269 = vector.broadcast %2 : vector<1x128xf32> to vector<2x128xf32>
    %270 = arith.addf %268, %269 : vector<2x128xf32>
    %271 = arith.negf %270 : vector<2x128xf32>
    %272 = math.exp %271 : vector<2x128xf32>
    %cst_42 = arith.constant 1.000000e+00 : f32
    %273 = vector.broadcast %cst_42 : f32 to vector<2x128xf32>
    %274 = arith.addf %273, %272 : vector<2x128xf32>
    %275 = arith.divf %273, %274 : vector<2x128xf32>
    %276 = math.tanh %270 : vector<2x128xf32>
    %277 = vector.extract_strided_slice %275 {offsets = [0, 0], sizes = [2, 32], strides = [1, 1]} : vector<2x128xf32> to vector<2x32xf32>
    %278 = vector.extract_strided_slice %275 {offsets = [0, 32], sizes = [2, 32], strides = [1, 1]} : vector<2x128xf32> to vector<2x32xf32>
    %279 = vector.extract_strided_slice %276 {offsets = [0, 64], sizes = [2, 32], strides = [1, 1]} : vector<2x128xf32> to vector<2x32xf32>
    %280 = vector.extract_strided_slice %275 {offsets = [0, 96], sizes = [2, 32], strides = [1, 1]} : vector<2x128xf32> to vector<2x32xf32>
    %281 = arith.mulf %278, %244 : vector<2x32xf32>
    %282 = arith.mulf %277, %279 : vector<2x32xf32>
    %283 = arith.addf %281, %282 : vector<2x32xf32>
    %284 = math.tanh %283 : vector<2x32xf32>
    %285 = arith.mulf %280, %284 : vector<2x32xf32>
    %286 = vector.extract_strided_slice %8 {offsets = [14, 0], sizes = [2, 128], strides = [1, 1]} : vector<16x128xf32> to vector<2x128xf32>
    %287 = arith.truncf %265 : vector<2x32xf32> to vector<2x32xbf16>
    %cst_43 = arith.constant dense<0.000000e+00> : vector<2x128xf32>
    %288 = tpu.matmul %287, %0, %cst_43 {dimension_numbers = #tpu.dot_dimension_numbers<[1], [0], [0], [1], [0, 0, 1, 1], [], []>} : vector<2x32xbf16>, vector<32x128xbf16>, vector<2x128xf32> -> vector<2x128xf32>
    %289 = arith.addf %286, %288 : vector<2x128xf32>
    %290 = arith.negf %289 : vector<2x128xf32>
    %291 = math.exp %290 : vector<2x128xf32>
    %cst_44 = arith.constant 1.000000e+00 : f32
    %292 = vector.broadcast %cst_44 : f32 to vector<2x128xf32>
    %293 = arith.addf %292, %291 : vector<2x128xf32>
    %294 = arith.divf %292, %293 : vector<2x128xf32>
    %295 = math.tanh %289 : vector<2x128xf32>
    %296 = vector.extract_strided_slice %294 {offsets = [0, 0], sizes = [2, 32], strides = [1, 1]} : vector<2x128xf32> to vector<2x32xf32>
    %297 = vector.extract_strided_slice %294 {offsets = [0, 32], sizes = [2, 32], strides = [1, 1]} : vector<2x128xf32> to vector<2x32xf32>
    %298 = vector.extract_strided_slice %295 {offsets = [0, 64], sizes = [2, 32], strides = [1, 1]} : vector<2x128xf32> to vector<2x32xf32>
    %299 = vector.extract_strided_slice %294 {offsets = [0, 96], sizes = [2, 32], strides = [1, 1]} : vector<2x128xf32> to vector<2x32xf32>
    %300 = arith.mulf %297, %263 : vector<2x32xf32>
    %301 = arith.mulf %296, %298 : vector<2x32xf32>
    %302 = arith.addf %300, %301 : vector<2x32xf32>
    %303 = math.tanh %302 : vector<2x32xf32>
    %304 = arith.mulf %299, %303 : vector<2x32xf32>
    %305 = tpu.concatenate %304, %285 in 1 : vector<2x32xf32>, vector<2x32xf32> -> vector<2x64xf32>
    %306 = arith.truncf %305 : vector<2x64xf32> to vector<2x64xbf16>
    %cst_45 = arith.constant dense<0.000000e+00> : vector<2x128xf32>
    %307 = tpu.matmul %306, %1, %cst_45 {dimension_numbers = #tpu.dot_dimension_numbers<[1], [0], [0], [1], [0, 0, 1, 1], [], []>} : vector<2x64xbf16>, vector<64x128xbf16>, vector<2x128xf32> -> vector<2x128xf32>
    %308 = vector.broadcast %2 : vector<1x128xf32> to vector<2x128xf32>
    %309 = arith.addf %307, %308 : vector<2x128xf32>
    %310 = arith.negf %309 : vector<2x128xf32>
    %311 = math.exp %310 : vector<2x128xf32>
    %cst_46 = arith.constant 1.000000e+00 : f32
    %312 = vector.broadcast %cst_46 : f32 to vector<2x128xf32>
    %313 = arith.addf %312, %311 : vector<2x128xf32>
    %314 = arith.divf %312, %313 : vector<2x128xf32>
    %315 = math.tanh %309 : vector<2x128xf32>
    %316 = vector.extract_strided_slice %314 {offsets = [0, 0], sizes = [2, 32], strides = [1, 1]} : vector<2x128xf32> to vector<2x32xf32>
    %317 = vector.extract_strided_slice %314 {offsets = [0, 32], sizes = [2, 32], strides = [1, 1]} : vector<2x128xf32> to vector<2x32xf32>
    %318 = vector.extract_strided_slice %315 {offsets = [0, 64], sizes = [2, 32], strides = [1, 1]} : vector<2x128xf32> to vector<2x32xf32>
    %319 = vector.extract_strided_slice %314 {offsets = [0, 96], sizes = [2, 32], strides = [1, 1]} : vector<2x128xf32> to vector<2x32xf32>
    %320 = arith.mulf %317, %283 : vector<2x32xf32>
    %321 = arith.mulf %316, %318 : vector<2x32xf32>
    %322 = arith.addf %320, %321 : vector<2x32xf32>
    %323 = math.tanh %322 : vector<2x32xf32>
    %324 = arith.mulf %319, %323 : vector<2x32xf32>
    %c0_47 = arith.constant 0 : index
    %c0_48 = arith.constant 0 : index
    %325 = vector.load %arg7[%c0_47, %c0_48] : memref<32x128xbf16, #tpu.memory_space<vmem>>, vector<32x128xbf16>
    %c0_49 = arith.constant 0 : index
    %c0_50 = arith.constant 0 : index
    %326 = vector.load %arg8[%c0_49, %c0_50] : memref<64x128xbf16, #tpu.memory_space<vmem>>, vector<64x128xbf16>
    %c0_51 = arith.constant 0 : index
    %c0_52 = arith.constant 0 : index
    %327 = vector.load %arg9[%c0_51, %c0_52] : memref<1x128xf32, #tpu.memory_space<vmem>>, vector<1x128xf32>
    %c0_53 = arith.constant 0 : index
    %c0_54 = arith.constant 0 : index
    %328 = vector.load %arg10[%c0_53, %c0_54] : memref<1x128xf32, #tpu.memory_space<vmem>>, vector<1x128xf32>
    %c0_55 = arith.constant 0 : index
    %c0_56 = arith.constant 0 : index
    %329 = vector.load %arg11[%c0_55, %c0_56] : memref<64x128xbf16, #tpu.memory_space<vmem>>, vector<64x128xbf16>
    %c0_57 = arith.constant 0 : index
    %c0_58 = arith.constant 0 : index
    %330 = vector.load %arg12[%c0_57, %c0_58] : memref<1x128xf32, #tpu.memory_space<vmem>>, vector<1x128xf32>
    %c0_59 = arith.constant 0 : index
    %c0_60 = arith.constant 0 : index
    %331 = vector.load %arg13[%c0_59, %c0_60] : memref<32x128xbf16, #tpu.memory_space<vmem>>, vector<32x128xbf16>
    %c0_61 = arith.constant 0 : index
    %c0_62 = arith.constant 0 : index
    %332 = vector.load %arg14[%c0_61, %c0_62] : memref<1x128xf32, #tpu.memory_space<vmem>>, vector<1x128xf32>
    %333 = arith.truncf %304 : vector<2x32xf32> to vector<2x32xbf16>
    %cst_63 = arith.constant dense<0.000000e+00> : vector<2x128xf32>
    %334 = tpu.matmul %333, %325, %cst_63 {dimension_numbers = #tpu.dot_dimension_numbers<[1], [0], [0], [1], [0, 0, 1, 1], [], []>} : vector<2x32xbf16>, vector<32x128xbf16>, vector<2x128xf32> -> vector<2x128xf32>
    %335 = vector.broadcast %327 : vector<1x128xf32> to vector<2x128xf32>
    %336 = arith.addf %334, %335 : vector<2x128xf32>
    %337 = arith.negf %336 : vector<2x128xf32>
    %338 = math.exp %337 : vector<2x128xf32>
    %cst_64 = arith.constant 1.000000e+00 : f32
    %339 = vector.broadcast %cst_64 : f32 to vector<2x128xf32>
    %340 = arith.addf %339, %338 : vector<2x128xf32>
    %341 = arith.divf %339, %340 : vector<2x128xf32>
    %342 = math.tanh %336 : vector<2x128xf32>
    %343 = vector.extract_strided_slice %341 {offsets = [0, 0], sizes = [2, 32], strides = [1, 1]} : vector<2x128xf32> to vector<2x32xf32>
    %344 = vector.extract_strided_slice %341 {offsets = [0, 32], sizes = [2, 32], strides = [1, 1]} : vector<2x128xf32> to vector<2x32xf32>
    %345 = vector.extract_strided_slice %342 {offsets = [0, 64], sizes = [2, 32], strides = [1, 1]} : vector<2x128xf32> to vector<2x32xf32>
    %346 = vector.extract_strided_slice %341 {offsets = [0, 96], sizes = [2, 32], strides = [1, 1]} : vector<2x128xf32> to vector<2x32xf32>
    %347 = arith.mulf %344, %302 : vector<2x32xf32>
    %348 = arith.mulf %343, %345 : vector<2x32xf32>
    %349 = arith.addf %347, %348 : vector<2x32xf32>
    %350 = math.tanh %349 : vector<2x32xf32>
    %351 = arith.mulf %346, %350 : vector<2x32xf32>
    %352 = tpu.concatenate %351, %324 in 1 : vector<2x32xf32>, vector<2x32xf32> -> vector<2x64xf32>
    %353 = arith.truncf %352 : vector<2x64xf32> to vector<2x64xbf16>
    %cst_65 = arith.constant dense<0.000000e+00> : vector<2x128xf32>
    %354 = tpu.matmul %353, %329, %cst_65 {dimension_numbers = #tpu.dot_dimension_numbers<[1], [0], [0], [1], [0, 0, 1, 1], [], []>} : vector<2x64xbf16>, vector<64x128xbf16>, vector<2x128xf32> -> vector<2x128xf32>
    %355 = vector.broadcast %330 : vector<1x128xf32> to vector<2x128xf32>
    %356 = arith.addf %354, %355 : vector<2x128xf32>
    %357 = arith.negf %356 : vector<2x128xf32>
    %358 = math.exp %357 : vector<2x128xf32>
    %cst_66 = arith.constant 1.000000e+00 : f32
    %359 = vector.broadcast %cst_66 : f32 to vector<2x128xf32>
    %360 = arith.addf %359, %358 : vector<2x128xf32>
    %361 = arith.divf %359, %360 : vector<2x128xf32>
    %362 = math.tanh %356 : vector<2x128xf32>
    %363 = vector.extract_strided_slice %361 {offsets = [0, 0], sizes = [2, 32], strides = [1, 1]} : vector<2x128xf32> to vector<2x32xf32>
    %364 = vector.extract_strided_slice %361 {offsets = [0, 32], sizes = [2, 32], strides = [1, 1]} : vector<2x128xf32> to vector<2x32xf32>
    %365 = vector.extract_strided_slice %362 {offsets = [0, 64], sizes = [2, 32], strides = [1, 1]} : vector<2x128xf32> to vector<2x32xf32>
    %366 = vector.extract_strided_slice %361 {offsets = [0, 96], sizes = [2, 32], strides = [1, 1]} : vector<2x128xf32> to vector<2x32xf32>
    %367 = arith.mulf %364, %322 : vector<2x32xf32>
    %368 = arith.mulf %363, %365 : vector<2x32xf32>
    %369 = arith.addf %367, %368 : vector<2x32xf32>
    %370 = math.tanh %369 : vector<2x32xf32>
    %371 = arith.mulf %366, %370 : vector<2x32xf32>
    %372 = arith.truncf %371 : vector<2x32xf32> to vector<2x32xbf16>
    %cst_67 = arith.constant dense<0.000000e+00> : vector<2x128xf32>
    %373 = tpu.matmul %372, %331, %cst_67 {dimension_numbers = #tpu.dot_dimension_numbers<[1], [0], [0], [1], [0, 0, 1, 1], [], []>} : vector<2x32xbf16>, vector<32x128xbf16>, vector<2x128xf32> -> vector<2x128xf32>
    %374 = vector.broadcast %332 : vector<1x128xf32> to vector<2x128xf32>
    %375 = arith.addf %373, %374 : vector<2x128xf32>
    %376 = tpu.concatenate %371, %351 in 1 : vector<2x32xf32>, vector<2x32xf32> -> vector<2x64xf32>
    %377 = arith.truncf %376 : vector<2x64xf32> to vector<2x64xbf16>
    %cst_68 = arith.constant dense<0.000000e+00> : vector<2x128xf32>
    %378 = tpu.matmul %377, %326, %cst_68 {dimension_numbers = #tpu.dot_dimension_numbers<[1], [0], [0], [1], [0, 0, 1, 1], [], []>} : vector<2x64xbf16>, vector<64x128xbf16>, vector<2x128xf32> -> vector<2x128xf32>
    %379 = vector.broadcast %328 : vector<1x128xf32> to vector<2x128xf32>
    %380 = arith.addf %378, %379 : vector<2x128xf32>
    %381 = arith.negf %380 : vector<2x128xf32>
    %382 = math.exp %381 : vector<2x128xf32>
    %cst_69 = arith.constant 1.000000e+00 : f32
    %383 = vector.broadcast %cst_69 : f32 to vector<2x128xf32>
    %384 = arith.addf %383, %382 : vector<2x128xf32>
    %385 = arith.divf %383, %384 : vector<2x128xf32>
    %386 = math.tanh %380 : vector<2x128xf32>
    %387 = vector.extract_strided_slice %385 {offsets = [0, 0], sizes = [2, 32], strides = [1, 1]} : vector<2x128xf32> to vector<2x32xf32>
    %388 = vector.extract_strided_slice %385 {offsets = [0, 32], sizes = [2, 32], strides = [1, 1]} : vector<2x128xf32> to vector<2x32xf32>
    %389 = vector.extract_strided_slice %386 {offsets = [0, 64], sizes = [2, 32], strides = [1, 1]} : vector<2x128xf32> to vector<2x32xf32>
    %390 = vector.extract_strided_slice %385 {offsets = [0, 96], sizes = [2, 32], strides = [1, 1]} : vector<2x128xf32> to vector<2x32xf32>
    %391 = arith.mulf %388, %349 : vector<2x32xf32>
    %392 = arith.mulf %387, %389 : vector<2x32xf32>
    %393 = arith.addf %391, %392 : vector<2x32xf32>
    %394 = math.tanh %393 : vector<2x32xf32>
    %395 = arith.mulf %390, %394 : vector<2x32xf32>
    %396 = tpu.concatenate %395, %371 in 1 : vector<2x32xf32>, vector<2x32xf32> -> vector<2x64xf32>
    %397 = arith.truncf %396 : vector<2x64xf32> to vector<2x64xbf16>
    %cst_70 = arith.constant dense<0.000000e+00> : vector<2x128xf32>
    %398 = tpu.matmul %397, %329, %cst_70 {dimension_numbers = #tpu.dot_dimension_numbers<[1], [0], [0], [1], [0, 0, 1, 1], [], []>} : vector<2x64xbf16>, vector<64x128xbf16>, vector<2x128xf32> -> vector<2x128xf32>
    %399 = vector.broadcast %330 : vector<1x128xf32> to vector<2x128xf32>
    %400 = arith.addf %398, %399 : vector<2x128xf32>
    %401 = arith.negf %400 : vector<2x128xf32>
    %402 = math.exp %401 : vector<2x128xf32>
    %cst_71 = arith.constant 1.000000e+00 : f32
    %403 = vector.broadcast %cst_71 : f32 to vector<2x128xf32>
    %404 = arith.addf %403, %402 : vector<2x128xf32>
    %405 = arith.divf %403, %404 : vector<2x128xf32>
    %406 = math.tanh %400 : vector<2x128xf32>
    %407 = vector.extract_strided_slice %405 {offsets = [0, 0], sizes = [2, 32], strides = [1, 1]} : vector<2x128xf32> to vector<2x32xf32>
    %408 = vector.extract_strided_slice %405 {offsets = [0, 32], sizes = [2, 32], strides = [1, 1]} : vector<2x128xf32> to vector<2x32xf32>
    %409 = vector.extract_strided_slice %406 {offsets = [0, 64], sizes = [2, 32], strides = [1, 1]} : vector<2x128xf32> to vector<2x32xf32>
    %410 = vector.extract_strided_slice %405 {offsets = [0, 96], sizes = [2, 32], strides = [1, 1]} : vector<2x128xf32> to vector<2x32xf32>
    %411 = arith.mulf %408, %369 : vector<2x32xf32>
    %412 = arith.mulf %407, %409 : vector<2x32xf32>
    %413 = arith.addf %411, %412 : vector<2x32xf32>
    %414 = math.tanh %413 : vector<2x32xf32>
    %415 = arith.mulf %410, %414 : vector<2x32xf32>
    %416 = arith.truncf %415 : vector<2x32xf32> to vector<2x32xbf16>
    %cst_72 = arith.constant dense<0.000000e+00> : vector<2x128xf32>
    %417 = tpu.matmul %416, %331, %cst_72 {dimension_numbers = #tpu.dot_dimension_numbers<[1], [0], [0], [1], [0, 0, 1, 1], [], []>} : vector<2x32xbf16>, vector<32x128xbf16>, vector<2x128xf32> -> vector<2x128xf32>
    %418 = vector.broadcast %332 : vector<1x128xf32> to vector<2x128xf32>
    %419 = arith.addf %417, %418 : vector<2x128xf32>
    %420 = tpu.concatenate %415, %395 in 1 : vector<2x32xf32>, vector<2x32xf32> -> vector<2x64xf32>
    %421 = arith.truncf %420 : vector<2x64xf32> to vector<2x64xbf16>
    %cst_73 = arith.constant dense<0.000000e+00> : vector<2x128xf32>
    %422 = tpu.matmul %421, %326, %cst_73 {dimension_numbers = #tpu.dot_dimension_numbers<[1], [0], [0], [1], [0, 0, 1, 1], [], []>} : vector<2x64xbf16>, vector<64x128xbf16>, vector<2x128xf32> -> vector<2x128xf32>
    %423 = vector.broadcast %328 : vector<1x128xf32> to vector<2x128xf32>
    %424 = arith.addf %422, %423 : vector<2x128xf32>
    %425 = arith.negf %424 : vector<2x128xf32>
    %426 = math.exp %425 : vector<2x128xf32>
    %cst_74 = arith.constant 1.000000e+00 : f32
    %427 = vector.broadcast %cst_74 : f32 to vector<2x128xf32>
    %428 = arith.addf %427, %426 : vector<2x128xf32>
    %429 = arith.divf %427, %428 : vector<2x128xf32>
    %430 = math.tanh %424 : vector<2x128xf32>
    %431 = vector.extract_strided_slice %429 {offsets = [0, 0], sizes = [2, 32], strides = [1, 1]} : vector<2x128xf32> to vector<2x32xf32>
    %432 = vector.extract_strided_slice %429 {offsets = [0, 32], sizes = [2, 32], strides = [1, 1]} : vector<2x128xf32> to vector<2x32xf32>
    %433 = vector.extract_strided_slice %430 {offsets = [0, 64], sizes = [2, 32], strides = [1, 1]} : vector<2x128xf32> to vector<2x32xf32>
    %434 = vector.extract_strided_slice %429 {offsets = [0, 96], sizes = [2, 32], strides = [1, 1]} : vector<2x128xf32> to vector<2x32xf32>
    %435 = arith.mulf %432, %393 : vector<2x32xf32>
    %436 = arith.mulf %431, %433 : vector<2x32xf32>
    %437 = arith.addf %435, %436 : vector<2x32xf32>
    %438 = math.tanh %437 : vector<2x32xf32>
    %439 = arith.mulf %434, %438 : vector<2x32xf32>
    %440 = tpu.concatenate %439, %415 in 1 : vector<2x32xf32>, vector<2x32xf32> -> vector<2x64xf32>
    %441 = arith.truncf %440 : vector<2x64xf32> to vector<2x64xbf16>
    %cst_75 = arith.constant dense<0.000000e+00> : vector<2x128xf32>
    %442 = tpu.matmul %441, %329, %cst_75 {dimension_numbers = #tpu.dot_dimension_numbers<[1], [0], [0], [1], [0, 0, 1, 1], [], []>} : vector<2x64xbf16>, vector<64x128xbf16>, vector<2x128xf32> -> vector<2x128xf32>
    %443 = vector.broadcast %330 : vector<1x128xf32> to vector<2x128xf32>
    %444 = arith.addf %442, %443 : vector<2x128xf32>
    %445 = arith.negf %444 : vector<2x128xf32>
    %446 = math.exp %445 : vector<2x128xf32>
    %cst_76 = arith.constant 1.000000e+00 : f32
    %447 = vector.broadcast %cst_76 : f32 to vector<2x128xf32>
    %448 = arith.addf %447, %446 : vector<2x128xf32>
    %449 = arith.divf %447, %448 : vector<2x128xf32>
    %450 = math.tanh %444 : vector<2x128xf32>
    %451 = vector.extract_strided_slice %449 {offsets = [0, 0], sizes = [2, 32], strides = [1, 1]} : vector<2x128xf32> to vector<2x32xf32>
    %452 = vector.extract_strided_slice %449 {offsets = [0, 32], sizes = [2, 32], strides = [1, 1]} : vector<2x128xf32> to vector<2x32xf32>
    %453 = vector.extract_strided_slice %450 {offsets = [0, 64], sizes = [2, 32], strides = [1, 1]} : vector<2x128xf32> to vector<2x32xf32>
    %454 = vector.extract_strided_slice %449 {offsets = [0, 96], sizes = [2, 32], strides = [1, 1]} : vector<2x128xf32> to vector<2x32xf32>
    %455 = arith.mulf %452, %413 : vector<2x32xf32>
    %456 = arith.mulf %451, %453 : vector<2x32xf32>
    %457 = arith.addf %455, %456 : vector<2x32xf32>
    %458 = math.tanh %457 : vector<2x32xf32>
    %459 = arith.mulf %454, %458 : vector<2x32xf32>
    %460 = arith.truncf %459 : vector<2x32xf32> to vector<2x32xbf16>
    %cst_77 = arith.constant dense<0.000000e+00> : vector<2x128xf32>
    %461 = tpu.matmul %460, %331, %cst_77 {dimension_numbers = #tpu.dot_dimension_numbers<[1], [0], [0], [1], [0, 0, 1, 1], [], []>} : vector<2x32xbf16>, vector<32x128xbf16>, vector<2x128xf32> -> vector<2x128xf32>
    %462 = vector.broadcast %332 : vector<1x128xf32> to vector<2x128xf32>
    %463 = arith.addf %461, %462 : vector<2x128xf32>
    %464 = tpu.concatenate %459, %439 in 1 : vector<2x32xf32>, vector<2x32xf32> -> vector<2x64xf32>
    %465 = arith.truncf %464 : vector<2x64xf32> to vector<2x64xbf16>
    %cst_78 = arith.constant dense<0.000000e+00> : vector<2x128xf32>
    %466 = tpu.matmul %465, %326, %cst_78 {dimension_numbers = #tpu.dot_dimension_numbers<[1], [0], [0], [1], [0, 0, 1, 1], [], []>} : vector<2x64xbf16>, vector<64x128xbf16>, vector<2x128xf32> -> vector<2x128xf32>
    %467 = vector.broadcast %328 : vector<1x128xf32> to vector<2x128xf32>
    %468 = arith.addf %466, %467 : vector<2x128xf32>
    %469 = arith.negf %468 : vector<2x128xf32>
    %470 = math.exp %469 : vector<2x128xf32>
    %cst_79 = arith.constant 1.000000e+00 : f32
    %471 = vector.broadcast %cst_79 : f32 to vector<2x128xf32>
    %472 = arith.addf %471, %470 : vector<2x128xf32>
    %473 = arith.divf %471, %472 : vector<2x128xf32>
    %474 = math.tanh %468 : vector<2x128xf32>
    %475 = vector.extract_strided_slice %473 {offsets = [0, 0], sizes = [2, 32], strides = [1, 1]} : vector<2x128xf32> to vector<2x32xf32>
    %476 = vector.extract_strided_slice %473 {offsets = [0, 32], sizes = [2, 32], strides = [1, 1]} : vector<2x128xf32> to vector<2x32xf32>
    %477 = vector.extract_strided_slice %474 {offsets = [0, 64], sizes = [2, 32], strides = [1, 1]} : vector<2x128xf32> to vector<2x32xf32>
    %478 = vector.extract_strided_slice %473 {offsets = [0, 96], sizes = [2, 32], strides = [1, 1]} : vector<2x128xf32> to vector<2x32xf32>
    %479 = arith.mulf %476, %437 : vector<2x32xf32>
    %480 = arith.mulf %475, %477 : vector<2x32xf32>
    %481 = arith.addf %479, %480 : vector<2x32xf32>
    %482 = math.tanh %481 : vector<2x32xf32>
    %483 = arith.mulf %478, %482 : vector<2x32xf32>
    %484 = tpu.concatenate %483, %459 in 1 : vector<2x32xf32>, vector<2x32xf32> -> vector<2x64xf32>
    %485 = arith.truncf %484 : vector<2x64xf32> to vector<2x64xbf16>
    %cst_80 = arith.constant dense<0.000000e+00> : vector<2x128xf32>
    %486 = tpu.matmul %485, %329, %cst_80 {dimension_numbers = #tpu.dot_dimension_numbers<[1], [0], [0], [1], [0, 0, 1, 1], [], []>} : vector<2x64xbf16>, vector<64x128xbf16>, vector<2x128xf32> -> vector<2x128xf32>
    %487 = vector.broadcast %330 : vector<1x128xf32> to vector<2x128xf32>
    %488 = arith.addf %486, %487 : vector<2x128xf32>
    %489 = arith.negf %488 : vector<2x128xf32>
    %490 = math.exp %489 : vector<2x128xf32>
    %cst_81 = arith.constant 1.000000e+00 : f32
    %491 = vector.broadcast %cst_81 : f32 to vector<2x128xf32>
    %492 = arith.addf %491, %490 : vector<2x128xf32>
    %493 = arith.divf %491, %492 : vector<2x128xf32>
    %494 = math.tanh %488 : vector<2x128xf32>
    %495 = vector.extract_strided_slice %493 {offsets = [0, 0], sizes = [2, 32], strides = [1, 1]} : vector<2x128xf32> to vector<2x32xf32>
    %496 = vector.extract_strided_slice %493 {offsets = [0, 32], sizes = [2, 32], strides = [1, 1]} : vector<2x128xf32> to vector<2x32xf32>
    %497 = vector.extract_strided_slice %494 {offsets = [0, 64], sizes = [2, 32], strides = [1, 1]} : vector<2x128xf32> to vector<2x32xf32>
    %498 = vector.extract_strided_slice %493 {offsets = [0, 96], sizes = [2, 32], strides = [1, 1]} : vector<2x128xf32> to vector<2x32xf32>
    %499 = arith.mulf %496, %457 : vector<2x32xf32>
    %500 = arith.mulf %495, %497 : vector<2x32xf32>
    %501 = arith.addf %499, %500 : vector<2x32xf32>
    %502 = math.tanh %501 : vector<2x32xf32>
    %503 = arith.mulf %498, %502 : vector<2x32xf32>
    %504 = arith.truncf %503 : vector<2x32xf32> to vector<2x32xbf16>
    %cst_82 = arith.constant dense<0.000000e+00> : vector<2x128xf32>
    %505 = tpu.matmul %504, %331, %cst_82 {dimension_numbers = #tpu.dot_dimension_numbers<[1], [0], [0], [1], [0, 0, 1, 1], [], []>} : vector<2x32xbf16>, vector<32x128xbf16>, vector<2x128xf32> -> vector<2x128xf32>
    %506 = vector.broadcast %332 : vector<1x128xf32> to vector<2x128xf32>
    %507 = arith.addf %505, %506 : vector<2x128xf32>
    %508 = tpu.concatenate %503, %483 in 1 : vector<2x32xf32>, vector<2x32xf32> -> vector<2x64xf32>
    %509 = arith.truncf %508 : vector<2x64xf32> to vector<2x64xbf16>
    %cst_83 = arith.constant dense<0.000000e+00> : vector<2x128xf32>
    %510 = tpu.matmul %509, %326, %cst_83 {dimension_numbers = #tpu.dot_dimension_numbers<[1], [0], [0], [1], [0, 0, 1, 1], [], []>} : vector<2x64xbf16>, vector<64x128xbf16>, vector<2x128xf32> -> vector<2x128xf32>
    %511 = vector.broadcast %328 : vector<1x128xf32> to vector<2x128xf32>
    %512 = arith.addf %510, %511 : vector<2x128xf32>
    %513 = arith.negf %512 : vector<2x128xf32>
    %514 = math.exp %513 : vector<2x128xf32>
    %cst_84 = arith.constant 1.000000e+00 : f32
    %515 = vector.broadcast %cst_84 : f32 to vector<2x128xf32>
    %516 = arith.addf %515, %514 : vector<2x128xf32>
    %517 = arith.divf %515, %516 : vector<2x128xf32>
    %518 = math.tanh %512 : vector<2x128xf32>
    %519 = vector.extract_strided_slice %517 {offsets = [0, 0], sizes = [2, 32], strides = [1, 1]} : vector<2x128xf32> to vector<2x32xf32>
    %520 = vector.extract_strided_slice %517 {offsets = [0, 32], sizes = [2, 32], strides = [1, 1]} : vector<2x128xf32> to vector<2x32xf32>
    %521 = vector.extract_strided_slice %518 {offsets = [0, 64], sizes = [2, 32], strides = [1, 1]} : vector<2x128xf32> to vector<2x32xf32>
    %522 = vector.extract_strided_slice %517 {offsets = [0, 96], sizes = [2, 32], strides = [1, 1]} : vector<2x128xf32> to vector<2x32xf32>
    %523 = arith.mulf %520, %481 : vector<2x32xf32>
    %524 = arith.mulf %519, %521 : vector<2x32xf32>
    %525 = arith.addf %523, %524 : vector<2x32xf32>
    %526 = math.tanh %525 : vector<2x32xf32>
    %527 = arith.mulf %522, %526 : vector<2x32xf32>
    %528 = tpu.concatenate %527, %503 in 1 : vector<2x32xf32>, vector<2x32xf32> -> vector<2x64xf32>
    %529 = arith.truncf %528 : vector<2x64xf32> to vector<2x64xbf16>
    %cst_85 = arith.constant dense<0.000000e+00> : vector<2x128xf32>
    %530 = tpu.matmul %529, %329, %cst_85 {dimension_numbers = #tpu.dot_dimension_numbers<[1], [0], [0], [1], [0, 0, 1, 1], [], []>} : vector<2x64xbf16>, vector<64x128xbf16>, vector<2x128xf32> -> vector<2x128xf32>
    %531 = vector.broadcast %330 : vector<1x128xf32> to vector<2x128xf32>
    %532 = arith.addf %530, %531 : vector<2x128xf32>
    %533 = arith.negf %532 : vector<2x128xf32>
    %534 = math.exp %533 : vector<2x128xf32>
    %cst_86 = arith.constant 1.000000e+00 : f32
    %535 = vector.broadcast %cst_86 : f32 to vector<2x128xf32>
    %536 = arith.addf %535, %534 : vector<2x128xf32>
    %537 = arith.divf %535, %536 : vector<2x128xf32>
    %538 = math.tanh %532 : vector<2x128xf32>
    %539 = vector.extract_strided_slice %537 {offsets = [0, 0], sizes = [2, 32], strides = [1, 1]} : vector<2x128xf32> to vector<2x32xf32>
    %540 = vector.extract_strided_slice %537 {offsets = [0, 32], sizes = [2, 32], strides = [1, 1]} : vector<2x128xf32> to vector<2x32xf32>
    %541 = vector.extract_strided_slice %538 {offsets = [0, 64], sizes = [2, 32], strides = [1, 1]} : vector<2x128xf32> to vector<2x32xf32>
    %542 = vector.extract_strided_slice %537 {offsets = [0, 96], sizes = [2, 32], strides = [1, 1]} : vector<2x128xf32> to vector<2x32xf32>
    %543 = arith.mulf %540, %501 : vector<2x32xf32>
    %544 = arith.mulf %539, %541 : vector<2x32xf32>
    %545 = arith.addf %543, %544 : vector<2x32xf32>
    %546 = math.tanh %545 : vector<2x32xf32>
    %547 = arith.mulf %542, %546 : vector<2x32xf32>
    %548 = arith.truncf %547 : vector<2x32xf32> to vector<2x32xbf16>
    %cst_87 = arith.constant dense<0.000000e+00> : vector<2x128xf32>
    %549 = tpu.matmul %548, %331, %cst_87 {dimension_numbers = #tpu.dot_dimension_numbers<[1], [0], [0], [1], [0, 0, 1, 1], [], []>} : vector<2x32xbf16>, vector<32x128xbf16>, vector<2x128xf32> -> vector<2x128xf32>
    %550 = vector.broadcast %332 : vector<1x128xf32> to vector<2x128xf32>
    %551 = arith.addf %549, %550 : vector<2x128xf32>
    %552 = tpu.concatenate %547, %527 in 1 : vector<2x32xf32>, vector<2x32xf32> -> vector<2x64xf32>
    %553 = arith.truncf %552 : vector<2x64xf32> to vector<2x64xbf16>
    %cst_88 = arith.constant dense<0.000000e+00> : vector<2x128xf32>
    %554 = tpu.matmul %553, %326, %cst_88 {dimension_numbers = #tpu.dot_dimension_numbers<[1], [0], [0], [1], [0, 0, 1, 1], [], []>} : vector<2x64xbf16>, vector<64x128xbf16>, vector<2x128xf32> -> vector<2x128xf32>
    %555 = vector.broadcast %328 : vector<1x128xf32> to vector<2x128xf32>
    %556 = arith.addf %554, %555 : vector<2x128xf32>
    %557 = arith.negf %556 : vector<2x128xf32>
    %558 = math.exp %557 : vector<2x128xf32>
    %cst_89 = arith.constant 1.000000e+00 : f32
    %559 = vector.broadcast %cst_89 : f32 to vector<2x128xf32>
    %560 = arith.addf %559, %558 : vector<2x128xf32>
    %561 = arith.divf %559, %560 : vector<2x128xf32>
    %562 = math.tanh %556 : vector<2x128xf32>
    %563 = vector.extract_strided_slice %561 {offsets = [0, 0], sizes = [2, 32], strides = [1, 1]} : vector<2x128xf32> to vector<2x32xf32>
    %564 = vector.extract_strided_slice %561 {offsets = [0, 32], sizes = [2, 32], strides = [1, 1]} : vector<2x128xf32> to vector<2x32xf32>
    %565 = vector.extract_strided_slice %562 {offsets = [0, 64], sizes = [2, 32], strides = [1, 1]} : vector<2x128xf32> to vector<2x32xf32>
    %566 = vector.extract_strided_slice %561 {offsets = [0, 96], sizes = [2, 32], strides = [1, 1]} : vector<2x128xf32> to vector<2x32xf32>
    %567 = arith.mulf %564, %525 : vector<2x32xf32>
    %568 = arith.mulf %563, %565 : vector<2x32xf32>
    %569 = arith.addf %567, %568 : vector<2x32xf32>
    %570 = math.tanh %569 : vector<2x32xf32>
    %571 = arith.mulf %566, %570 : vector<2x32xf32>
    %572 = tpu.concatenate %571, %547 in 1 : vector<2x32xf32>, vector<2x32xf32> -> vector<2x64xf32>
    %573 = arith.truncf %572 : vector<2x64xf32> to vector<2x64xbf16>
    %cst_90 = arith.constant dense<0.000000e+00> : vector<2x128xf32>
    %574 = tpu.matmul %573, %329, %cst_90 {dimension_numbers = #tpu.dot_dimension_numbers<[1], [0], [0], [1], [0, 0, 1, 1], [], []>} : vector<2x64xbf16>, vector<64x128xbf16>, vector<2x128xf32> -> vector<2x128xf32>
    %575 = vector.broadcast %330 : vector<1x128xf32> to vector<2x128xf32>
    %576 = arith.addf %574, %575 : vector<2x128xf32>
    %577 = arith.negf %576 : vector<2x128xf32>
    %578 = math.exp %577 : vector<2x128xf32>
    %cst_91 = arith.constant 1.000000e+00 : f32
    %579 = vector.broadcast %cst_91 : f32 to vector<2x128xf32>
    %580 = arith.addf %579, %578 : vector<2x128xf32>
    %581 = arith.divf %579, %580 : vector<2x128xf32>
    %582 = math.tanh %576 : vector<2x128xf32>
    %583 = vector.extract_strided_slice %581 {offsets = [0, 0], sizes = [2, 32], strides = [1, 1]} : vector<2x128xf32> to vector<2x32xf32>
    %584 = vector.extract_strided_slice %581 {offsets = [0, 32], sizes = [2, 32], strides = [1, 1]} : vector<2x128xf32> to vector<2x32xf32>
    %585 = vector.extract_strided_slice %582 {offsets = [0, 64], sizes = [2, 32], strides = [1, 1]} : vector<2x128xf32> to vector<2x32xf32>
    %586 = vector.extract_strided_slice %581 {offsets = [0, 96], sizes = [2, 32], strides = [1, 1]} : vector<2x128xf32> to vector<2x32xf32>
    %587 = arith.mulf %584, %545 : vector<2x32xf32>
    %588 = arith.mulf %583, %585 : vector<2x32xf32>
    %589 = arith.addf %587, %588 : vector<2x32xf32>
    %590 = math.tanh %589 : vector<2x32xf32>
    %591 = arith.mulf %586, %590 : vector<2x32xf32>
    %592 = arith.truncf %591 : vector<2x32xf32> to vector<2x32xbf16>
    %cst_92 = arith.constant dense<0.000000e+00> : vector<2x128xf32>
    %593 = tpu.matmul %592, %331, %cst_92 {dimension_numbers = #tpu.dot_dimension_numbers<[1], [0], [0], [1], [0, 0, 1, 1], [], []>} : vector<2x32xbf16>, vector<32x128xbf16>, vector<2x128xf32> -> vector<2x128xf32>
    %594 = vector.broadcast %332 : vector<1x128xf32> to vector<2x128xf32>
    %595 = arith.addf %593, %594 : vector<2x128xf32>
    %596 = tpu.concatenate %375, %419, %463, %507, %551, %595 in 0 : vector<2x128xf32>, vector<2x128xf32>, vector<2x128xf32>, vector<2x128xf32>, vector<2x128xf32>, vector<2x128xf32> -> vector<12x128xf32>
    %c0_93 = arith.constant 0 : index
    %c0_94 = arith.constant 0 : index
    %597 = vector.load %arg15[%c0_93, %c0_94] : memref<12x128xf32, #tpu.memory_space<vmem>>, vector<12x128xf32>
    tpu.vector_store %arg15[%c0_93, %c0_94], %596 {strides = array<i32>} : memref<12x128xf32, #tpu.memory_space<vmem>>, vector<12x128xf32>,
    return
  }
  func.func @transform_0(%arg0: i32) -> (i32, i32) {
    %c0_i32 = arith.constant 0 : i32
    %c0_i32_0 = arith.constant 0 : i32
    %c0_i32_1 = arith.constant 0 : i32
    return %c0_i32, %c0_i32_0 : i32, i32
  }
  func.func @transform_1(%arg0: i32) -> (i32, i32) {
    %c0_i32 = arith.constant 0 : i32
    %c0_i32_0 = arith.constant 0 : i32
    %c0_i32_1 = arith.constant 0 : i32
    return %c0_i32, %c0_i32_0 : i32, i32
  }
  func.func @transform_2(%arg0: i32) -> (i32, i32) {
    %c0_i32 = arith.constant 0 : i32
    %c0_i32_0 = arith.constant 0 : i32
    %c0_i32_1 = arith.constant 0 : i32
    return %c0_i32, %c0_i32_0 : i32, i32
  }
  func.func @transform_3(%arg0: i32) -> (i32, i32) {
    %c0_i32 = arith.constant 0 : i32
    %c0_i32_0 = arith.constant 0 : i32
    %c0_i32_1 = arith.constant 0 : i32
    return %c0_i32, %c0_i32_0 : i32, i32
  }
  func.func @transform_4(%arg0: i32) -> (i32, i32) {
    %c0_i32 = arith.constant 0 : i32
    %c0_i32_0 = arith.constant 0 : i32
    %c0_i32_1 = arith.constant 0 : i32
    return %c0_i32, %c0_i32_0 : i32, i32
  }
  func.func @transform_5(%arg0: i32) -> (i32, i32) {
    %c0_i32 = arith.constant 0 : i32
    %c0_i32_0 = arith.constant 0 : i32
    %c0_i32_1 = arith.constant 0 : i32
    return %c0_i32, %c0_i32_0 : i32, i32
  }
  func.func @transform_6(%arg0: i32) -> (i32, i32) {
    %c0_i32 = arith.constant 0 : i32
    %c0_i32_0 = arith.constant 0 : i32
    %c0_i32_1 = arith.constant 0 : i32
    return %c0_i32, %c0_i32_0 : i32, i32
  }
  func.func @transform_7(%arg0: i32) -> (i32, i32) {
    %c0_i32 = arith.constant 0 : i32
    %c0_i32_0 = arith.constant 0 : i32
    %c0_i32_1 = arith.constant 0 : i32
    return %c0_i32, %c0_i32_0 : i32, i32
  }
  func.func @transform_8(%arg0: i32) -> (i32, i32) {
    %c0_i32 = arith.constant 0 : i32
    %c0_i32_0 = arith.constant 0 : i32
    %c0_i32_1 = arith.constant 0 : i32
    return %c0_i32, %c0_i32_0 : i32, i32
  }
  func.func @transform_9(%arg0: i32) -> (i32, i32) {
    %c0_i32 = arith.constant 0 : i32
    %c0_i32_0 = arith.constant 0 : i32
    %c0_i32_1 = arith.constant 0 : i32
    return %c0_i32, %c0_i32_0 : i32, i32
  }
  func.func @transform_10(%arg0: i32) -> (i32, i32) {
    %c0_i32 = arith.constant 0 : i32
    %c0_i32_0 = arith.constant 0 : i32
    %c0_i32_1 = arith.constant 0 : i32
    return %c0_i32, %c0_i32_0 : i32, i32
  }
  func.func @transform_11(%arg0: i32) -> (i32, i32) {
    %c0_i32 = arith.constant 0 : i32
    %c0_i32_0 = arith.constant 0 : i32
    %c0_i32_1 = arith.constant 0 : i32
    return %c0_i32, %c0_i32_0 : i32, i32
  }
  func.func @transform_12(%arg0: i32) -> (i32, i32) {
    %c0_i32 = arith.constant 0 : i32
    %c0_i32_0 = arith.constant 0 : i32
    %c0_i32_1 = arith.constant 0 : i32
    return %c0_i32, %c0_i32_0 : i32, i32
  }
  func.func @transform_13(%arg0: i32) -> (i32, i32) {
    %c0_i32 = arith.constant 0 : i32
    %c0_i32_0 = arith.constant 0 : i32
    %c0_i32_1 = arith.constant 0 : i32
    return %c0_i32, %c0_i32_0 : i32, i32
  }
  func.func @transform_14(%arg0: i32) -> (i32, i32) {
    %c0_i32 = arith.constant 0 : i32
    %c0_i32_0 = arith.constant 0 : i32
    %c0_i32_1 = arith.constant 0 : i32
    return %c0_i32, %c0_i32_0 : i32, i32
  }
}

</mosaic_0001>

<bundles_post_ra>
// kernel: tpu_custom_call.1
= control target key start
LH: loop header
LB: loop body
LE: loop exit
PB: predicated region body
PF: predicated region fallthrough
CT: control target
= control target key end

     0   :  { %19 = vsyncpa [#allocation3], 0  ;;  %s3696_s0 = inlined_call_operand.hbm [shape: bf16[16,128], index: 0, kind: input, shape index: {}]   ;;  %s3697_s1 = inlined_call_operand.hbm [shape: bf16[128,128], index: 1, kind: input, shape index: {}]   ;;  %s3698_s2 = inlined_call_operand.vmem [shape: f32[1,128], index: 2, kind: input, shape index: {}]   ;;  %s3699_s3 = inlined_call_operand.hbm [shape: bf16[32,128], index: 3, kind: input, shape index: {}]   ;;  %s3700_s4 = inlined_call_operand.hbm [shape: bf16[64,128], index: 4, kind: input, shape index: {}]   ;;  %s3701_s5 = inlined_call_operand.vmem [shape: f32[1,128], index: 5, kind: input, shape index: {}]   ;;  %s3702_s6 = inlined_call_operand.hbm [shape: bf16[32,128], index: 6, kind: input, shape index: {}]   ;;  %s3703_s7 = inlined_call_operand.hbm [shape: bf16[64,128], index: 7, kind: input, shape index: {}]   ;;  %s3704_s8 = inlined_call_operand.vmem [shape: f32[1,128], index: 8, kind: input, shape index: {}]   ;;  %s3705_s9 = inlined_call_operand.vmem [shape: f32[1,128], index: 9, kind: input, shape index: {}]   ;;  %s3706_s10 = inlined_call_operand.hbm [shape: bf16[64,128], index: 10, kind: input, shape index: {}]   ;;  %s3707_s11 = inlined_call_operand.vmem [shape: f32[1,128], index: 11, kind: input, shape index: {}]   ;;  %s3708_s12 = inlined_call_operand.hbm [shape: bf16[32,128], index: 12, kind: input, shape index: {}]   ;;  %s3709_s13 = inlined_call_operand.vmem [shape: f32[1,128], index: 13, kind: input, shape index: {}]   ;;  %s3710_s14 = inlined_call_operand.hbm [shape: f32[12,128], index: 14, kind: output, shape index: {}]  }
   0x1   :  { %20 = vsyncpa [#allocation6], 0 }
   0x2   :  { %21 = vsyncpa [#allocation9], 0 }
   0x3   :  { %22 = vsyncpa [#allocation12], 0 }
   0x4   :  { %23 = vsyncpa [#allocation15], 0 }
   0x5   :  { %24 = vsyncpa [#allocation4], 0  ;;  %s42_s15 = sshll.u32 %s3697_s1, 4  ;;  %s3031_s16 = smov [#allocation5]   ;;  %s43_s15 = int_to_ptr.hbm [resolvable:$true] %s42_s15 }
   0x6   :  { %s44_s17 = sshll.u32 %s3031_s16, 4  ;;  %s70_s20 = sshll.u32 %s3700_s4, 4  ;;  %s45_s17 = int_to_ptr.vmem [resolvable:$true] %s44_s17  ;;  %s71_s20 = int_to_ptr.hbm [resolvable:$true] %s70_s20 }
   0x7   :  { %s3032_s21 = smov 64   ;;  %s3033_s22 = smov 4  }
   0x8   :  { %50 = dma.hbm_to_vmem [thread:$0]  %s43_s15, 1024, %s45_s17, [#allocation6], %s3032_s21, %s3032_s21, %s3033_s22  }
   0x9   :  { %s3034_s23 = smov [#allocation8]   ;;  %s98_s1 = sshll.u32 %s3703_s7, 4  ;;  %s99_s1 = int_to_ptr.hbm [resolvable:$true] %s98_s1 }
   0xa   :  { %s72_s24 = sshll.u32 %s3034_s23, 4  ;;  %s29_s28 = sshll.u32 %s3696_s0, 4  ;;  %s73_s24 = int_to_ptr.vmem [resolvable:$true] %s72_s24  ;;  %s30_s28 = int_to_ptr.hbm [resolvable:$true] %s29_s28 }
   0xb   :  { %78 = dma.hbm_to_vmem [thread:$0]  %s71_s20, 512, %s73_s24, [#allocation9], %s3032_s21, %s3032_s21, %s3033_s22  }
   0xc   :  { %s3035_s29 = smov [#allocation11]   ;;  %s3036_s15 = smov [#allocation2]  }
   0xd   :  { %s100_s30 = sshll.u32 %s3035_s29, 4  ;;  %s31_s7 = sshll.u32 %s3036_s15, 4  ;;  %s101_s30 = int_to_ptr.vmem [resolvable:$true] %s100_s30  ;;  %s32_s7 = int_to_ptr.vmem [resolvable:$true] %s31_s7 }
   0xe   :  { %106 = dma.hbm_to_vmem [thread:$0]  %s99_s1, 512, %s101_s30, [#allocation12], %s3032_s21, %s3032_s21, %s3033_s22  }
   0xf   :  { %s57_s18 = sshll.u32 %s3699_s3, 4  ;;  %s85_s20 = sshll.u32 %s3702_s6, 4  ;;  %s58_s18 = int_to_ptr.hbm [resolvable:$true] %s57_s18  ;;  %s86_s20 = int_to_ptr.hbm [resolvable:$true] %s85_s20 }
  0x10   :  { %37 = dma.hbm_to_vmem [thread:$0]  %s30_s28, 128, %s32_s7, [#allocation3], %s3032_s21, %s3032_s21, %s3033_s22  }
  0x11   :  { %s3037_s23 = smov [#allocation7]   ;;  %s3038_s25 = smov [#allocation10]  }
  0x12   :  { %s59_s24 = sshll.u32 %s3037_s23, 4  ;;  %s87_s3 = sshll.u32 %s3038_s25, 4  ;;  %s60_s24 = int_to_ptr.vmem [resolvable:$true] %s59_s24  ;;  %s88_s3 = int_to_ptr.vmem [resolvable:$true] %s87_s3 }
  0x13   :  { %65 = dma.hbm_to_vmem [thread:$0]  %s58_s18, 256, %s60_s24, [#allocation6], %s3032_s21, %s3032_s21, %s3033_s22  }
  0x14   :  { %s115_s4 = sshll.u32 %s3706_s10, 4  ;;  %s130_s28 = sshll.u32 %s3708_s12, 4  ;;  %s116_s4 = int_to_ptr.hbm [resolvable:$true] %s115_s4  ;;  %s131_s28 = int_to_ptr.hbm [resolvable:$true] %s130_s28 }
  0x15   :  { %93 = dma.hbm_to_vmem [thread:$0]  %s86_s20, 256, %s88_s3, [#allocation9], %s3032_s21, %s3032_s21, %s3033_s22  }
  0x16   :  { %s3039_s29 = smov [#allocation13]   ;;  %s3040_s15 = smov [#allocation14]  }
  0x17   :  { %s117_s30 = sshll.u32 %s3039_s29, 4  ;;  %s132_s10 = sshll.u32 %s3040_s15, 4  ;;  %s118_s30 = int_to_ptr.vmem [resolvable:$true] %s117_s30  ;;  %s133_s10 = int_to_ptr.vmem [resolvable:$true] %s132_s10 }
  0x18   :  { %123 = dma.hbm_to_vmem [thread:$0]  %s116_s4, 512, %s118_s30, [#allocation12], %s3032_s21, %s3032_s21, %s3033_s22  }
  0x19   :  { %138 = dma.hbm_to_vmem [thread:$0]  %s131_s28, 256, %s133_s10, [#allocation15], %s3032_s21, %s3032_s21, %s3033_s22  }
  0x1a   :  { %3019 = dma.done.wait [#allocation3], 128  }
  0x1b   :  { %3020 = vsyncadd [#allocation3], 4294967168 }
  0x1c   :  { %3021 = dma.done.wait [#allocation6], 1280  }
  0x1d   :  { %3022 = vsyncadd [#allocation6], 4294966016 }
  0x1e   :  { %3023 = dma.done.wait [#allocation9], 768  }
  0x1f   :  { %3024 = vsyncadd [#allocation9], 4294966528 }
  0x20   :  { %3025 = dma.done.wait [#allocation12], 1024  }
  0x21   :  { %3026 = vsyncadd [#allocation12], 4294966272 }
  0x22   :  { %3027 = dma.done.wait [#allocation15], 256  }
  0x23   :  { %3028 = vsyncadd [#allocation15], 4294967040  ;;  %v2543_v0 = vld [vmem:[#allocation5 + $0x38] sm:$0xff]  ;;  %v3169_v1 = vld [vmem:[#allocation7 + $0x8] sm:$0xff]  ;;  %v3041_v6 = vmov 0   ;;  %vm289_vm4 = vcmask 261120  }
  0x24   :  { %263 = vmatpush.bf16.msra.mxu0 %v2543_v0  ;;  %v2542_v2 = vld [vmem:[#allocation5 + $0x30] sm:$0xff]  ;;  %299 = vmatpush.bf16.msra.mxu1 %v3169_v1  ;;  %v3172_v3 = vld [vmem:[#allocation7] sm:$0xff]  ;;  %v2541_v4 = vld [vmem:[#allocation5 + $0x28] sm:$0xff]  ;;  %vm377_vm5 = vcmask 523264   ;;  %s2343_s4 = sshll.u32 %s3710_s14, 4  ;;  %s3045_s6 = smov 8   ;;  %s2344_s4 = int_to_ptr.hbm [resolvable:$true] %s2343_s4 }
  0x25   :  { %444 = vmatpush.bf16.msra.mxu3 %v3169_v1  ;;  %v2540_v5 = vld [vmem:[#allocation5 + $0x20] sm:$0xff]  ;;  %v2539_v7 = vld [vmem:[#allocation5 + $0x18] sm:$0xff]  ;;  %v2538_v8 = vld [vmem:[#allocation5 + $0x10] sm:$0xff] }
  0x26   :  { %v2537_v9 = vld [vmem:[#allocation5 + $0x8] sm:$0xff]  ;;  %v2536_v10 = vld [vmem:[#allocation5] sm:$0xff]  ;;  %v2535_v11 = vld [vmem:[#allocation2] sm:$0xff] }
  0x27   :  { %v3186_v14 = vld [vmem:[%s3698_s2] ss:$0 sm:$0xff]  ;;  %s3042_s2 = smov 32   ;;  %v3198_v38 = vld [vmem:[#allocation8 + $0x18] sm:$0xff]  ;;  %v3201_v39 = vld [vmem:[#allocation8 + $0x10] sm:$0xff] }
  0x28   :  { %264 = vmatpush.bf16.msra.mxu0 %v2542_v2  ;;  %300 = vmatpush.bf16.msra.mxu1 %v3172_v3  ;;  %v3205_v40 = vld [vmem:[#allocation8 + $0x8] sm:$0xff]  ;;  %v3212_v44 = vld [vmem:[#allocation8] sm:$0xff] }
  0x29   :  { %445 = vmatpush.bf16.msra.mxu3 %v3172_v3  ;;  %385 = vmatpush.bf16.msra.mxu2 %v3198_v38  ;;  %v3236_v49 = vld [vmem:[%s3701_s5] ss:$0 sm:$0xff] }
  0x2b   :  { %301 = vmatmul.bf16.vlgmr.msra.gmra.mxu1 %v3041_v6 }
  0x2c   :  { %265 = vmatpush.bf16.msra.mxu0 %v2541_v4  ;;  %515 = vmatpush.bf16.msrb.mxu1 %v3198_v38 }
  0x2d   :  { %575 = vmatpush.bf16.msrb.mxu3 %v3169_v1  ;;  %386 = vmatpush.bf16.msra.mxu2 %v3201_v39 }
  0x30   :  { %266 = vmatpush.bf16.msra.mxu0 %v2540_v5  ;;  %516 = vmatpush.bf16.msrb.mxu1 %v3201_v39 }
  0x31   :  { %576 = vmatpush.bf16.msrb.mxu3 %v3172_v3  ;;  %387 = vmatpush.bf16.msra.mxu2 %v3205_v40 }
  0x34   :  { %267 = vmatpush.bf16.msra.mxu0 %v2539_v7  ;;  %517 = vmatpush.bf16.msrb.mxu1 %v3205_v40 }
  0x35   :  { %388 = vmatpush.bf16.msra.mxu2 %v3212_v44 }
  0x38   :  { %268 = vmatpush.bf16.msra.mxu0 %v2538_v8  ;;  %518 = vmatpush.bf16.msrb.mxu1 %v3212_v44 }
  0x39   :  { %646 = vmatpush.bf16.msrb.mxu2 %v3198_v38 }
  0x3c   :  { %269 = vmatpush.bf16.msra.mxu0 %v2537_v9  ;;  %706 = vmatpush.bf16.msra.mxu1 %v3169_v1 }
  0x3d   :  { %647 = vmatpush.bf16.msrb.mxu2 %v3201_v39 }
  0x40   :  { %270 = vmatpush.bf16.msra.mxu0 %v2536_v10  ;;  %707 = vmatpush.bf16.msra.mxu1 %v3172_v3 }
  0x41   :  { %648 = vmatpush.bf16.msrb.mxu2 %v3205_v40 }
  0x43   :  { %271 = vmatmul.bf16.vlgmr.msra.gmra.mxu0 %v2535_v11 }
  0x44   :  { %837 = vmatpush.bf16.msrb.mxu0 %v3169_v1 }
  0x45   :  { %649 = vmatpush.bf16.msrb.mxu2 %v3212_v44 }
  0x48   :  { %838 = vmatpush.bf16.msrb.mxu0 %v3172_v3 }
  0x4c   :  { %1092 = vmatpush.bf16.msra.mxu0 %v3169_v1 }
  0x50   :  { %1093 = vmatpush.bf16.msra.mxu0 %v3172_v3 }
  0xa8   :  { %v302_v12 = vpop.f32.mrf.mxu1 }
  0xb0   :  { %v304_v13 = vpop.f32.mrf.mxu1 }
  0xc0   :  { %v272_v15 = vpop.f32.mrf.mxu0 }
  0xc1   :  { %v3189_v16 = vadd.f32 %v3186_v14, %v272_v15 }
  0xc3   :  { %v306_v17 = vadd.f32 %v302_v12, %v3189_v16 }
  0xc5   :  { %2577 = vtanh.f32 %v306_v17  ;;  %v2404_v19 = vmul.f32 -1.442695, %v306_v17 }
  0xc7   :  { %2579 = vpow2.f32 %v2404_v19 }
  0xcb   :  { %v2578_v18 = vpop.eup %2577 }
  0xcc   :  { %329 = vrot.lane.b32.xlu0 %v2578_v18, %s3032_s21 }
  0xcd   :  { %v2580_v20 = vpop.eup %2579 }
  0xce   :  { %v310_v21 = vadd.f32 1.0, %v2580_v20 }
  0xd0   :  { %2581 = vrcp.f32 %v310_v21  ;;  %v322_v27 = vand.u32 2147483648, %v310_v21  ;;  %vm316_vm1 = vweird.f32 %v310_v21  ;;  %v320_v28 = vand.u32 2147483647, %v310_v21 }
  0xd2   :  { %v323_v30 = vor.u32 1.1754944e-38, %v322_v27  ;;  %vm321_vm3 = vcmp.eq.f32.partialorder %v320_v28, 8.507059e+37 }
  0xd6   :  { %v2582_v22 = vpop.eup %2581 }
  0xd7   :  { %v312_v23 = vmul.f32 %v2582_v22, %v310_v21  ;;  %vm317_vm0 = vweird.f32 %v2582_v22 }
  0xd8   :  { %vm318_vm2 = vmor %vm316_vm1, %vm317_vm0 }
  0xd9   :  { %v313_v24 = vsub.f32 1.0, %v312_v23 }
  0xdb   :  { %v314_v25 = vmul.f32 %v2582_v22, %v313_v24 }
  0xdd   :  { %v315_v26 = vadd.f32 %v2582_v22, %v314_v25 }
  0xdf   :  { %v319_v29 = vsel %vm318_vm2, %v2582_v22, %v315_v26 }
  0xe0   :  { %v324_v32 = vsel %vm321_vm3, %v323_v30, %v319_v29 }
  0xe1   :  { %v327_v34 = vmul.f32 0.0, %v324_v32 }
 0x13e   :  { %v330_v31 = vpop.permute.xlu0 %329 }
 0x13f   :  { %v332_v33 = vmul.f32 %v330_v31, %v324_v32 }
 0x141   :  { %334 = vrot.lane.b32.xlu0 %v332_v33, %s3042_s2 }
 0x1b3   :  { %v335_v35 = vpop.permute.xlu0 %334 }
 0x1b4   :  { %v3194_v36 = vadd.f32 %v335_v35, %v327_v34 }
 0x1b6   :  { %2583 = vtanh.f32 %v3194_v36  ;;  %v476_v33 = vrot.slane %v3194_v36, 6 }
 0x1bc   :  { %v2584_v37 = vpop.eup %2583 }
 0x1bd   :  { %340 = vrot.lane.b32.xlu1 %v2584_v37, %s3032_s21 }
 0x22f   :  { %v341_v41 = vpop.permute.xlu1 %340 }
 0x230   :  { %v343_v42 = vmul.f32 %v341_v41, %v324_v32 }
 0x232   :  { %v431_v43 = vpack.c.bf16 %v343_v42, %v343_v42  ;;  %345 = vrot.lane.b32.xlu2 %v343_v42, %s3042_s2 }
 0x234   :  { %433 = vrot.lane.b32.xlu1 %v431_v43, %s3042_s2 }
 0x28c   :  { %v346_v45 = vpop.permute.xlu2 %345 }
 0x28d   :  { %v348_v46 = vsel %vm289_vm4, %v346_v45, 0.0 }
 0x28e   :  { %v349_v47 = vpack.c.bf16 %v348_v46, %v348_v46 }
 0x290   :  { %2421 = vmatmul.msk.bf16.vlgmr.msra.gmra.mxu2 %vm377_vm5, %v349_v47 }
 0x291   :  { %902 = vmatpush.bf16.msra.mxu2 %v3198_v38 }
 0x295   :  { %903 = vmatpush.bf16.msra.mxu2 %v3201_v39 }
 0x299   :  { %904 = vmatpush.bf16.msra.mxu2 %v3205_v40 }
 0x29d   :  { %905 = vmatpush.bf16.msra.mxu2 %v3212_v44 }
 0x2a6   :  { %v434_v48 = vpop.permute.xlu1 %433 }
 0x2a7   :  { %2423 = vmatmul.msk.bf16.vlgmr.msra.gmra.mxu3 %vm289_vm4, %v434_v48 }
 0x2a8   :  { %777 = vmatpush.bf16.msra.mxu3 %v3198_v38 }
 0x2ac   :  { %778 = vmatpush.bf16.msra.mxu3 %v3201_v39 }
 0x2b0   :  { %779 = vmatpush.bf16.msra.mxu3 %v3205_v40 }
 0x2b4   :  { %780 = vmatpush.bf16.msra.mxu3 %v3212_v44 }
 0x313   :  { %v390_v50 = vpop.f32.mrf.mxu2 }
 0x314   :  { %v391_v51 = vadd.f32 %v3236_v49, %v390_v50 }
 0x316   :  { %2585 = vtanh.f32 %v391_v51  ;;  %v2422_v59 = vmul.f32 -1.442695, %v391_v51 }
 0x31b   :  { %v392_v52 = vpop.f32.mrf.mxu2 }
 0x31c   :  { %v2586_v53 = vpop.eup %2585 }
 0x31d   :  { %416 = vrot.lane.b32.xlu0 %v2586_v53, %s3032_s21 }
 0x32a   :  { %v447_v54 = vpop.f32.mrf.mxu3 }
 0x32b   :  { %v452_v55 = vrot.slane %v447_v54, 6 }
 0x32d   :  { %v454_v56 = vadd.f32 %v452_v55, %v3189_v16 }
 0x32f   :  { %2587 = vtanh.f32 %v454_v56  ;;  %v2424_v60 = vmul.f32 -1.442695, %v454_v56 }
 0x330   :  { %2589 = vpow2.f32 %v2422_v59 }
 0x331   :  { %2591 = vpow2.f32 %v2424_v60 }
 0x332   :  { %v449_v57 = vpop.f32.mrf.mxu3 }
 0x335   :  { %v2588_v58 = vpop.eup %2587 }
 0x336   :  { %480 = vrot.lane.b32.xlu2 %v2588_v58, %s3032_s21  ;;  %v2590_v61 = vpop.eup %2589 }
 0x337   :  { %v2592_v62 = vpop.eup %2591  ;;  %v397_v63 = vadd.f32 1.0, %v2590_v61 }
 0x338   :  { %v458_v0 = vadd.f32 1.0, %v2592_v62 }
 0x339   :  { %2593 = vrcp.f32 %v397_v63  ;;  %v409_v12 = vand.u32 2147483648, %v397_v63  ;;  %vm403_vm8 = vweird.f32 %v397_v63  ;;  %v407_v15 = vand.u32 2147483647, %v397_v63 }
 0x33a   :  { %2595 = vrcp.f32 %v458_v0  ;;  %v470_v17 = vand.u32 2147483648, %v458_v0  ;;  %vm464_vm10 = vweird.f32 %v458_v0  ;;  %v468_v18 = vand.u32 2147483647, %v458_v0 }
 0x33b   :  { %v410_v20 = vor.u32 1.1754944e-38, %v409_v12  ;;  %vm408_vm12 = vcmp.eq.f32.partialorder %v407_v15, 8.507059e+37 }
 0x33c   :  { %v471_v22 = vor.u32 1.1754944e-38, %v470_v17  ;;  %vm469_vm13 = vcmp.eq.f32.partialorder %v468_v18, 8.507059e+37 }
 0x33f   :  { %v2594_v2 = vpop.eup %2593 }
 0x340   :  { %v2596_v4 = vpop.eup %2595  ;;  %v399_v5 = vmul.f32 %v2594_v2, %v397_v63  ;;  %vm404_vm6 = vweird.f32 %v2594_v2 }
 0x341   :  { %v460_v6 = vmul.f32 %v2596_v4, %v458_v0  ;;  %vm465_vm7 = vweird.f32 %v2596_v4  ;;  %vm405_vm9 = vmor %vm403_vm8, %vm404_vm6 }
 0x342   :  { %v400_v7 = vsub.f32 1.0, %v399_v5  ;;  %vm466_vm11 = vmor %vm464_vm10, %vm465_vm7 }
 0x343   :  { %v461_v8 = vsub.f32 1.0, %v460_v6 }
 0x344   :  { %v401_v9 = vmul.f32 %v2594_v2, %v400_v7 }
 0x345   :  { %v462_v10 = vmul.f32 %v2596_v4, %v461_v8 }
 0x346   :  { %v402_v11 = vadd.f32 %v2594_v2, %v401_v9 }
 0x347   :  { %v463_v13 = vadd.f32 %v2596_v4, %v462_v10 }
 0x348   :  { %v406_v19 = vsel %vm405_vm9, %v2594_v2, %v402_v11 }
 0x349   :  { %v467_v21 = vsel %vm466_vm11, %v2596_v4, %v463_v13  ;;  %v411_v24 = vsel %vm408_vm12, %v410_v20, %v406_v19 }
 0x34a   :  { %v472_v27 = vsel %vm469_vm13, %v471_v22, %v467_v21  ;;  %v414_v29 = vmul.f32 0.0, %v411_v24 }
 0x34b   :  { %v478_v34 = vmul.f32 %v476_v33, %v472_v27 }
 0x38f   :  { %v417_v23 = vpop.permute.xlu0 %416 }
 0x390   :  { %v419_v25 = vmul.f32 %v417_v23, %v411_v24  ;;  %v481_v26 = vpop.permute.xlu2 %480 }
 0x391   :  { %v483_v28 = vmul.f32 %v481_v26, %v472_v27 }
 0x392   :  { %421 = vrot.lane.b32.xlu2 %v419_v25, %s3042_s2 }
 0x393   :  { %485 = vrot.lane.b32.xlu1 %v483_v28, %s3042_s2 }
 0x3ec   :  { %v422_v30 = vpop.permute.xlu2 %421 }
 0x3ed   :  { %v3244_v31 = vadd.f32 %v422_v30, %v414_v29 }
 0x3ef   :  { %2597 = vtanh.f32 %v3244_v31 }
 0x3f5   :  { %v2598_v32 = vpop.eup %2597 }
 0x3f6   :  { %427 = vrot.lane.b32.xlu1 %v2598_v32, %s3032_s21 }
 0x405   :  { %v486_v35 = vpop.permute.xlu1 %485 }
 0x406   :  { %v3249_v37 = vadd.f32 %v486_v35, %v478_v34 }
 0x408   :  { %2599 = vtanh.f32 %v3249_v37 }
 0x40e   :  { %v2600_v41 = vpop.eup %2599 }
 0x40f   :  { %491 = vrot.lane.b32.xlu0 %v2600_v41, %s3032_s21  ;;  %v607_v41 = vrot.slane %v3249_v37, 6 }
 0x468   :  { %v428_v42 = vpop.permute.xlu1 %427 }
 0x469   :  { %v430_v43 = vmul.f32 %v428_v42, %v411_v24 }
 0x46b   :  { %v500_v45 = vrot.slane %v430_v43, 6 }
 0x46d   :  { %501 = vrot.lane.b32.xlu1 %v500_v45, %s3032_s21 }
 0x481   :  { %v492_v46 = vpop.permute.xlu0 %491 }
 0x482   :  { %v494_v47 = vmul.f32 %v492_v46, %v472_v27 }
 0x484   :  { %v561_v48 = vpack.c.bf16 %v494_v47, %v494_v47  ;;  %496 = vrot.lane.b32.xlu0 %v494_v47, %s3042_s2 }
 0x486   :  { %v563_v36 = vrot.slane %v561_v48, 1 }
 0x488   :  { %564 = vrot.lane.b32.xlu2 %v563_v36, %s3042_s2 }
 0x4df   :  { %v502_v51 = vpop.permute.xlu1 %501 }
 0x4e2   :  { %v565_v50 = vpop.permute.xlu2 %564 }
 0x4e3   :  { %2427 = vmatmul.msk.bf16.vlgmr.msrb.gmra.mxu3 %vm289_vm4, %v565_v50 }
 0x4e4   :  { %1032 = vmatpush.bf16.msrb.mxu3 %v3198_v38 }
 0x4e8   :  { %1033 = vmatpush.bf16.msrb.mxu3 %v3201_v39 }
 0x4ec   :  { %1034 = vmatpush.bf16.msrb.mxu3 %v3205_v40 }
 0x4f0   :  { %1035 = vmatpush.bf16.msrb.mxu3 %v3212_v44 }
 0x4f6   :  { %v497_v52 = vpop.permute.xlu0 %496 }
 0x4f7   :  { %v504_v53 = vsel %vm289_vm4, %v497_v52, %v502_v51 }
 0x4f8   :  { %v505_v54 = vpack.c.bf16 %v504_v53, %v504_v53 }
 0x4fa   :  { %v507_v55 = vrot.slane %v505_v54, 1 }
 0x4fc   :  { %2425 = vmatmul.msk.bf16.vlgmr.msrb.gmra.mxu1 %vm377_vm5, %v507_v55 }
 0x4fd   :  { %961 = vmatpush.bf16.msrb.mxu1 %v3169_v1 }
 0x501   :  { %962 = vmatpush.bf16.msrb.mxu1 %v3172_v3 }
 0x566   :  { %v578_v56 = vpop.f32.mrf.mxu3 }
 0x567   :  { %v583_v57 = vrot.slane %v578_v56, 4 }
 0x569   :  { %v585_v58 = vadd.f32 %v583_v57, %v3189_v16 }
 0x56b   :  { %2601 = vtanh.f32 %v585_v58  ;;  %v2428_v4 = vmul.f32 -1.442695, %v585_v58 }
 0x56e   :  { %v580_v59 = vpop.f32.mrf.mxu3 }
 0x571   :  { %v2602_v60 = vpop.eup %2601 }
 0x572   :  { %611 = vrot.lane.b32.xlu0 %v2602_v60, %s3032_s21 }
 0x579   :  { %v520_v61 = vpop.f32.mrf.mxu1 }
 0x57a   :  { %v521_v62 = vadd.f32 %v3236_v49, %v520_v61 }
 0x57c   :  { %2603 = vtanh.f32 %v521_v62  ;;  %v2426_v2 = vmul.f32 -1.442695, %v521_v62 }
 0x57e   :  { %2605 = vpow2.f32 %v2426_v2 }
 0x57f   :  { %2607 = vpow2.f32 %v2428_v4 }
 0x581   :  { %v522_v63 = vpop.f32.mrf.mxu1 }
 0x582   :  { %v2604_v0 = vpop.eup %2603 }
 0x583   :  { %546 = vrot.lane.b32.xlu2 %v2604_v0, %s3032_s21 }
 0x584   :  { %v2606_v5 = vpop.eup %2605 }
 0x585   :  { %v527_v6 = vadd.f32 1.0, %v2606_v5  ;;  %v2608_v7 = vpop.eup %2607 }
 0x586   :  { %v589_v8 = vadd.f32 1.0, %v2608_v7 }
 0x587   :  { %2609 = vrcp.f32 %v527_v6  ;;  %v539_v19 = vand.u32 2147483648, %v527_v6  ;;  %vm533_vm15 = vweird.f32 %v527_v6  ;;  %v537_v20 = vand.u32 2147483647, %v527_v6 }
 0x588   :  { %2611 = vrcp.f32 %v589_v8  ;;  %v601_v28 = vand.u32 2147483648, %v589_v8  ;;  %vm595_vm3 = vweird.f32 %v589_v8  ;;  %v599_v29 = vand.u32 2147483647, %v589_v8 }
 0x589   :  { %v540_v23 = vor.u32 1.1754944e-38, %v539_v19  ;;  %vm538_vm1 = vcmp.eq.f32.partialorder %v537_v20, 8.507059e+37 }
 0x58a   :  { %v602_v32 = vor.u32 1.1754944e-38, %v601_v28  ;;  %vm600_vm7 = vcmp.eq.f32.partialorder %v599_v29, 8.507059e+37 }
 0x58d   :  { %v2610_v9 = vpop.eup %2609 }
 0x58e   :  { %v529_v10 = vmul.f32 %v2610_v9, %v527_v6  ;;  %v2612_v11 = vpop.eup %2611  ;;  %vm534_vm14 = vweird.f32 %v2610_v9 }
 0x58f   :  { %v591_v13 = vmul.f32 %v2612_v11, %v589_v8  ;;  %vm535_vm0 = vmor %vm533_vm15, %vm534_vm14  ;;  %vm596_vm2 = vweird.f32 %v2612_v11 }
 0x590   :  { %v530_v12 = vsub.f32 1.0, %v529_v10  ;;  %vm597_vm6 = vmor %vm595_vm3, %vm596_vm2 }
 0x591   :  { %v592_v17 = vsub.f32 1.0, %v591_v13 }
 0x592   :  { %v531_v15 = vmul.f32 %v2610_v9, %v530_v12 }
 0x593   :  { %v593_v21 = vmul.f32 %v2612_v11, %v592_v17 }
 0x594   :  { %v532_v18 = vadd.f32 %v2610_v9, %v531_v15 }
 0x595   :  { %v594_v26 = vadd.f32 %v2612_v11, %v593_v21 }
 0x596   :  { %v536_v22 = vsel %vm535_vm0, %v2610_v9, %v532_v18 }
 0x597   :  { %v541_v25 = vsel %vm538_vm1, %v540_v23, %v536_v22  ;;  %v598_v30 = vsel %vm597_vm6, %v2612_v11, %v594_v26 }
 0x598   :  { %v603_v34 = vsel %vm600_vm7, %v602_v32, %v598_v30  ;;  %v544_v47 = vmul.f32 %v541_v25, %v3244_v31 }
 0x599   :  { %v609_v42 = vmul.f32 %v607_v41, %v603_v34 }
 0x5dd   :  { %v547_v24 = vpop.permute.xlu2 %546 }
 0x5de   :  { %v549_v27 = vmul.f32 %v547_v24, %v541_v25 }
 0x5e0   :  { %551 = vrot.lane.b32.xlu1 %v549_v27, %s3042_s2 }
 0x5e4   :  { %v612_v33 = vpop.permute.xlu0 %611 }
 0x5e5   :  { %v614_v35 = vmul.f32 %v612_v33, %v603_v34 }
 0x5e7   :  { %616 = vrot.lane.b32.xlu2 %v614_v35, %s3042_s2 }
 0x641   :  { %v617_v43 = vpop.permute.xlu2 %616 }
 0x642   :  { %v3272_v45 = vadd.f32 %v617_v43, %v609_v42 }
 0x644   :  { %2613 = vtanh.f32 %v3272_v45 }
 0x64a   :  { %v2614_v46 = vpop.eup %2613 }
 0x64b   :  { %622 = vrot.lane.b32.xlu1 %v2614_v46, %s3032_s21  ;;  %v738_v46 = vrot.slane %v3272_v45, 6 }
 0x652   :  { %v552_v48 = vpop.permute.xlu1 %551 }
 0x653   :  { %v3277_v36 = vadd.f32 %v552_v48, %v544_v47 }
 0x655   :  { %2615 = vtanh.f32 %v3277_v36 }
 0x65b   :  { %v2616_v50 = vpop.eup %2615 }
 0x65c   :  { %557 = vrot.lane.b32.xlu0 %v2616_v50, %s3032_s21 }
 0x6bd   :  { %v623_v37 = vpop.permute.xlu1 %622 }
 0x6be   :  { %v625_v51 = vmul.f32 %v623_v37, %v603_v34 }
 0x6c0   :  { %v692_v52 = vpack.c.bf16 %v625_v51, %v625_v51  ;;  %627 = vrot.lane.b32.xlu2 %v625_v51, %s3042_s2 }
 0x6c2   :  { %v694_v53 = vrot.slane %v692_v52, 2 }
 0x6c4   :  { %695 = vrot.lane.b32.xlu1 %v694_v53, %s3042_s2 }
 0x6ce   :  { %v558_v54 = vpop.permute.xlu0 %557 }
 0x6cf   :  { %v560_v55 = vmul.f32 %v558_v54, %v541_v25 }
 0x6d1   :  { %v631_v56 = vrot.slane %v560_v55, 4 }
 0x6d3   :  { %632 = vrot.lane.b32.xlu0 %v631_v56, %s3032_s21 }
 0x71a   :  { %v628_v57 = vpop.permute.xlu2 %627 }
 0x736   :  { %v696_v31 = vpop.permute.xlu1 %695 }
 0x737   :  { %2431 = vmatmul.msk.bf16.vlgmr.msra.gmra.mxu1 %vm289_vm4, %v696_v31 }
 0x738   :  { %1223 = vmatpush.bf16.msra.mxu1 %v3169_v1 }
 0x73c   :  { %1224 = vmatpush.bf16.msra.mxu1 %v3172_v3 }
 0x745   :  { %v633_v58 = vpop.permute.xlu0 %632 }
 0x746   :  { %v635_v59 = vsel %vm289_vm4, %v628_v57, %v633_v58 }
 0x747   :  { %v636_v60 = vpack.c.bf16 %v635_v59, %v635_v59 }
 0x749   :  { %v638_v61 = vrot.slane %v636_v60, 2 }
 0x74b   :  { %2429 = vmatmul.msk.bf16.vlgmr.msrb.gmra.mxu2 %vm377_vm5, %v638_v61 }
 0x74c   :  { %1163 = vmatpush.bf16.msrb.mxu2 %v3198_v38 }
 0x750   :  { %1164 = vmatpush.bf16.msrb.mxu2 %v3201_v39 }
 0x754   :  { %1165 = vmatpush.bf16.msrb.mxu2 %v3205_v40 }
 0x758   :  { %1166 = vmatpush.bf16.msrb.mxu2 %v3212_v44 }
 0x7b4   :  { %v709_v62 = vpop.f32.mrf.mxu1 }
 0x7b5   :  { %v714_v1 = vrot.slane %v709_v62, 2 }
 0x7b7   :  { %v716_v3 = vadd.f32 %v714_v1, %v3189_v16 }
 0x7b9   :  { %2617 = vtanh.f32 %v716_v3  ;;  %v2432_v7 = vmul.f32 -1.442695, %v716_v3 }
 0x7bc   :  { %v711_v63 = vpop.f32.mrf.mxu1 }
 0x7bd   :  { %v274_v63 = vpop.f32.mrf.mxu0 }
 0x7bf   :  { %v2618_v0 = vpop.eup %2617 }
 0x7c0   :  { %742 = vrot.lane.b32.xlu0 %v2618_v0, %s3032_s21  ;;  %v3320_v0 = vadd.f32 %v3186_v14, %v274_v63 }
 0x7ce   :  { %v651_v2 = vpop.f32.mrf.mxu2 }
 0x7cf   :  { %v652_v4 = vadd.f32 %v3236_v49, %v651_v2 }
 0x7d1   :  { %2619 = vtanh.f32 %v652_v4  ;;  %v2430_v8 = vmul.f32 -1.442695, %v652_v4 }
 0x7d2   :  { %2621 = vpow2.f32 %v2432_v7 }
 0x7d3   :  { %2623 = vpow2.f32 %v2430_v8 }
 0x7d6   :  { %v653_v5 = vpop.f32.mrf.mxu2 }
 0x7d7   :  { %v2620_v6 = vpop.eup %2619 }
 0x7d8   :  { %677 = vrot.lane.b32.xlu2 %v2620_v6, %s3032_s21  ;;  %v2622_v9 = vpop.eup %2621 }
 0x7d9   :  { %v2624_v10 = vpop.eup %2623  ;;  %v720_v16 = vadd.f32 1.0, %v2622_v9 }
 0x7da   :  { %v658_v11 = vadd.f32 1.0, %v2624_v10 }
 0x7db   :  { %2625 = vrcp.f32 %v720_v16  ;;  %vm726_vm10 = vweird.f32 %v720_v16  ;;  %v732_v25 = vand.u32 2147483648, %v720_v16  ;;  %v730_v27 = vand.u32 2147483647, %v720_v16 }
 0x7dc   :  { %2627 = vrcp.f32 %v658_v11  ;;  %v670_v24 = vand.u32 2147483648, %v658_v11  ;;  %vm664_vm11 = vweird.f32 %v658_v11  ;;  %v668_v26 = vand.u32 2147483647, %v658_v11 }
 0x7dd   :  { %v733_v32 = vor.u32 1.1754944e-38, %v732_v25  ;;  %vm731_vm15 = vcmp.eq.f32.partialorder %v730_v27, 8.507059e+37 }
 0x7de   :  { %v671_v30 = vor.u32 1.1754944e-38, %v670_v24  ;;  %vm669_vm14 = vcmp.eq.f32.partialorder %v668_v26, 8.507059e+37 }
 0x7e1   :  { %v2626_v12 = vpop.eup %2625 }
 0x7e2   :  { %v2628_v13 = vpop.eup %2627  ;;  %v722_v17 = vmul.f32 %v2626_v12, %v720_v16  ;;  %vm727_vm8 = vweird.f32 %v2626_v12 }
 0x7e3   :  { %v660_v15 = vmul.f32 %v2628_v13, %v658_v11  ;;  %vm665_vm9 = vweird.f32 %v2628_v13  ;;  %vm728_vm12 = vmor %vm726_vm10, %vm727_vm8 }
 0x7e4   :  { %v723_v19 = vsub.f32 1.0, %v722_v17  ;;  %vm666_vm13 = vmor %vm664_vm11, %vm665_vm9 }
 0x7e5   :  { %v661_v18 = vsub.f32 1.0, %v660_v15 }
 0x7e6   :  { %v724_v21 = vmul.f32 %v2626_v12, %v723_v19 }
 0x7e7   :  { %v662_v20 = vmul.f32 %v2628_v13, %v661_v18 }
 0x7e8   :  { %v725_v23 = vadd.f32 %v2626_v12, %v724_v21 }
 0x7e9   :  { %v663_v22 = vadd.f32 %v2628_v13, %v662_v20 }
 0x7ea   :  { %v729_v29 = vsel %vm728_vm12, %v2626_v12, %v725_v23 }
 0x7eb   :  { %v667_v28 = vsel %vm666_vm13, %v2628_v13, %v663_v22  ;;  %v734_v35 = vsel %vm731_vm15, %v733_v32, %v729_v29 }
 0x7ec   :  { %v672_v34 = vsel %vm669_vm14, %v671_v30, %v667_v28  ;;  %v740_v47 = vmul.f32 %v738_v46, %v734_v35 }
 0x7ed   :  { %v675_v51 = vmul.f32 %v672_v34, %v3277_v36 }
 0x832   :  { %v678_v33 = vpop.permute.xlu2 %677  ;;  %v743_v41 = vpop.permute.xlu0 %742 }
 0x833   :  { %v680_v42 = vmul.f32 %v678_v33, %v672_v34  ;;  %v745_v43 = vmul.f32 %v743_v41, %v734_v35 }
 0x835   :  { %682 = vrot.lane.b32.xlu1 %v680_v42, %s3042_s2  ;;  %747 = vrot.lane.b32.xlu2 %v745_v43, %s3042_s2 }
 0x88f   :  { %v748_v48 = vpop.permute.xlu2 %747 }
 0x890   :  { %v3300_v50 = vadd.f32 %v748_v48, %v740_v47 }
 0x892   :  { %2629 = vtanh.f32 %v3300_v50  ;;  %v866_v43 = vrot.slane %v3300_v50, 6 }
 0x898   :  { %v2630_v37 = vpop.eup %2629 }
 0x899   :  { %753 = vrot.lane.b32.xlu1 %v2630_v37, %s3032_s21 }
 0x8a7   :  { %v683_v52 = vpop.permute.xlu1 %682 }
 0x8a8   :  { %v3305_v53 = vadd.f32 %v683_v52, %v675_v51 }
 0x8aa   :  { %2631 = vtanh.f32 %v3305_v53 }
 0x8b0   :  { %v2632_v54 = vpop.eup %2631 }
 0x8b1   :  { %688 = vrot.lane.b32.xlu0 %v2632_v54, %s3032_s21 }
 0x90b   :  { %v754_v45 = vpop.permute.xlu1 %753 }
 0x90c   :  { %v756_v55 = vmul.f32 %v754_v45, %v734_v35 }
 0x90e   :  { %v823_v56 = vpack.c.bf16 %v756_v55, %v756_v55  ;;  %758 = vrot.lane.b32.xlu2 %v756_v55, %s3042_s2 }
 0x910   :  { %v825_v31 = vrot.slane %v823_v56, 3 }
 0x912   :  { %826 = vrot.lane.b32.xlu1 %v825_v31, %s3042_s2 }
 0x923   :  { %v689_v57 = vpop.permute.xlu0 %688 }
 0x924   :  { %v691_v58 = vmul.f32 %v689_v57, %v672_v34 }
 0x926   :  { %v762_v59 = vrot.slane %v691_v58, 2 }
 0x928   :  { %763 = vrot.lane.b32.xlu0 %v762_v59, %s3032_s21 }
 0x968   :  { %v759_v60 = vpop.permute.xlu2 %758 }
 0x984   :  { %v827_v36 = vpop.permute.xlu1 %826 }
 0x985   :  { %2435 = vmatmul.msk.bf16.vlgmr.msrb.gmra.mxu0 %vm289_vm4, %v827_v36 }
 0x99a   :  { %v764_v61 = vpop.permute.xlu0 %763 }
 0x99b   :  { %v766_v62 = vsel %vm289_vm4, %v759_v60, %v764_v61 }
 0x99c   :  { %v767_v1 = vpack.c.bf16 %v766_v62, %v766_v62 }
 0x99e   :  { %v769_v3 = vrot.slane %v767_v1, 3 }
 0x9a0   :  { %2433 = vmatmul.msk.bf16.vlgmr.msra.gmra.mxu3 %vm377_vm5, %v769_v3 }
 0x9a1   :  { %1294 = vmatpush.bf16.msra.mxu3 %v3198_v38 }
 0x9a5   :  { %1295 = vmatpush.bf16.msra.mxu3 %v3201_v39 }
 0x9a9   :  { %1296 = vmatpush.bf16.msra.mxu3 %v3205_v40 }
 0x9ad   :  { %1297 = vmatpush.bf16.msra.mxu3 %v3212_v44 }
 0xa02   :  { %v840_v2 = vpop.f32.mrf.mxu0 }
 0xa03   :  { %v844_v4 = vadd.f32 %v840_v2, %v3320_v0 }
 0xa05   :  { %2633 = vtanh.f32 %v844_v4  ;;  %v2436_v44 = vmul.f32 -1.442695, %v844_v4 }
 0xa0a   :  { %v842_v5 = vpop.f32.mrf.mxu0 }
 0xa0b   :  { %v2634_v6 = vpop.eup %2633 }
 0xa0c   :  { %870 = vrot.lane.b32.xlu0 %v2634_v6, %s3032_s21 }
 0xa23   :  { %v782_v7 = vpop.f32.mrf.mxu3 }
 0xa24   :  { %v783_v38 = vadd.f32 %v3236_v49, %v782_v7 }
 0xa26   :  { %2635 = vtanh.f32 %v783_v38  ;;  %v2434_v14 = vmul.f32 -1.442695, %v783_v38 }
 0xa27   :  { %2637 = vpow2.f32 %v2436_v44 }
 0xa28   :  { %2639 = vpow2.f32 %v2434_v14 }
 0xa2b   :  { %v784_v39 = vpop.f32.mrf.mxu3 }
 0xa2c   :  { %v2636_v40 = vpop.eup %2635 }
 0xa2d   :  { %808 = vrot.lane.b32.xlu2 %v2636_v40, %s3032_s21  ;;  %v2638_v8 = vpop.eup %2637 }
 0xa2e   :  { %v848_v9 = vadd.f32 1.0, %v2638_v8  ;;  %v2640_v10 = vpop.eup %2639 }
 0xa2f   :  { %v789_v16 = vadd.f32 1.0, %v2640_v10 }
 0xa30   :  { %2641 = vrcp.f32 %v848_v9  ;;  %v860_v20 = vand.u32 2147483648, %v848_v9  ;;  %vm854_vm1 = vweird.f32 %v848_v9  ;;  %v858_v22 = vand.u32 2147483647, %v848_v9 }
 0xa31   :  { %2643 = vrcp.f32 %v789_v16  ;;  %v801_v30 = vand.u32 2147483648, %v789_v16  ;;  %vm795_vm7 = vweird.f32 %v789_v16  ;;  %v799_v32 = vand.u32 2147483647, %v789_v16 }
 0xa32   :  { %v861_v24 = vor.u32 1.1754944e-38, %v860_v20  ;;  %vm859_vm3 = vcmp.eq.f32.partialorder %v858_v22, 8.507059e+37 }
 0xa33   :  { %v802_v34 = vor.u32 1.1754944e-38, %v801_v30  ;;  %vm800_vm9 = vcmp.eq.f32.partialorder %v799_v32, 8.507059e+37 }
 0xa36   :  { %v2642_v11 = vpop.eup %2641 }
 0xa37   :  { %v850_v12 = vmul.f32 %v2642_v11, %v848_v9  ;;  %v2644_v15 = vpop.eup %2643  ;;  %vm855_vm0 = vweird.f32 %v2642_v11 }
 0xa38   :  { %v791_v18 = vmul.f32 %v2644_v15, %v789_v16  ;;  %vm856_vm2 = vmor %vm854_vm1, %vm855_vm0  ;;  %vm796_vm6 = vweird.f32 %v2644_v15 }
 0xa39   :  { %v851_v13 = vsub.f32 1.0, %v850_v12  ;;  %vm797_vm8 = vmor %vm795_vm7, %vm796_vm6 }
 0xa3a   :  { %v792_v21 = vsub.f32 1.0, %v791_v18 }
 0xa3b   :  { %v852_v17 = vmul.f32 %v2642_v11, %v851_v13 }
 0xa3c   :  { %v793_v25 = vmul.f32 %v2644_v15, %v792_v21 }
 0xa3d   :  { %v853_v19 = vadd.f32 %v2642_v11, %v852_v17 }
 0xa3e   :  { %v794_v29 = vadd.f32 %v2644_v15, %v793_v25 }
 0xa3f   :  { %v857_v23 = vsel %vm856_vm2, %v2642_v11, %v853_v19 }
 0xa40   :  { %v862_v26 = vsel %vm859_vm3, %v861_v24, %v857_v23  ;;  %v798_v33 = vsel %vm797_vm8, %v2644_v15, %v794_v29 }
 0xa41   :  { %v803_v41 = vsel %vm800_vm9, %v802_v34, %v798_v33  ;;  %v868_v46 = vmul.f32 %v866_v43, %v862_v26 }
 0xa42   :  { %v806_v51 = vmul.f32 %v803_v41, %v3305_v53 }
 0xa7e   :  { %v871_v27 = vpop.permute.xlu0 %870 }
 0xa7f   :  { %v873_v28 = vmul.f32 %v871_v27, %v862_v26 }
 0xa81   :  { %875 = vrot.lane.b32.xlu2 %v873_v28, %s3042_s2 }
 0xa87   :  { %v809_v35 = vpop.permute.xlu2 %808 }
 0xa88   :  { %v811_v42 = vmul.f32 %v809_v35, %v803_v41 }
 0xa8a   :  { %813 = vrot.lane.b32.xlu1 %v811_v42, %s3042_s2 }
 0xadb   :  { %v876_v47 = vpop.permute.xlu2 %875 }
 0xadc   :  { %v3329_v48 = vadd.f32 %v876_v47, %v868_v46 }
 0xade   :  { %2645 = vtanh.f32 %v3329_v48  ;;  %v993_v34 = vrot.slane %v3329_v48, 6 }
 0xae4   :  { %v2646_v37 = vpop.eup %2645 }
 0xae5   :  { %881 = vrot.lane.b32.xlu1 %v2646_v37, %s3032_s21 }
 0xafc   :  { %v814_v52 = vpop.permute.xlu1 %813 }
 0xafd   :  { %v3334_v54 = vadd.f32 %v814_v52, %v806_v51 }
 0xaff   :  { %2647 = vtanh.f32 %v3334_v54 }
 0xb05   :  { %v2648_v45 = vpop.eup %2647 }
 0xb06   :  { %819 = vrot.lane.b32.xlu0 %v2648_v45, %s3032_s21 }
 0xb57   :  { %v882_v50 = vpop.permute.xlu1 %881 }
 0xb58   :  { %v884_v55 = vmul.f32 %v882_v50, %v862_v26 }
 0xb5a   :  { %v948_v56 = vpack.c.bf16 %v884_v55, %v884_v55  ;;  %886 = vrot.lane.b32.xlu2 %v884_v55, %s3042_s2 }
 0xb5c   :  { %950 = vrot.lane.b32.xlu1 %v948_v56, %s3042_s2 }
 0xb78   :  { %v820_v31 = vpop.permute.xlu0 %819 }
 0xb79   :  { %v822_v57 = vmul.f32 %v820_v31, %v803_v41 }
 0xb7b   :  { %890 = vrot.lane.b32.xlu0 %v822_v57, %s3032_s21 }
 0xbb4   :  { %v887_v58 = vpop.permute.xlu2 %886 }
 0xbce   :  { %v951_v53 = vpop.permute.xlu1 %950 }
 0xbcf   :  { %2439 = vmatmul.msk.bf16.vlgmr.msrb.gmra.mxu1 %vm289_vm4, %v951_v53 }
 0xbed   :  { %v891_v59 = vpop.permute.xlu0 %890 }
 0xbee   :  { %v893_v36 = vsel %vm289_vm4, %v887_v58, %v891_v59 }
 0xbef   :  { %v894_v60 = vpack.c.bf16 %v893_v36, %v893_v36 }
 0xbf1   :  { %2437 = vmatmul.msk.bf16.vlgmr.msra.gmra.mxu2 %vm377_vm5, %v894_v60 }
 0xc4c   :  { %v964_v61 = vpop.f32.mrf.mxu1 }
 0xc4d   :  { %v969_v62 = vrot.slane %v964_v61, 6 }
 0xc4f   :  { %v971_v1 = vadd.f32 %v969_v62, %v3320_v0 }
 0xc51   :  { %2649 = vtanh.f32 %v971_v1  ;;  %v2440_v7 = vmul.f32 -1.442695, %v971_v1 }
 0xc54   :  { %v966_v3 = vpop.f32.mrf.mxu1 }
 0xc57   :  { %v2650_v63 = vpop.eup %2649 }
 0xc58   :  { %997 = vrot.lane.b32.xlu0 %v2650_v63, %s3032_s21 }
 0xc74   :  { %v907_v2 = vpop.f32.mrf.mxu2 }
 0xc75   :  { %v908_v4 = vadd.f32 %v3236_v49, %v907_v2 }
 0xc77   :  { %2651 = vtanh.f32 %v908_v4  ;;  %v2438_v40 = vmul.f32 -1.442695, %v908_v4 }
 0xc78   :  { %2653 = vpow2.f32 %v2440_v7 }
 0xc7c   :  { %v909_v5 = vpop.f32.mrf.mxu2 }
 0xc7d   :  { %v2652_v6 = vpop.eup %2651 }
 0xc7e   :  { %933 = vrot.lane.b32.xlu2 %v2652_v6, %s3032_s21  ;;  %v2654_v38 = vpop.eup %2653 }
 0xc7f   :  { %v975_v39 = vadd.f32 1.0, %v2654_v38 }
 0xc81   :  { %2655 = vrcp.f32 %v975_v39  ;;  %v987_v13 = vand.u32 2147483648, %v975_v39  ;;  %vm981_vm11 = vweird.f32 %v975_v39  ;;  %v985_v15 = vand.u32 2147483647, %v975_v39 }
 0xc82   :  { %2657 = vpow2.f32 %v2438_v40 }
 0xc83   :  { %v988_v19 = vor.u32 1.1754944e-38, %v987_v13  ;;  %vm986_vm13 = vcmp.eq.f32.partialorder %v985_v15, 8.507059e+37 }
 0xc87   :  { %v2656_v44 = vpop.eup %2655 }
 0xc88   :  { %v2658_v14 = vpop.eup %2657  ;;  %v977_v8 = vmul.f32 %v2656_v44, %v975_v39  ;;  %vm982_vm10 = vweird.f32 %v2656_v44 }
 0xc89   :  { %v914_v9 = vadd.f32 1.0, %v2658_v14  ;;  %vm983_vm12 = vmor %vm981_vm11, %vm982_vm10 }
 0xc8a   :  { %v978_v10 = vsub.f32 1.0, %v977_v8 }
 0xc8b   :  { %2659 = vrcp.f32 %v914_v9  ;;  %v926_v26 = vand.u32 2147483648, %v914_v9  ;;  %vm920_vm15 = vweird.f32 %v914_v9  ;;  %v924_v27 = vand.u32 2147483647, %v914_v9 }
 0xc8c   :  { %v979_v16 = vmul.f32 %v2656_v44, %v978_v10 }
 0xc8d   :  { %v927_v29 = vor.u32 1.1754944e-38, %v926_v26  ;;  %vm925_vm1 = vcmp.eq.f32.partialorder %v924_v27, 8.507059e+37 }
 0xc8e   :  { %v980_v12 = vadd.f32 %v2656_v44, %v979_v16 }
 0xc90   :  { %v984_v18 = vsel %vm983_vm12, %v2656_v44, %v980_v12 }
 0xc91   :  { %v2660_v11 = vpop.eup %2659  ;;  %v989_v21 = vsel %vm986_vm13, %v988_v19, %v984_v18 }
 0xc92   :  { %v916_v17 = vmul.f32 %v2660_v11, %v914_v9  ;;  %vm921_vm14 = vweird.f32 %v2660_v11  ;;  %v995_v35 = vmul.f32 %v993_v34, %v989_v21 }
 0xc93   :  { %vm922_vm0 = vmor %vm920_vm15, %vm921_vm14 }
 0xc94   :  { %v917_v20 = vsub.f32 1.0, %v916_v17 }
 0xc96   :  { %v918_v24 = vmul.f32 %v2660_v11, %v917_v20 }
 0xc98   :  { %v919_v25 = vadd.f32 %v2660_v11, %v918_v24 }
 0xc9a   :  { %v923_v28 = vsel %vm922_vm0, %v2660_v11, %v919_v25 }
 0xc9b   :  { %v928_v32 = vsel %vm925_vm1, %v927_v29, %v923_v28 }
 0xc9c   :  { %v931_v46 = vmul.f32 %v928_v32, %v3334_v54 }
 0xcca   :  { %v998_v22 = vpop.permute.xlu0 %997 }
 0xccb   :  { %v1000_v23 = vmul.f32 %v998_v22, %v989_v21 }
 0xccd   :  { %1002 = vrot.lane.b32.xlu2 %v1000_v23, %s3042_s2 }
 0xcd8   :  { %v934_v30 = vpop.permute.xlu2 %933 }
 0xcd9   :  { %v936_v33 = vmul.f32 %v934_v30, %v928_v32 }
 0xcdb   :  { %938 = vrot.lane.b32.xlu1 %v936_v33, %s3042_s2 }
 0xd27   :  { %v1003_v41 = vpop.permute.xlu2 %1002 }
 0xd28   :  { %v3351_v42 = vadd.f32 %v1003_v41, %v995_v35 }
 0xd2a   :  { %2661 = vtanh.f32 %v3351_v42 }
 0xd30   :  { %v2662_v43 = vpop.eup %2661 }
 0xd31   :  { %1008 = vrot.lane.b32.xlu1 %v2662_v43, %s3032_s21 }
 0xd4d   :  { %v939_v47 = vpop.permute.xlu1 %938 }
 0xd4e   :  { %v3356_v37 = vadd.f32 %v939_v47, %v931_v46 }
 0xd50   :  { %2663 = vtanh.f32 %v3356_v37 }
 0xd56   :  { %v2664_v51 = vpop.eup %2663 }
 0xd57   :  { %944 = vrot.lane.b32.xlu0 %v2664_v51, %s3032_s21 }
 0xda3   :  { %v1009_v48 = vpop.permute.xlu1 %1008 }
 0xda4   :  { %v1011_v52 = vmul.f32 %v1009_v48, %v989_v21 }
 0xda6   :  { %v1078_v45 = vpack.c.bf16 %v1011_v52, %v1011_v52  ;;  %1013 = vrot.lane.b32.xlu2 %v1011_v52, %s3042_s2 }
 0xda8   :  { %v1080_v50 = vrot.slane %v1078_v45, 1 }
 0xdaa   :  { %1081 = vrot.lane.b32.xlu1 %v1080_v50, %s3042_s2 }
 0xdc9   :  { %v945_v55 = vpop.permute.xlu0 %944 }
 0xdca   :  { %v947_v56 = vmul.f32 %v945_v55, %v928_v32  ;;  %v1124_v32 = vrot.slane %v3351_v42, 6 }
 0xdcc   :  { %v1017_v31 = vrot.slane %v947_v56, 6 }
 0xdce   :  { %1018 = vrot.lane.b32.xlu0 %v1017_v31, %s3032_s21 }
 0xe00   :  { %v1014_v57 = vpop.permute.xlu2 %1013 }
 0xe1c   :  { %v1082_v54 = vpop.permute.xlu1 %1081 }
 0xe1d   :  { %2443 = vmatmul.msk.bf16.vlgmr.msra.gmra.mxu0 %vm289_vm4, %v1082_v54 }
 0xe40   :  { %v1019_v53 = vpop.permute.xlu0 %1018 }
 0xe41   :  { %v1021_v58 = vsel %vm289_vm4, %v1014_v57, %v1019_v53 }
 0xe42   :  { %v1022_v59 = vpack.c.bf16 %v1021_v58, %v1021_v58 }
 0xe44   :  { %v1024_v36 = vrot.slane %v1022_v59, 1 }
 0xe46   :  { %2441 = vmatmul.msk.bf16.vlgmr.msrb.gmra.mxu3 %vm377_vm5, %v1024_v36 }
 0xe9a   :  { %v1095_v60 = vpop.f32.mrf.mxu0 }
 0xe9b   :  { %v1100_v61 = vrot.slane %v1095_v60, 4 }
 0xe9d   :  { %v1102_v62 = vadd.f32 %v1100_v61, %v3320_v0 }
 0xe9f   :  { %2665 = vtanh.f32 %v1102_v62  ;;  %v2444_v6 = vmul.f32 -1.442695, %v1102_v62 }
 0xea2   :  { %v1097_v1 = vpop.f32.mrf.mxu0 }
 0xea5   :  { %v2666_v3 = vpop.eup %2665 }
 0xea6   :  { %1128 = vrot.lane.b32.xlu0 %v2666_v3, %s3032_s21  ;;  %v3393_v3 = vld [vmem:[%s3701_s5] ss:$0 sm:$0xff] }
 0xec9   :  { %v1037_v63 = vpop.f32.mrf.mxu3 }
 0xeca   :  { %v1038_v2 = vadd.f32 %v3236_v49, %v1037_v63 }
 0xecc   :  { %2667 = vtanh.f32 %v1038_v2  ;;  %v2442_v39 = vmul.f32 -1.442695, %v1038_v2 }
 0xecd   :  { %2669 = vpow2.f32 %v2444_v6 }
 0xed1   :  { %v1039_v4 = vpop.f32.mrf.mxu3 }
 0xed2   :  { %v2668_v5 = vpop.eup %2667 }
 0xed3   :  { %1063 = vrot.lane.b32.xlu2 %v2668_v5, %s3032_s21  ;;  %v2670_v7 = vpop.eup %2669 }
 0xed4   :  { %v1106_v38 = vadd.f32 1.0, %v2670_v7 }
 0xed6   :  { %2671 = vrcp.f32 %v1106_v38  ;;  %v1118_v16 = vand.u32 2147483648, %v1106_v38  ;;  %vm1112_vm3 = vweird.f32 %v1106_v38  ;;  %v1116_v11 = vand.u32 2147483647, %v1106_v38 }
 0xed7   :  { %2673 = vpow2.f32 %v2442_v39 }
 0xed8   :  { %v1119_v13 = vor.u32 1.1754944e-38, %v1118_v16  ;;  %vm1117_vm7 = vcmp.eq.f32.partialorder %v1116_v11, 8.507059e+37 }
 0xedc   :  { %v2672_v40 = vpop.eup %2671 }
 0xedd   :  { %v1108_v44 = vmul.f32 %v2672_v40, %v1106_v38  ;;  %v2674_v8 = vpop.eup %2673  ;;  %vm1113_vm2 = vweird.f32 %v2672_v40 }
 0xede   :  { %v1044_v9 = vadd.f32 1.0, %v2674_v8  ;;  %vm1114_vm6 = vmor %vm1112_vm3, %vm1113_vm2 }
 0xedf   :  { %v1109_v14 = vsub.f32 1.0, %v1108_v44 }
 0xee0   :  { %2675 = vrcp.f32 %v1044_v9  ;;  %v1056_v24 = vand.u32 2147483648, %v1044_v9  ;;  %vm1050_vm9 = vweird.f32 %v1044_v9  ;;  %v1054_v25 = vand.u32 2147483647, %v1044_v9 }
 0xee1   :  { %v1110_v10 = vmul.f32 %v2672_v40, %v1109_v14 }
 0xee2   :  { %v1057_v27 = vor.u32 1.1754944e-38, %v1056_v24  ;;  %vm1055_vm11 = vcmp.eq.f32.partialorder %v1054_v25, 8.507059e+37 }
 0xee3   :  { %v1111_v49 = vadd.f32 %v2672_v40, %v1110_v10 }
 0xee5   :  { %v1115_v12 = vsel %vm1114_vm6, %v2672_v40, %v1111_v49 }
 0xee6   :  { %v2676_v15 = vpop.eup %2675  ;;  %v1120_v17 = vsel %vm1117_vm7, %v1119_v13, %v1115_v12 }
 0xee7   :  { %v1046_v20 = vmul.f32 %v2676_v15, %v1044_v9  ;;  %vm1051_vm8 = vweird.f32 %v2676_v15  ;;  %v1126_v33 = vmul.f32 %v1124_v32, %v1120_v17 }
 0xee8   :  { %vm1052_vm10 = vmor %vm1050_vm9, %vm1051_vm8 }
 0xee9   :  { %v1047_v21 = vsub.f32 1.0, %v1046_v20 }
 0xeeb   :  { %v1048_v22 = vmul.f32 %v2676_v15, %v1047_v21 }
 0xeed   :  { %v1049_v23 = vadd.f32 %v2676_v15, %v1048_v22 }
 0xeef   :  { %v1053_v26 = vsel %vm1052_vm10, %v2676_v15, %v1049_v23 }
 0xef0   :  { %v1058_v29 = vsel %vm1055_vm11, %v1057_v27, %v1053_v26 }
 0xef1   :  { %v1061_v43 = vmul.f32 %v1058_v29, %v3356_v37 }
 0xf18   :  { %v1129_v18 = vpop.permute.xlu0 %1128 }
 0xf19   :  { %v1131_v19 = vmul.f32 %v1129_v18, %v1120_v17 }
 0xf1b   :  { %1133 = vrot.lane.b32.xlu2 %v1131_v19, %s3042_s2 }
 0xf2d   :  { %v1064_v28 = vpop.permute.xlu2 %1063 }
 0xf2e   :  { %v1066_v30 = vmul.f32 %v1064_v28, %v1058_v29 }
 0xf30   :  { %1068 = vrot.lane.b32.xlu1 %v1066_v30, %s3042_s2 }
 0xf75   :  { %v1134_v34 = vpop.permute.xlu2 %1133 }
 0xf76   :  { %v3373_v35 = vadd.f32 %v1134_v34, %v1126_v33 }
 0xf78   :  { %2677 = vtanh.f32 %v3373_v35 }
 0xf7e   :  { %v2678_v41 = vpop.eup %2677 }
 0xf7f   :  { %1139 = vrot.lane.b32.xlu1 %v2678_v41, %s3032_s21 }
 0xfa2   :  { %v1069_v46 = vpop.permute.xlu1 %1068 }
 0xfa3   :  { %v3378_v47 = vadd.f32 %v1069_v46, %v1061_v43 }
 0xfa5   :  { %2679 = vtanh.f32 %v3378_v47 }
 0xfab   :  { %v2680_v51 = vpop.eup %2679 }
 0xfac   :  { %1074 = vrot.lane.b32.xlu0 %v2680_v51, %s3032_s21 }
 0xff1   :  { %v1140_v42 = vpop.permute.xlu1 %1139 }
 0xff2   :  { %v1142_v48 = vmul.f32 %v1140_v42, %v1120_v17 }
 0xff4   :  { %v1209_v52 = vpack.c.bf16 %v1142_v48, %v1142_v48  ;;  %1144 = vrot.lane.b32.xlu2 %v1142_v48, %s3042_s2 }
 0xff6   :  { %v1211_v45 = vrot.slane %v1209_v52, 2 }
 0xff8   :  { %1212 = vrot.lane.b32.xlu1 %v1211_v45, %s3042_s2 }
0x101e   :  { %v1075_v50 = vpop.permute.xlu0 %1074 }
0x101f   :  { %v1077_v55 = vmul.f32 %v1075_v50, %v1058_v29  ;;  %v1255_v29 = vrot.slane %v3373_v35, 6 }
0x1021   :  { %v1148_v56 = vrot.slane %v1077_v55, 4 }
0x1023   :  { %1149 = vrot.lane.b32.xlu0 %v1148_v56, %s3032_s21  ;;  %v2544_v56 = vld [vmem:[#allocation10] sm:$0xff] }
0x104e   :  { %v1145_v31 = vpop.permute.xlu2 %1144 }
0x106a   :  { %v1213_v37 = vpop.permute.xlu1 %1212 }
0x106b   :  { %2447 = vmatmul.msk.bf16.vlgmr.msra.gmra.mxu1 %vm289_vm4, %v1213_v37 }
0x1095   :  { %v1150_v54 = vpop.permute.xlu0 %1149 }
0x1096   :  { %v1152_v57 = vsel %vm289_vm4, %v1145_v31, %v1150_v54 }
0x1097   :  { %v1153_v53 = vpack.c.bf16 %v1152_v57, %v1152_v57 }
0x1099   :  { %v1155_v58 = vrot.slane %v1153_v53, 2 }
0x109b   :  { %2445 = vmatmul.msk.bf16.vlgmr.msrb.gmra.mxu2 %vm377_vm5, %v1155_v58 }
0x10e8   :  { %v1226_v59 = vpop.f32.mrf.mxu1 }
0x10e9   :  { %v1231_v36 = vrot.slane %v1226_v59, 2  ;;  %v2573_v59 = vld [vmem:[%s3704_s8] ss:$0 sm:$0xff] }
0x10eb   :  { %v1233_v60 = vadd.f32 %v1231_v36, %v3320_v0 }
0x10ed   :  { %2681 = vtanh.f32 %v1233_v60  ;;  %v2448_v5 = vmul.f32 -1.442695, %v1233_v60 }
0x10f0   :  { %v1228_v61 = vpop.f32.mrf.mxu1 }
0x10f3   :  { %v2682_v62 = vpop.eup %2681 }
0x10f4   :  { %1259 = vrot.lane.b32.xlu0 %v2682_v62, %s3032_s21 }
0x111e   :  { %v1168_v1 = vpop.f32.mrf.mxu2 }
0x111f   :  { %v1169_v63 = vadd.f32 %v3393_v3, %v1168_v1 }
0x1121   :  { %2683 = vtanh.f32 %v1169_v63  ;;  %v2446_v39 = vmul.f32 -1.442695, %v1169_v63 }
0x1122   :  { %2685 = vpow2.f32 %v2448_v5 }
0x1126   :  { %v1170_v2 = vpop.f32.mrf.mxu2 }
0x1127   :  { %v2684_v4 = vpop.eup %2683 }
0x1128   :  { %1194 = vrot.lane.b32.xlu2 %v2684_v4, %s3032_s21  ;;  %v2686_v0 = vpop.eup %2685 }
0x1129   :  { %v1237_v6 = vadd.f32 1.0, %v2686_v0 }
0x112b   :  { %2687 = vrcp.f32 %v1237_v6  ;;  %v1249_v9 = vand.u32 2147483648, %v1237_v6  ;;  %vm1243_vm13 = vweird.f32 %v1237_v6  ;;  %v1247_v10 = vand.u32 2147483647, %v1237_v6 }
0x112c   :  { %2689 = vpow2.f32 %v2446_v39 }
0x112d   :  { %v1250_v11 = vor.u32 1.1754944e-38, %v1249_v9  ;;  %vm1248_vm15 = vcmp.eq.f32.partialorder %v1247_v10, 8.507059e+37 }
0x1131   :  { %v2688_v7 = vpop.eup %2687 }
0x1132   :  { %v1239_v38 = vmul.f32 %v2688_v7, %v1237_v6  ;;  %v2690_v14 = vpop.eup %2689  ;;  %vm1244_vm12 = vweird.f32 %v2688_v7 }
0x1133   :  { %v1175_v49 = vadd.f32 1.0, %v2690_v14  ;;  %vm1245_vm14 = vmor %vm1243_vm13, %vm1244_vm12 }
0x1134   :  { %v1240_v40 = vsub.f32 1.0, %v1239_v38 }
0x1135   :  { %2691 = vrcp.f32 %v1175_v49  ;;  %v1187_v22 = vand.u32 2147483648, %v1175_v49  ;;  %vm1181_vm1 = vweird.f32 %v1175_v49  ;;  %v1185_v23 = vand.u32 2147483647, %v1175_v49 }
0x1136   :  { %v1241_v44 = vmul.f32 %v2688_v7, %v1240_v40 }
0x1137   :  { %v1188_v25 = vor.u32 1.1754944e-38, %v1187_v22  ;;  %vm1186_vm3 = vcmp.eq.f32.partialorder %v1185_v23, 8.507059e+37 }
0x1138   :  { %v1242_v8 = vadd.f32 %v2688_v7, %v1241_v44 }
0x113a   :  { %v1246_v16 = vsel %vm1245_vm14, %v2688_v7, %v1242_v8 }
0x113b   :  { %v1251_v12 = vsel %vm1248_vm15, %v1250_v11, %v1246_v16  ;;  %v2692_v17 = vpop.eup %2691 }
0x113c   :  { %v1177_v18 = vmul.f32 %v2692_v17, %v1175_v49  ;;  %vm1182_vm0 = vweird.f32 %v2692_v17  ;;  %v1257_v30 = vmul.f32 %v1255_v29, %v1251_v12 }
0x113d   :  { %vm1183_vm2 = vmor %vm1181_vm1, %vm1182_vm0 }
0x113e   :  { %v1178_v19 = vsub.f32 1.0, %v1177_v18 }
0x1140   :  { %v1179_v20 = vmul.f32 %v2692_v17, %v1178_v19 }
0x1142   :  { %v1180_v21 = vadd.f32 %v2692_v17, %v1179_v20 }
0x1144   :  { %v1184_v24 = vsel %vm1183_vm2, %v2692_v17, %v1180_v21 }
0x1145   :  { %v1189_v27 = vsel %vm1186_vm3, %v1188_v25, %v1184_v24 }
0x1146   :  { %v1192_v41 = vmul.f32 %v1189_v27, %v3378_v47  ;;  %v2545_v47 = vld [vmem:[#allocation10 + $0x8] sm:$0xff] }
0x1147   :  { %1397 = vmatpush.bf16.msrb.mxu0 %v2545_v47 }
0x114b   :  { %1398 = vmatpush.bf16.msrb.mxu0 %v2544_v56 }
0x1166   :  { %v1260_v13 = vpop.permute.xlu0 %1259 }
0x1167   :  { %v1262_v15 = vmul.f32 %v1260_v13, %v1251_v12 }
0x1169   :  { %1264 = vrot.lane.b32.xlu2 %v1262_v15, %s3042_s2 }
0x1182   :  { %v1195_v26 = vpop.permute.xlu2 %1194 }
0x1183   :  { %v1197_v28 = vmul.f32 %v1195_v26, %v1189_v27 }
0x1185   :  { %1199 = vrot.lane.b32.xlu1 %v1197_v28, %s3042_s2 }
0x11c3   :  { %v1265_v32 = vpop.permute.xlu2 %1264 }
0x11c4   :  { %v3400_v33 = vadd.f32 %v1265_v32, %v1257_v30 }
0x11c6   :  { %2693 = vtanh.f32 %v3400_v33  ;;  %v1425_v28 = vrot.slane %v3400_v33, 6 }
0x11cc   :  { %v2694_v34 = vpop.eup %2693 }
0x11cd   :  { %1270 = vrot.lane.b32.xlu1 %v2694_v34, %s3032_s21 }
0x11f7   :  { %v1200_v43 = vpop.permute.xlu1 %1199 }
0x11f8   :  { %v3405_v46 = vadd.f32 %v1200_v43, %v1192_v41 }
0x11fa   :  { %2695 = vtanh.f32 %v3405_v46 }
0x1200   :  { %v2696_v51 = vpop.eup %2695 }
0x1201   :  { %1205 = vrot.lane.b32.xlu0 %v2696_v51, %s3032_s21 }
0x123f   :  { %v1271_v35 = vpop.permute.xlu1 %1270 }
0x1240   :  { %v1273_v42 = vmul.f32 %v1271_v35, %v1251_v12 }
0x1242   :  { %v1368_v48 = vpack.c.bf16 %v1273_v42, %v1273_v42  ;;  %1275 = vrot.lane.b32.xlu2 %v1273_v42, %s3042_s2 }
0x1244   :  { %v1373_v52 = vrot.slane %v1368_v48, 3 }
0x1246   :  { %1374 = vrot.lane.b32.xlu1 %v1373_v52, %s3042_s2  ;;  %v3431_v52 = vld [vmem:[#allocation13 + $0x18] sm:$0xff] }
0x1247   :  { %1488 = vmatpush.bf16.msra.mxu2 %v3431_v52  ;;  %1674 = vmatpush.bf16.msra.mxu0 %v3431_v52 }
0x1273   :  { %v1206_v45 = vpop.permute.xlu0 %1205 }
0x1274   :  { %v1208_v50 = vmul.f32 %v1206_v45, %v1189_v27 }
0x1276   :  { %v1279_v55 = vrot.slane %v1208_v50, 2  ;;  %v3434_v50 = vld [vmem:[#allocation13 + $0x10] sm:$0xff] }
0x1277   :  { %1489 = vmatpush.bf16.msra.mxu2 %v3434_v50  ;;  %1675 = vmatpush.bf16.msra.mxu0 %v3434_v50 }
0x1278   :  { %1280 = vrot.lane.b32.xlu0 %v1279_v55, %s3032_s21  ;;  %v3443_v55 = vld [vmem:[#allocation13] sm:$0xff] }
0x129c   :  { %v1276_v31 = vpop.permute.xlu2 %1275 }
0x12b8   :  { %v1375_v37 = vpop.permute.xlu1 %1374 }
0x12b9   :  { %2459 = vmatmul.msk.bf16.vlgmr.msrb.gmra.mxu0 %vm289_vm4, %v1375_v37 }
0x12ea   :  { %v1281_v54 = vpop.permute.xlu0 %1280 }
0x12eb   :  { %v1283_v57 = vsel %vm289_vm4, %v1276_v31, %v1281_v54  ;;  %v3453_v54 = vld [vmem:[%s3707_s11] ss:$0 sm:$0xff] }
0x12ec   :  { %v1284_v53 = vpack.c.bf16 %v1283_v57, %v1283_v57 }
0x12ee   :  { %v1286_v58 = vrot.slane %v1284_v53, 3 }
0x12f0   :  { %2449 = vmatmul.msk.bf16.vlgmr.msra.gmra.mxu3 %vm377_vm5, %v1286_v58 }
0x1336   :  { %v1400_v36 = vpop.f32.mrf.mxu0 }
0x1337   :  { %v1401_v60 = vadd.f32 %v2573_v59, %v1400_v36 }
0x1339   :  { %2697 = vtanh.f32 %v1401_v60  ;;  %v2460_v5 = vmul.f32 -1.442695, %v1401_v60 }
0x133e   :  { %v1402_v61 = vpop.f32.mrf.mxu0 }
0x133f   :  { %v2698_v62 = vpop.eup %2697 }
0x1340   :  { %1429 = vrot.lane.b32.xlu0 %v2698_v62, %s3032_s21 }
0x1373   :  { %v1299_v1 = vpop.f32.mrf.mxu3 }
0x1374   :  { %v1300_v63 = vadd.f32 %v3393_v3, %v1299_v1 }
0x1376   :  { %2699 = vtanh.f32 %v1300_v63  ;;  %v2450_v44 = vmul.f32 -1.442695, %v1300_v63 }
0x1377   :  { %2701 = vpow2.f32 %v2460_v5 }
0x137b   :  { %v1301_v2 = vpop.f32.mrf.mxu3 }
0x137c   :  { %v2700_v4 = vpop.eup %2699 }
0x137d   :  { %1325 = vrot.lane.b32.xlu2 %v2700_v4, %s3032_s21  ;;  %v2702_v0 = vpop.eup %2701 }
0x137e   :  { %v1407_v6 = vadd.f32 1.0, %v2702_v0 }
0x1380   :  { %2703 = vrcp.f32 %v1407_v6  ;;  %v1419_v8 = vand.u32 2147483648, %v1407_v6  ;;  %vm1413_vm7 = vweird.f32 %v1407_v6  ;;  %v1417_v3 = vand.u32 2147483647, %v1407_v6 }
0x1381   :  { %2705 = vpow2.f32 %v2450_v44 }
0x1382   :  { %v1420_v10 = vor.u32 1.1754944e-38, %v1419_v8  ;;  %vm1418_vm9 = vcmp.eq.f32.partialorder %v1417_v3, 8.507059e+37 }
0x1386   :  { %v2704_v7 = vpop.eup %2703 }
0x1387   :  { %v1409_v38 = vmul.f32 %v2704_v7, %v1407_v6  ;;  %vm1414_vm6 = vweird.f32 %v2704_v7  ;;  %v2706_v12 = vpop.eup %2705 }
0x1388   :  { %vm1415_vm8 = vmor %vm1413_vm7, %vm1414_vm6  ;;  %v1306_v13 = vadd.f32 1.0, %v2706_v12 }
0x1389   :  { %v1410_v39 = vsub.f32 1.0, %v1409_v38 }
0x138a   :  { %2707 = vrcp.f32 %v1306_v13  ;;  %v1318_v21 = vand.u32 2147483648, %v1306_v13  ;;  %vm1312_vm11 = vweird.f32 %v1306_v13  ;;  %v1316_v22 = vand.u32 2147483647, %v1306_v13 }
0x138b   :  { %v1411_v40 = vmul.f32 %v2704_v7, %v1410_v39 }
0x138c   :  { %v1319_v24 = vor.u32 1.1754944e-38, %v1318_v21  ;;  %vm1317_vm13 = vcmp.eq.f32.partialorder %v1316_v22, 8.507059e+37 }
0x138d   :  { %v1412_v14 = vadd.f32 %v2704_v7, %v1411_v40 }
0x138f   :  { %v1416_v9 = vsel %vm1415_vm8, %v2704_v7, %v1412_v14 }
0x1390   :  { %v1421_v49 = vsel %vm1418_vm9, %v1420_v10, %v1416_v9  ;;  %v2708_v15 = vpop.eup %2707  ;;  %v3463_v9 = vld [vmem:[#allocation11 + $0x18] sm:$0xff]  ;;  %v3466_v10 = vld [vmem:[#allocation11 + $0x10] sm:$0xff] }
0x1391   :  { %v1308_v17 = vmul.f32 %v2708_v15, %v1306_v13  ;;  %vm1313_vm10 = vweird.f32 %v2708_v15  ;;  %v1427_v29 = vmul.f32 %v1425_v28, %v1421_v49  ;;  %1612 = vmatpush.bf16.msrb.mxu3 %v3463_v9 }
0x1392   :  { %vm1314_vm12 = vmor %vm1312_vm11, %vm1313_vm10 }
0x1393   :  { %v1309_v18 = vsub.f32 1.0, %v1308_v17 }
0x1395   :  { %v1310_v19 = vmul.f32 %v2708_v15, %v1309_v18  ;;  %1613 = vmatpush.bf16.msrb.mxu3 %v3466_v10 }
0x1397   :  { %v1311_v20 = vadd.f32 %v2708_v15, %v1310_v19  ;;  %v3485_v19 = vld [vmem:[%s3705_s9] ss:$0 sm:$0xff] }
0x1399   :  { %v1315_v23 = vsel %vm1314_vm12, %v2708_v15, %v1311_v20 }
0x139a   :  { %v1320_v26 = vsel %vm1317_vm13, %v1319_v24, %v1315_v23 }
0x139b   :  { %v1323_v41 = vmul.f32 %v1320_v26, %v3405_v46  ;;  %v3439_v46 = vld [vmem:[#allocation13 + $0x8] sm:$0xff] }
0x139c   :  { %1490 = vmatpush.bf16.msra.mxu2 %v3439_v46  ;;  %1676 = vmatpush.bf16.msra.mxu0 %v3439_v46 }
0x13a0   :  { %1491 = vmatpush.bf16.msra.mxu2 %v3443_v55  ;;  %1677 = vmatpush.bf16.msra.mxu0 %v3443_v55 }
0x13b2   :  { %v1430_v16 = vpop.permute.xlu0 %1429 }
0x13b3   :  { %v1432_v11 = vmul.f32 %v1430_v16, %v1421_v49  ;;  %v3472_v16 = vld [vmem:[#allocation11] sm:$0xff] }
0x13b5   :  { %1434 = vrot.lane.b32.xlu2 %v1432_v11, %s3042_s2 }
0x13d7   :  { %v1326_v25 = vpop.permute.xlu2 %1325 }
0x13d8   :  { %v1328_v27 = vmul.f32 %v1326_v25, %v1320_v26 }
0x13da   :  { %1330 = vrot.lane.b32.xlu1 %v1328_v27, %s3042_s2 }
0x140f   :  { %v1435_v30 = vpop.permute.xlu2 %1434 }
0x1410   :  { %v3424_v32 = vadd.f32 %v1435_v30, %v1427_v29 }
0x1412   :  { %2709 = vtanh.f32 %v3424_v32 }
0x1418   :  { %v2710_v34 = vpop.eup %2709 }
0x1419   :  { %1440 = vrot.lane.b32.xlu1 %v2710_v34, %s3032_s21 }
0x144c   :  { %v1331_v43 = vpop.permute.xlu1 %1330 }
0x144d   :  { %v1333_v51 = vadd.f32 %v1331_v43, %v1323_v41 }
0x144f   :  { %2711 = vtanh.f32 %v1333_v51 }
0x1455   :  { %v2712_v35 = vpop.eup %2711 }
0x1456   :  { %1336 = vrot.lane.b32.xlu0 %v2712_v35, %s3032_s21 }
0x148b   :  { %v1441_v42 = vpop.permute.xlu1 %1440 }
0x148c   :  { %v1443_v48 = vmul.f32 %v1441_v42, %v1421_v49  ;;  %v3469_v49 = vld [vmem:[#allocation11 + $0x8] sm:$0xff] }
0x148d   :  { %1614 = vmatpush.bf16.msrb.mxu3 %v3469_v49 }
0x148e   :  { %1445 = vrot.lane.b32.xlu2 %v1443_v48, %s3042_s2 }
0x1491   :  { %1615 = vmatpush.bf16.msrb.mxu3 %v3472_v16 }
0x1495   :  { %1818 = vmatpush.bf16.msra.mxu3 %v3431_v52 }
0x1499   :  { %1819 = vmatpush.bf16.msra.mxu3 %v3434_v50 }
0x149d   :  { %1820 = vmatpush.bf16.msra.mxu3 %v3439_v46 }
0x14a1   :  { %1821 = vmatpush.bf16.msra.mxu3 %v3443_v55 }
0x14c8   :  { %v1337_v33 = vpop.permute.xlu0 %1336 }
0x14c9   :  { %v1339_v45 = vmul.f32 %v1337_v33, %v1320_v26 }
0x14cb   :  { %1449 = vrot.lane.b32.xlu0 %v1339_v45, %s3032_s21 }
0x14e8   :  { %v1446_v47 = vpop.permute.xlu2 %1445 }
0x153d   :  { %v1450_v56 = vpop.permute.xlu0 %1449 }
0x153e   :  { %v1452_v37 = vsel %vm289_vm4, %v1446_v47, %v1450_v56 }
0x153f   :  { %v1453_v31 = vpack.c.bf16 %v1452_v37, %v1452_v37 }
0x1541   :  { %2477 = vmatmul.msk.bf16.vlgmr.msra.gmra.mxu2 %vm377_vm5, %v1453_v31 }
0x15c4   :  { %v1493_v57 = vpop.f32.mrf.mxu2 }
0x15c5   :  { %v1494_v53 = vadd.f32 %v3453_v54, %v1493_v57 }
0x15c7   :  { %2713 = vtanh.f32 %v1494_v53  ;;  %v2478_v36 = vmul.f32 -1.442695, %v1494_v53 }
0x15c9   :  { %2715 = vpow2.f32 %v2478_v36 }
0x15cc   :  { %v1495_v58 = vpop.f32.mrf.mxu2 }
0x15cd   :  { %v2714_v59 = vpop.eup %2713 }
0x15ce   :  { %1519 = vrot.lane.b32.xlu1 %v2714_v59, %s3032_s21 }
0x15cf   :  { %v2716_v60 = vpop.eup %2715 }
0x15d0   :  { %v1500_v61 = vadd.f32 1.0, %v2716_v60 }
0x15d2   :  { %2717 = vrcp.f32 %v1500_v61  ;;  %v1512_v5 = vand.u32 2147483648, %v1500_v61  ;;  %vm1506_vm15 = vweird.f32 %v1500_v61  ;;  %v1510_v0 = vand.u32 2147483647, %v1500_v61 }
0x15d4   :  { %v1513_v7 = vor.u32 1.1754944e-38, %v1512_v5  ;;  %vm1511_vm1 = vcmp.eq.f32.partialorder %v1510_v0, 8.507059e+37  ;;  %v3505_v5 = vld [vmem:[#allocation14 + $0x8] sm:$0xff]  ;;  %v3508_v0 = vld [vmem:[#allocation14] sm:$0xff] }
0x15d5   :  { %1562 = vmatpush.bf16.msrb.mxu1 %v3505_v5  ;;  %1733 = vmatpush.bf16.msrb.mxu2 %v3505_v5 }
0x15d6   :  { %1877 = vmatpush.bf16.msrb.mxu0 %v3505_v5 }
0x15d8   :  { %v2718_v62 = vpop.eup %2717 }
0x15d9   :  { %v1502_v1 = vmul.f32 %v2718_v62, %v1500_v61  ;;  %vm1507_vm14 = vweird.f32 %v2718_v62  ;;  %1563 = vmatpush.bf16.msrb.mxu1 %v3508_v0  ;;  %1734 = vmatpush.bf16.msrb.mxu2 %v3508_v0 }
0x15da   :  { %vm1508_vm0 = vmor %vm1506_vm15, %vm1507_vm14  ;;  %1878 = vmatpush.bf16.msrb.mxu0 %v3508_v0 }
0x15db   :  { %v1503_v63 = vsub.f32 1.0, %v1502_v1 }
0x15dd   :  { %v1504_v2 = vmul.f32 %v2718_v62, %v1503_v63  ;;  %1756 = vmatpush.bf16.msra.mxu1 %v3463_v9  ;;  %1900 = vmatpush.bf16.msra.mxu2 %v3463_v9 }
0x15df   :  { %v1505_v4 = vadd.f32 %v2718_v62, %v1504_v2 }
0x15e1   :  { %v1509_v6 = vsel %vm1508_vm0, %v2718_v62, %v1505_v4  ;;  %1757 = vmatpush.bf16.msra.mxu1 %v3466_v10  ;;  %1901 = vmatpush.bf16.msra.mxu2 %v3466_v10 }
0x15e2   :  { %v1514_v39 = vsel %vm1511_vm1, %v1513_v7, %v1509_v6 }
0x15e3   :  { %v1517_v44 = vmul.f32 %v1514_v39, %v1333_v51 }
0x15e5   :  { %1758 = vmatpush.bf16.msra.mxu1 %v3469_v49  ;;  %1902 = vmatpush.bf16.msra.mxu2 %v3469_v49 }
0x15e9   :  { %1759 = vmatpush.bf16.msra.mxu1 %v3472_v16  ;;  %1903 = vmatpush.bf16.msra.mxu2 %v3472_v16 }
0x1640   :  { %v1520_v38 = vpop.permute.xlu1 %1519 }
0x1641   :  { %v1522_v40 = vmul.f32 %v1520_v38, %v1514_v39 }
0x1643   :  { %1524 = vrot.lane.b32.xlu2 %v1522_v40, %s3042_s2 }
0x164b   :  { %1573 = vrot.lane.b32.xlu2 %v1443_v48, %s3032_s21 }
0x169d   :  { %v1525_v14 = vpop.permute.xlu2 %1524 }
0x169e   :  { %v3459_v8 = vadd.f32 %v1525_v14, %v1517_v44 }
0x16a0   :  { %2719 = vtanh.f32 %v3459_v8 }
0x16a5   :  { %v1574_v13 = vpop.permute.xlu2 %1573 }
0x16a6   :  { %v2720_v3 = vpop.eup %2719 }
0x16a7   :  { %1530 = vrot.lane.b32.xlu0 %v2720_v3, %s3032_s21 }
0x1719   :  { %v1531_v11 = vpop.permute.xlu0 %1530 }
0x171a   :  { %v1533_v12 = vmul.f32 %v1531_v11, %v1514_v39 }
0x171c   :  { %1570 = vrot.lane.b32.xlu1 %v1533_v12, %s3042_s2  ;;  %v1534_v1 = vpack.c.bf16 %v1533_v12, %v1533_v12 }
0x178e   :  { %v1571_v15 = vpop.permute.xlu1 %1570 }
0x178f   :  { %v1576_v17 = vsel %vm289_vm4, %v1571_v15, %v1574_v13 }
0x1790   :  { %v1577_v18 = vpack.c.bf16 %v1576_v17, %v1576_v17 }
0x1792   :  { %2504 = vmatmul.msk.bf16.vlgmr.msrb.gmra.mxu3 %vm377_vm5, %v1577_v18 }
0x1793   :  { %2021 = vmatpush.bf16.msrb.mxu3 %v3505_v5 }
0x1797   :  { %2022 = vmatpush.bf16.msrb.mxu3 %v3508_v0 }
0x1815   :  { %v1617_v20 = vpop.f32.mrf.mxu3 }
0x1816   :  { %v1618_v21 = vadd.f32 %v3485_v19, %v1617_v20 }
0x1818   :  { %2721 = vtanh.f32 %v1618_v21  ;;  %v2505_v24 = vmul.f32 -1.442695, %v1618_v21 }
0x181a   :  { %2723 = vpow2.f32 %v2505_v24 }
0x181d   :  { %v1619_v22 = vpop.f32.mrf.mxu3 }
0x181e   :  { %v2722_v23 = vpop.eup %2721 }
0x181f   :  { %1643 = vrot.lane.b32.xlu0 %v2722_v23, %s3032_s21 }
0x1820   :  { %v2724_v25 = vpop.eup %2723 }
0x1821   :  { %v1624_v26 = vadd.f32 1.0, %v2724_v25 }
0x1823   :  { %2725 = vrcp.f32 %v1624_v26  ;;  %v1636_v41 = vand.u32 2147483648, %v1624_v26  ;;  %vm1630_vm3 = vweird.f32 %v1624_v26  ;;  %v1634_v43 = vand.u32 2147483647, %v1624_v26 }
0x1825   :  { %v1637_v35 = vor.u32 1.1754944e-38, %v1636_v41  ;;  %vm1635_vm7 = vcmp.eq.f32.partialorder %v1634_v43, 8.507059e+37 }
0x1829   :  { %v2726_v27 = vpop.eup %2725 }
0x182a   :  { %v1626_v28 = vmul.f32 %v2726_v27, %v1624_v26  ;;  %vm1631_vm2 = vweird.f32 %v2726_v27 }
0x182b   :  { %vm1632_vm6 = vmor %vm1630_vm3, %vm1631_vm2 }
0x182c   :  { %v1627_v29 = vsub.f32 1.0, %v1626_v28 }
0x182e   :  { %v1628_v30 = vmul.f32 %v2726_v27, %v1627_v29 }
0x1830   :  { %v1629_v34 = vadd.f32 %v2726_v27, %v1628_v30 }
0x1832   :  { %v1633_v51 = vsel %vm1632_vm6, %v2726_v27, %v1629_v34  ;;  %vm2328_vm6 = vcmask 1041408  }
0x1833   :  { %v1638_v48 = vsel %vm1635_vm7, %v1637_v35, %v1633_v51 }
0x1834   :  { %v1641_v45 = vmul.f32 %v1638_v48, %v3424_v32 }
0x1891   :  { %v1644_v42 = vpop.permute.xlu0 %1643 }
0x1892   :  { %v1646_v33 = vmul.f32 %v1644_v42, %v1638_v48 }
0x1894   :  { %1648 = vrot.lane.b32.xlu1 %v1646_v33, %s3042_s2 }
0x189c   :  { %1662 = vrot.lane.b32.xlu1 %v1533_v12, %s3032_s21 }
0x1906   :  { %v1649_v47 = vpop.permute.xlu1 %1648 }
0x1907   :  { %v3492_v56 = vadd.f32 %v1649_v47, %v1641_v45 }
0x1909   :  { %2727 = vtanh.f32 %v3492_v56 }
0x190e   :  { %v1663_v53 = vpop.permute.xlu1 %1662 }
0x190f   :  { %v2728_v37 = vpop.eup %2727 }
0x1910   :  { %1654 = vrot.lane.b32.xlu2 %v2728_v37, %s3032_s21 }
0x196a   :  { %v1655_v31 = vpop.permute.xlu2 %1654 }
0x196b   :  { %v3496_v57 = vmul.f32 %v1655_v31, %v1638_v48 }
0x196d   :  { %1659 = vrot.lane.b32.xlu0 %v3496_v57, %s3042_s2 }
0x19df   :  { %v1660_v58 = vpop.permute.xlu0 %1659 }
0x19e0   :  { %v1665_v59 = vsel %vm289_vm4, %v1660_v58, %v1663_v53 }
0x19e1   :  { %v1666_v36 = vpack.c.bf16 %v1665_v59, %v1665_v59 }
0x19e3   :  { %2506 = vmatmul.msk.bf16.vlgmr.msra.gmra.mxu0 %vm377_vm5, %v1666_v36 }
0x19e4   :  { %2044 = vmatpush.bf16.msra.mxu0 %v3463_v9 }
0x19e8   :  { %2045 = vmatpush.bf16.msra.mxu0 %v3466_v10 }
0x19ec   :  { %2046 = vmatpush.bf16.msra.mxu0 %v3469_v49 }
0x19f0   :  { %2047 = vmatpush.bf16.msra.mxu0 %v3472_v16 }
0x1a60   :  { %v1679_v32 = vpop.f32.mrf.mxu0 }
0x1a61   :  { %v1680_v60 = vadd.f32 %v3453_v54, %v1679_v32 }
0x1a63   :  { %2729 = vtanh.f32 %v1680_v60  ;;  %v2507_v63 = vmul.f32 -1.442695, %v1680_v60 }
0x1a65   :  { %2731 = vpow2.f32 %v2507_v63 }
0x1a68   :  { %v1681_v61 = vpop.f32.mrf.mxu0 }
0x1a69   :  { %v2730_v62 = vpop.eup %2729 }
0x1a6a   :  { %1705 = vrot.lane.b32.xlu2 %v2730_v62, %s3032_s21 }
0x1a6b   :  { %v2732_v2 = vpop.eup %2731 }
0x1a6c   :  { %v1686_v4 = vadd.f32 1.0, %v2732_v2 }
0x1a6e   :  { %2733 = vrcp.f32 %v1686_v4  ;;  %v1698_v44 = vand.u32 2147483648, %v1686_v4  ;;  %vm1692_vm9 = vweird.f32 %v1686_v4  ;;  %v1696_v14 = vand.u32 2147483647, %v1686_v4 }
0x1a70   :  { %v1699_v11 = vor.u32 1.1754944e-38, %v1698_v44  ;;  %vm1697_vm11 = vcmp.eq.f32.partialorder %v1696_v14, 8.507059e+37 }
0x1a72   :  { %1539 = vrot.lane.b32.xlu2 %v1534_v1, %s3042_s2 }
0x1a74   :  { %v2734_v6 = vpop.eup %2733 }
0x1a75   :  { %v1688_v7 = vmul.f32 %v2734_v6, %v1686_v4  ;;  %vm1693_vm8 = vweird.f32 %v2734_v6 }
0x1a76   :  { %vm1694_vm10 = vmor %vm1692_vm9, %vm1693_vm8 }
0x1a77   :  { %v1689_v38 = vsub.f32 1.0, %v1688_v7 }
0x1a79   :  { %v1690_v39 = vmul.f32 %v2734_v6, %v1689_v38 }
0x1a7b   :  { %v1691_v40 = vadd.f32 %v2734_v6, %v1690_v39 }
0x1a7d   :  { %v1695_v3 = vsel %vm1694_vm10, %v2734_v6, %v1691_v40 }
0x1a7e   :  { %v1700_v13 = vsel %vm1697_vm11, %v1699_v11, %v1695_v3 }
0x1a7f   :  { %v1703_v18 = vmul.f32 %v1700_v13, %v3459_v8 }
0x1ac4   :  { %v1706_v12 = vpop.permute.xlu2 %1705 }
0x1ac5   :  { %v1708_v15 = vmul.f32 %v1706_v12, %v1700_v13 }
0x1ac7   :  { %1710 = vrot.lane.b32.xlu0 %v1708_v15, %s3042_s2 }
0x1acc   :  { %v1540_v17 = vpop.permute.xlu2 %1539 }
0x1acd   :  { %2487 = vmatmul.msk.bf16.vlgmr.msrb.gmra.mxu1 %vm289_vm4, %v1540_v17 }
0x1ace   :  { %1962 = vmatpush.bf16.msrb.mxu1 %v3431_v52 }
0x1ad2   :  { %1963 = vmatpush.bf16.msrb.mxu1 %v3434_v50 }
0x1ad6   :  { %1964 = vmatpush.bf16.msrb.mxu1 %v3439_v46 }
0x1ada   :  { %1965 = vmatpush.bf16.msrb.mxu1 %v3443_v55 }
0x1b39   :  { %v1711_v20 = vpop.permute.xlu0 %1710 }
0x1b3a   :  { %v3536_v21 = vadd.f32 %v1711_v20, %v1703_v18 }
0x1b3c   :  { %2735 = vtanh.f32 %v3536_v21 }
0x1b42   :  { %v2736_v22 = vpop.eup %2735 }
0x1b43   :  { %1716 = vrot.lane.b32.xlu1 %v2736_v22, %s3032_s21 }
0x1b4a   :  { %v3540_v23 = vpop.f32.mrf.mxu1 }
0x1b4b   :  { %1744 = vrot.lane.b32.xlu1 %v3496_v57, %s3032_s21 }
0x1b52   :  { %v1567_v24 = vpop.f32.mrf.mxu1 }
0x1bb5   :  { %v1717_v25 = vpop.permute.xlu1 %1716 }
0x1bb6   :  { %v3544_v26 = vmul.f32 %v1717_v25, %v1700_v13 }
0x1bb8   :  { %1741 = vrot.lane.b32.xlu0 %v3544_v26, %s3042_s2  ;;  %v1720_v14 = vpack.c.bf16 %v3544_v26, %v3544_v26 }
0x1bbd   :  { %v1745_v8 = vpop.permute.xlu1 %1744 }
0x1c2a   :  { %v1742_v27 = vpop.permute.xlu0 %1741 }
0x1c2b   :  { %v1747_v28 = vsel %vm289_vm4, %v1742_v27, %v1745_v8 }
0x1c2c   :  { %v1748_v29 = vpack.c.bf16 %v1747_v28, %v1747_v28 }
0x1c2e   :  { %2509 = vmatmul.msk.bf16.vlgmr.msra.gmra.mxu1 %vm377_vm5, %v1748_v29 }
0x1c2f   :  { %2165 = vmatpush.bf16.msra.mxu1 %v3505_v5 }
0x1c33   :  { %2166 = vmatpush.bf16.msra.mxu1 %v3508_v0 }
0x1cab   :  { %v1761_v30 = vpop.f32.mrf.mxu1 }
0x1cac   :  { %v1762_v34 = vadd.f32 %v3485_v19, %v1761_v30  ;;  %v3589_v30 = vld [vmem:[%s3709_s13] ss:$0 sm:$0xff] }
0x1cae   :  { %2737 = vtanh.f32 %v1762_v34  ;;  %v2510_v51 = vmul.f32 -1.442695, %v1762_v34 }
0x1cb0   :  { %2739 = vpow2.f32 %v2510_v51 }
0x1cb3   :  { %v1763_v41 = vpop.f32.mrf.mxu1 }
0x1cb4   :  { %v2738_v43 = vpop.eup %2737 }
0x1cb5   :  { %1787 = vrot.lane.b32.xlu2 %v2738_v43, %s3032_s21 }
0x1cb6   :  { %v2740_v35 = vpop.eup %2739 }
0x1cb7   :  { %v1768_v42 = vadd.f32 1.0, %v2740_v35 }
0x1cb9   :  { %2741 = vrcp.f32 %v1768_v42  ;;  %v1780_v31 = vand.u32 2147483648, %v1768_v42  ;;  %vm1774_vm13 = vweird.f32 %v1768_v42  ;;  %v1778_v57 = vand.u32 2147483647, %v1768_v42 }
0x1cbb   :  { %v1781_v58 = vor.u32 1.1754944e-38, %v1780_v31  ;;  %vm1779_vm15 = vcmp.eq.f32.partialorder %v1778_v57, 8.507059e+37 }
0x1cbf   :  { %v2742_v48 = vpop.eup %2741 }
0x1cc0   :  { %v1770_v33 = vmul.f32 %v2742_v48, %v1768_v42  ;;  %vm1775_vm12 = vweird.f32 %v2742_v48 }
0x1cc1   :  { %vm1776_vm14 = vmor %vm1774_vm13, %vm1775_vm12 }
0x1cc2   :  { %v1771_v45 = vsub.f32 1.0, %v1770_v33 }
0x1cc4   :  { %v1772_v47 = vmul.f32 %v2742_v48, %v1771_v45 }
0x1cc6   :  { %v1773_v37 = vadd.f32 %v2742_v48, %v1772_v47 }
0x1cc8   :  { %v1777_v53 = vsel %vm1776_vm14, %v2742_v48, %v1773_v37 }
0x1cc9   :  { %v1782_v36 = vsel %vm1779_vm15, %v1781_v58, %v1777_v53  ;;  %vm2330_vm15 = vcmask 1043456  }
0x1cca   :  { %v1785_v60 = vmul.f32 %v1782_v36, %v3492_v56 }
0x1d0f   :  { %v1788_v59 = vpop.permute.xlu2 %1787 }
0x1d10   :  { %v1790_v32 = vmul.f32 %v1788_v59, %v1782_v36 }
0x1d12   :  { %1792 = vrot.lane.b32.xlu0 %v1790_v32, %s3042_s2 }
0x1d1a   :  { %1806 = vrot.lane.b32.xlu0 %v3544_v26, %s3032_s21 }
0x1d84   :  { %v1793_v61 = vpop.permute.xlu0 %1792 }
0x1d85   :  { %v3558_v62 = vadd.f32 %v1793_v61, %v1785_v60 }
0x1d87   :  { %2743 = vtanh.f32 %v3558_v62 }
0x1d8c   :  { %v1807_v4 = vpop.permute.xlu0 %1806 }
0x1d8d   :  { %v2744_v1 = vpop.eup %2743 }
0x1d8e   :  { %1798 = vrot.lane.b32.xlu1 %v2744_v1, %s3032_s21 }
0x1e00   :  { %v1799_v63 = vpop.permute.xlu1 %1798 }
0x1e01   :  { %v1801_v2 = vmul.f32 %v1799_v63, %v1782_v36 }
0x1e03   :  { %1803 = vrot.lane.b32.xlu2 %v1801_v2, %s3042_s2 }
0x1e5d   :  { %v1804_v6 = vpop.permute.xlu2 %1803 }
0x1e5e   :  { %v1809_v7 = vsel %vm289_vm4, %v1804_v6, %v1807_v4 }
0x1e5f   :  { %v1810_v38 = vpack.c.bf16 %v1809_v7, %v1809_v7 }
0x1e61   :  { %2511 = vmatmul.msk.bf16.vlgmr.msra.gmra.mxu3 %vm377_vm5, %v1810_v38 }
0x1e62   :  { %2188 = vmatpush.bf16.msra.mxu3 %v3463_v9 }
0x1e66   :  { %2189 = vmatpush.bf16.msra.mxu3 %v3466_v10 }
0x1e6a   :  { %2190 = vmatpush.bf16.msra.mxu3 %v3469_v49 }
0x1e6e   :  { %2191 = vmatpush.bf16.msra.mxu3 %v3472_v16 }
0x1ee4   :  { %v1823_v56 = vpop.f32.mrf.mxu3 }
0x1ee5   :  { %v1824_v39 = vadd.f32 %v3453_v54, %v1823_v56 }
0x1ee7   :  { %2745 = vtanh.f32 %v1824_v39  ;;  %v2512_v9 = vmul.f32 -1.442695, %v1824_v39 }
0x1ee9   :  { %2747 = vpow2.f32 %v2512_v9 }
0x1eec   :  { %v1825_v40 = vpop.f32.mrf.mxu3 }
0x1eed   :  { %v2746_v44 = vpop.eup %2745 }
0x1eee   :  { %1849 = vrot.lane.b32.xlu1 %v2746_v44, %s3032_s21 }
0x1eef   :  { %v2748_v10 = vpop.eup %2747 }
0x1ef0   :  { %v1830_v3 = vadd.f32 1.0, %v2748_v10 }
0x1ef2   :  { %2749 = vrcp.f32 %v1830_v3  ;;  %v1842_v15 = vand.u32 2147483648, %v1830_v3  ;;  %vm1836_vm1 = vweird.f32 %v1830_v3  ;;  %v1840_v17 = vand.u32 2147483647, %v1830_v3 }
0x1ef4   :  { %v1843_v20 = vor.u32 1.1754944e-38, %v1842_v15  ;;  %vm1841_vm3 = vcmp.eq.f32.partialorder %v1840_v17, 8.507059e+37 }
0x1ef6   :  { %1722 = vrot.lane.b32.xlu1 %v1720_v14, %s3042_s2 }
0x1ef8   :  { %v2750_v49 = vpop.eup %2749 }
0x1ef9   :  { %v1832_v16 = vmul.f32 %v2750_v49, %v1830_v3  ;;  %vm1837_vm0 = vweird.f32 %v2750_v49 }
0x1efa   :  { %vm1838_vm2 = vmor %vm1836_vm1, %vm1837_vm0 }
0x1efb   :  { %v1833_v11 = vsub.f32 1.0, %v1832_v16 }
0x1efd   :  { %v1834_v12 = vmul.f32 %v2750_v49, %v1833_v11 }
0x1eff   :  { %v1835_v13 = vadd.f32 %v2750_v49, %v1834_v12 }
0x1f01   :  { %v1839_v18 = vsel %vm1838_vm2, %v2750_v49, %v1835_v13 }
0x1f02   :  { %v1844_v24 = vsel %vm1841_vm3, %v1843_v20, %v1839_v18 }
0x1f03   :  { %v1847_v8 = vmul.f32 %v1844_v24, %v3536_v21  ;;  %v1566_v21 = vadd.f32 %v3589_v30, %v3540_v23 }
0x1f60   :  { %v1850_v22 = vpop.permute.xlu1 %1849 }
0x1f61   :  { %v1852_v25 = vmul.f32 %v1850_v22, %v1844_v24 }
0x1f63   :  { %1854 = vrot.lane.b32.xlu2 %v1852_v25, %s3042_s2 }
0x1f68   :  { %v1723_v26 = vpop.permute.xlu1 %1722 }
0x1f69   :  { %2508 = vmatmul.msk.bf16.vlgmr.msrb.gmra.mxu2 %vm289_vm4, %v1723_v26 }
0x1f6a   :  { %2106 = vmatpush.bf16.msrb.mxu2 %v3431_v52 }
0x1f6e   :  { %2107 = vmatpush.bf16.msrb.mxu2 %v3434_v50 }
0x1f72   :  { %2108 = vmatpush.bf16.msrb.mxu2 %v3439_v46 }
0x1f76   :  { %2109 = vmatpush.bf16.msrb.mxu2 %v3443_v55 }
0x1fbd   :  { %v1855_v27 = vpop.permute.xlu2 %1854 }
0x1fbe   :  { %v3581_v28 = vadd.f32 %v1855_v27, %v1847_v8 }
0x1fc0   :  { %2751 = vtanh.f32 %v3581_v28 }
0x1fc6   :  { %v2752_v29 = vpop.eup %2751 }
0x1fc7   :  { %1860 = vrot.lane.b32.xlu0 %v2752_v29, %s3032_s21 }
0x1fcf   :  { %1888 = vrot.lane.b32.xlu0 %v1801_v2, %s3032_s21 }
0x1fec   :  { %v1736_v34 = vpop.f32.mrf.mxu2 }
0x1fed   :  { %v1737_v41 = vadd.f32 %v3589_v30, %v1736_v34 }
0x1fef   :  { %v2317_v43 = vrot.slane %v1737_v41, 6 }
0x1ff1   :  { %v3595_v51 = vsel %vm2328_vm6, %v1566_v21, %v2317_v43 }
0x1ff4   :  { %v1738_v35 = vpop.f32.mrf.mxu2 }
0x2039   :  { %v1861_v42 = vpop.permute.xlu0 %1860 }
0x203a   :  { %v1863_v48 = vmul.f32 %v1861_v42, %v1844_v24 }
0x203c   :  { %1885 = vrot.lane.b32.xlu2 %v1863_v48, %s3042_s2  ;;  %v1864_v15 = vpack.c.bf16 %v1863_v48, %v1863_v48 }
0x2041   :  { %v1889_v33 = vpop.permute.xlu0 %1888 }
0x2096   :  { %v1886_v45 = vpop.permute.xlu2 %1885 }
0x2097   :  { %v1891_v47 = vsel %vm289_vm4, %v1886_v45, %v1889_v33 }
0x2098   :  { %v1892_v37 = vpack.c.bf16 %v1891_v47, %v1891_v47 }
0x209a   :  { %2514 = vmatmul.msk.bf16.vlgmr.msra.gmra.mxu2 %vm377_vm5, %v1892_v37 }
0x209b   :  { %2309 = vmatpush.bf16.msra.mxu2 %v3505_v5 }
0x209f   :  { %2310 = vmatpush.bf16.msra.mxu2 %v3508_v0 }
0x211d   :  { %v1905_v23 = vpop.f32.mrf.mxu2 }
0x211e   :  { %v1906_v31 = vadd.f32 %v3485_v19, %v1905_v23 }
0x2120   :  { %2753 = vtanh.f32 %v1906_v31  ;;  %v2515_v58 = vmul.f32 -1.442695, %v1906_v31 }
0x2122   :  { %2755 = vpow2.f32 %v2515_v58 }
0x2125   :  { %v1907_v57 = vpop.f32.mrf.mxu2 }
0x2126   :  { %v2754_v53 = vpop.eup %2753 }
0x2127   :  { %1931 = vrot.lane.b32.xlu1 %v2754_v53, %s3032_s21 }
0x2128   :  { %v2756_v59 = vpop.eup %2755 }
0x2129   :  { %v1912_v36 = vadd.f32 1.0, %v2756_v59 }
0x212b   :  { %2757 = vrcp.f32 %v1912_v36  ;;  %v1924_v0 = vand.u32 2147483648, %v1912_v36  ;;  %vm1918_vm8 = vweird.f32 %v1912_v36  ;;  %v1922_v63 = vand.u32 2147483647, %v1912_v36 }
0x212d   :  { %v1925_v4 = vor.u32 1.1754944e-38, %v1924_v0  ;;  %vm1923_vm10 = vcmp.eq.f32.partialorder %v1922_v63, 8.507059e+37 }
0x2131   :  { %v2758_v32 = vpop.eup %2757 }
0x2132   :  { %v1914_v60 = vmul.f32 %v2758_v32, %v1912_v36  ;;  %vm1919_vm7 = vweird.f32 %v2758_v32 }
0x2133   :  { %vm1920_vm9 = vmor %vm1918_vm8, %vm1919_vm7 }
0x2134   :  { %v1915_v61 = vsub.f32 1.0, %v1914_v60 }
0x2136   :  { %v1916_v1 = vmul.f32 %v2758_v32, %v1915_v61 }
0x2138   :  { %v1917_v5 = vadd.f32 %v2758_v32, %v1916_v1 }
0x213a   :  { %v1921_v2 = vsel %vm1920_vm9, %v2758_v32, %v1917_v5 }
0x213b   :  { %v1926_v7 = vsel %vm1923_vm10, %v1925_v4, %v1921_v2 }
0x213c   :  { %v1929_v56 = vmul.f32 %v1926_v7, %v3558_v62 }
0x2199   :  { %v1932_v6 = vpop.permute.xlu1 %1931 }
0x219a   :  { %v1934_v38 = vmul.f32 %v1932_v6, %v1926_v7 }
0x219c   :  { %1936 = vrot.lane.b32.xlu2 %v1934_v38, %s3042_s2 }
0x21a4   :  { %1950 = vrot.lane.b32.xlu2 %v1863_v48, %s3032_s21 }
0x21f6   :  { %v1937_v39 = vpop.permute.xlu2 %1936 }
0x21f7   :  { %v3607_v40 = vadd.f32 %v1937_v39, %v1929_v56 }
0x21f9   :  { %2759 = vtanh.f32 %v3607_v40 }
0x21fe   :  { %v1951_v10 = vpop.permute.xlu2 %1950 }
0x21ff   :  { %v2760_v44 = vpop.eup %2759 }
0x2200   :  { %1942 = vrot.lane.b32.xlu0 %v2760_v44, %s3032_s21 }
0x2272   :  { %v1943_v14 = vpop.permute.xlu0 %1942 }
0x2273   :  { %v1945_v9 = vmul.f32 %v1943_v14, %v1926_v7 }
0x2275   :  { %1947 = vrot.lane.b32.xlu1 %v1945_v9, %s3042_s2 }
0x22e7   :  { %v1948_v3 = vpop.permute.xlu1 %1947 }
0x22e8   :  { %v1953_v49 = vsel %vm289_vm4, %v1948_v3, %v1951_v10 }
0x22e9   :  { %v1954_v16 = vpack.c.bf16 %v1953_v49, %v1953_v49 }
0x22eb   :  { %2516 = vmatmul.msk.bf16.vlgmr.msrb.gmra.mxu1 %vm377_vm5, %v1954_v16 }
0x2368   :  { %v1967_v62 = vpop.f32.mrf.mxu1 }
0x2369   :  { %v1968_v11 = vadd.f32 %v3453_v54, %v1967_v62 }
0x236b   :  { %2761 = vtanh.f32 %v1968_v11  ;;  %v2517_v17 = vmul.f32 -1.442695, %v1968_v11 }
0x236d   :  { %2763 = vpow2.f32 %v2517_v17 }
0x2370   :  { %v1969_v12 = vpop.f32.mrf.mxu1 }
0x2371   :  { %v2762_v13 = vpop.eup %2761 }
0x2372   :  { %1993 = vrot.lane.b32.xlu0 %v2762_v13, %s3032_s21 }
0x2373   :  { %v2764_v18 = vpop.eup %2763 }
0x2374   :  { %v1974_v20 = vadd.f32 1.0, %v2764_v18 }
0x2376   :  { %2765 = vrcp.f32 %v1974_v20  ;;  %v1986_v27 = vand.u32 2147483648, %v1974_v20  ;;  %vm1980_vm12 = vweird.f32 %v1974_v20  ;;  %v1984_v29 = vand.u32 2147483647, %v1974_v20 }
0x2378   :  { %v1987_v41 = vor.u32 1.1754944e-38, %v1986_v27  ;;  %vm1985_vm14 = vcmp.eq.f32.partialorder %v1984_v29, 8.507059e+37 }
0x237a   :  { %1866 = vrot.lane.b32.xlu0 %v1864_v15, %s3042_s2 }
0x237c   :  { %v2766_v22 = vpop.eup %2765 }
0x237d   :  { %v1976_v24 = vmul.f32 %v2766_v22, %v1974_v20  ;;  %vm1981_vm11 = vweird.f32 %v2766_v22 }
0x237e   :  { %vm1982_vm13 = vmor %vm1980_vm12, %vm1981_vm11  ;;  %vm2332_vm11 = vcmask 1045504  }
0x237f   :  { %v1977_v25 = vsub.f32 1.0, %v1976_v24 }
0x2381   :  { %v1978_v26 = vmul.f32 %v2766_v22, %v1977_v25 }
0x2383   :  { %v1979_v8 = vadd.f32 %v2766_v22, %v1978_v26 }
0x2385   :  { %v1983_v34 = vsel %vm1982_vm13, %v2766_v22, %v1979_v8 }
0x2386   :  { %v1988_v43 = vsel %vm1985_vm14, %v1987_v41, %v1983_v34 }
0x2387   :  { %v1991_v48 = vmul.f32 %v1988_v43, %v3581_v28 }
0x23e4   :  { %v1994_v21 = vpop.permute.xlu0 %1993 }
0x23e5   :  { %v1996_v35 = vmul.f32 %v1994_v21, %v1988_v43 }
0x23e7   :  { %1998 = vrot.lane.b32.xlu1 %v1996_v35, %s3042_s2 }
0x23ec   :  { %v1867_v42 = vpop.permute.xlu0 %1866 }
0x23ed   :  { %2513 = vmatmul.msk.bf16.vlgmr.msrb.gmra.mxu0 %vm289_vm4, %v1867_v42 }
0x23ee   :  { %2250 = vmatpush.bf16.msrb.mxu0 %v3431_v52 }
0x23f2   :  { %2251 = vmatpush.bf16.msrb.mxu0 %v3434_v50 }
0x23f6   :  { %2252 = vmatpush.bf16.msrb.mxu0 %v3439_v46 }
0x23fa   :  { %2253 = vmatpush.bf16.msrb.mxu0 %v3443_v55 }
0x2459   :  { %v1999_v33 = vpop.permute.xlu1 %1998 }
0x245a   :  { %v3624_v45 = vadd.f32 %v1999_v33, %v1991_v48 }
0x245c   :  { %2767 = vtanh.f32 %v3624_v45 }
0x2462   :  { %v2768_v47 = vpop.eup %2767 }
0x2463   :  { %2004 = vrot.lane.b32.xlu2 %v2768_v47, %s3032_s21 }
0x246a   :  { %v1880_v37 = vpop.f32.mrf.mxu0 }
0x246b   :  { %v1881_v23 = vadd.f32 %v3589_v30, %v1880_v37  ;;  %2032 = vrot.lane.b32.xlu2 %v1945_v9, %s3032_s21 }
0x246d   :  { %v2320_v52 = vrot.slane %v1881_v23, 4 }
0x246f   :  { %v3631_v50 = vsel %vm2330_vm15, %v3595_v51, %v2320_v52 }
0x2472   :  { %v1882_v46 = vpop.f32.mrf.mxu0 }
0x24bd   :  { %v2005_v55 = vpop.permute.xlu2 %2004 }
0x24be   :  { %v2007_v28 = vmul.f32 %v2005_v55, %v1988_v43 }
0x24c0   :  { %2029 = vrot.lane.b32.xlu1 %v2007_v28, %s3042_s2  ;;  %v2008_v22 = vpack.c.bf16 %v2007_v28, %v2007_v28 }
0x24c5   :  { %v2033_v31 = vpop.permute.xlu2 %2032 }
0x2532   :  { %v2030_v57 = vpop.permute.xlu1 %2029 }
0x2533   :  { %v2035_v53 = vsel %vm289_vm4, %v2030_v57, %v2033_v31 }
0x2534   :  { %v2036_v58 = vpack.c.bf16 %v2035_v53, %v2035_v53 }
0x2536   :  { %2519 = vmatmul.msk.bf16.vlgmr.msra.gmra.mxu0 %vm377_vm5, %v2036_v58 }
0x25b3   :  { %v2049_v59 = vpop.f32.mrf.mxu0 }
0x25b4   :  { %v2050_v36 = vadd.f32 %v3485_v19, %v2049_v59 }
0x25b6   :  { %2769 = vtanh.f32 %v2050_v36  ;;  %v2520_v51 = vmul.f32 -1.442695, %v2050_v36 }
0x25b8   :  { %2771 = vpow2.f32 %v2520_v51 }
0x25bb   :  { %v2051_v32 = vpop.f32.mrf.mxu0 }
0x25bc   :  { %v2770_v60 = vpop.eup %2769 }
0x25bd   :  { %2075 = vrot.lane.b32.xlu0 %v2770_v60, %s3032_s21 }
0x25be   :  { %v2772_v61 = vpop.eup %2771 }
0x25bf   :  { %v2056_v1 = vadd.f32 1.0, %v2772_v61 }
0x25c1   :  { %2773 = vrcp.f32 %v2056_v1  ;;  %v2068_v6 = vand.u32 2147483648, %v2056_v1  ;;  %vm2062_vm1 = vweird.f32 %v2056_v1  ;;  %v2066_v7 = vand.u32 2147483647, %v2056_v1 }
0x25c3   :  { %v2069_v56 = vor.u32 1.1754944e-38, %v2068_v6  ;;  %vm2067_vm3 = vcmp.eq.f32.partialorder %v2066_v7, 8.507059e+37 }
0x25c7   :  { %v2774_v5 = vpop.eup %2773 }
0x25c8   :  { %v2058_v0 = vmul.f32 %v2774_v5, %v2056_v1  ;;  %vm2063_vm0 = vweird.f32 %v2774_v5 }
0x25c9   :  { %vm2064_vm2 = vmor %vm2062_vm1, %vm2063_vm0 }
0x25ca   :  { %v2059_v63 = vsub.f32 1.0, %v2058_v0 }
0x25cc   :  { %v2060_v2 = vmul.f32 %v2774_v5, %v2059_v63 }
0x25ce   :  { %v2061_v4 = vadd.f32 %v2774_v5, %v2060_v2 }
0x25d0   :  { %v2065_v38 = vsel %vm2064_vm2, %v2774_v5, %v2061_v4 }
0x25d1   :  { %v2070_v44 = vsel %vm2067_vm3, %v2069_v56, %v2065_v38 }
0x25d2   :  { %v2073_v9 = vmul.f32 %v2070_v44, %v3607_v40 }
0x262f   :  { %v2076_v39 = vpop.permute.xlu0 %2075 }
0x2630   :  { %v2078_v14 = vmul.f32 %v2076_v39, %v2070_v44 }
0x2632   :  { %2080 = vrot.lane.b32.xlu1 %v2078_v14, %s3042_s2 }
0x263a   :  { %2094 = vrot.lane.b32.xlu1 %v2007_v28, %s3032_s21 }
0x26a4   :  { %v2081_v10 = vpop.permute.xlu1 %2080 }
0x26a5   :  { %v3641_v3 = vadd.f32 %v2081_v10, %v2073_v9 }
0x26a7   :  { %2775 = vtanh.f32 %v3641_v3 }
0x26ac   :  { %v2095_v11 = vpop.permute.xlu1 %2094 }
0x26ad   :  { %v2776_v49 = vpop.eup %2775 }
0x26ae   :  { %2086 = vrot.lane.b32.xlu2 %v2776_v49, %s3032_s21 }
0x2708   :  { %v2087_v16 = vpop.permute.xlu2 %2086 }
0x2709   :  { %v2089_v62 = vmul.f32 %v2087_v16, %v2070_v44 }
0x270b   :  { %2091 = vrot.lane.b32.xlu0 %v2089_v62, %s3042_s2 }
0x277d   :  { %v2092_v12 = vpop.permute.xlu0 %2091 }
0x277e   :  { %v2097_v13 = vsel %vm289_vm4, %v2092_v12, %v2095_v11 }
0x277f   :  { %v2098_v15 = vpack.c.bf16 %v2097_v13, %v2097_v13 }
0x2781   :  { %2521 = vmatmul.msk.bf16.vlgmr.msrb.gmra.mxu2 %vm377_vm5, %v2098_v15 }
0x2804   :  { %v2111_v40 = vpop.f32.mrf.mxu2 }
0x2805   :  { %v2112_v17 = vadd.f32 %v3453_v54, %v2111_v40 }
0x2807   :  { %2777 = vtanh.f32 %v2112_v17  ;;  %v2522_v24 = vmul.f32 -1.442695, %v2112_v17 }
0x2809   :  { %2779 = vpow2.f32 %v2522_v24 }
0x280c   :  { %v2113_v18 = vpop.f32.mrf.mxu2 }
0x280d   :  { %v2778_v20 = vpop.eup %2777 }
0x280e   :  { %2137 = vrot.lane.b32.xlu2 %v2778_v20, %s3032_s21 }
0x280f   :  { %v2780_v25 = vpop.eup %2779 }
0x2810   :  { %v2118_v26 = vadd.f32 1.0, %v2780_v25 }
0x2812   :  { %2781 = vrcp.f32 %v2118_v26  ;;  %v2130_v54 = vand.u32 2147483648, %v2118_v26  ;;  %vm2124_vm8 = vweird.f32 %v2118_v26  ;;  %v2128_v21 = vand.u32 2147483647, %v2118_v26 }
0x2814   :  { %v2131_v35 = vor.u32 1.1754944e-38, %v2130_v54  ;;  %vm2129_vm10 = vcmp.eq.f32.partialorder %v2128_v21, 8.507059e+37 }
0x2816   :  { %2010 = vrot.lane.b32.xlu2 %v2008_v22, %s3042_s2 }
0x2818   :  { %v2782_v8 = vpop.eup %2781 }
0x2819   :  { %v2120_v27 = vmul.f32 %v2782_v8, %v2118_v26  ;;  %vm2125_vm7 = vweird.f32 %v2782_v8 }
0x281a   :  { %vm2126_vm9 = vmor %vm2124_vm8, %vm2125_vm7 }
0x281b   :  { %v2121_v29 = vsub.f32 1.0, %v2120_v27 }
0x281d   :  { %v2122_v34 = vmul.f32 %v2782_v8, %v2121_v29 }
0x281f   :  { %v2123_v41 = vadd.f32 %v2782_v8, %v2122_v34 }
0x2821   :  { %v2127_v43 = vsel %vm2126_vm9, %v2782_v8, %v2123_v41 }
0x2822   :  { %v2132_v48 = vsel %vm2129_vm10, %v2131_v35, %v2127_v43 }
0x2823   :  { %v2135_v37 = vmul.f32 %v2132_v48, %v3624_v45 }
0x2868   :  { %v2138_v42 = vpop.permute.xlu2 %2137 }
0x2869   :  { %v2140_v33 = vmul.f32 %v2138_v42, %v2132_v48 }
0x286b   :  { %2142 = vrot.lane.b32.xlu0 %v2140_v33, %s3042_s2 }
0x2870   :  { %v2011_v47 = vpop.permute.xlu2 %2010 }
0x2871   :  { %2518 = vmatmul.msk.bf16.vlgmr.msrb.gmra.mxu3 %vm289_vm4, %v2011_v47 }
0x28dd   :  { %v2143_v23 = vpop.permute.xlu0 %2142 }
0x28de   :  { %v3654_v52 = vadd.f32 %v2143_v23, %v2135_v37 }
0x28e0   :  { %2783 = vtanh.f32 %v3654_v52 }
0x28e6   :  { %v2784_v46 = vpop.eup %2783 }
0x28e7   :  { %2148 = vrot.lane.b32.xlu1 %v2784_v46, %s3032_s21 }
0x28ef   :  { %2176 = vrot.lane.b32.xlu1 %v2089_v62, %s3032_s21 }
0x28f4   :  { %v2024_v55 = vpop.f32.mrf.mxu3 }
0x28f5   :  { %v2025_v28 = vadd.f32 %v3589_v30, %v2024_v55 }
0x28f7   :  { %v2323_v31 = vrot.slane %v2025_v28, 2 }
0x28f9   :  { %v2333_v57 = vsel %vm2332_vm11, %v3631_v50, %v2323_v31 }
0x28fa   :  { %2335 = vst [vmem:[#allocation16] sm:$0xff] %v2333_v57 }
0x28fc   :  { %v2026_v53 = vpop.f32.mrf.mxu3 }
0x2959   :  { %v2149_v45 = vpop.permute.xlu1 %2148 }
0x295a   :  { %v3661_v58 = vmul.f32 %v2149_v45, %v2132_v48 }
0x295c   :  { %2173 = vrot.lane.b32.xlu0 %v3661_v58, %s3042_s2  ;;  %v2152_v23 = vpack.c.bf16 %v3661_v58, %v3661_v58 }
0x2961   :  { %v2177_v59 = vpop.permute.xlu1 %2176 }
0x29ce   :  { %v2174_v36 = vpop.permute.xlu0 %2173 }
0x29cf   :  { %v2179_v32 = vsel %vm289_vm4, %v2174_v36, %v2177_v59 }
0x29d0   :  { %v2180_v60 = vpack.c.bf16 %v2179_v32, %v2179_v32 }
0x29d2   :  { %2524 = vmatmul.msk.bf16.vlgmr.msra.gmra.mxu3 %vm377_vm5, %v2180_v60 }
0x2a55   :  { %v2193_v51 = vpop.f32.mrf.mxu3 }
0x2a56   :  { %v2194_v61 = vadd.f32 %v3485_v19, %v2193_v51 }
0x2a58   :  { %2785 = vtanh.f32 %v2194_v61  ;;  %v2525_v5 = vmul.f32 -1.442695, %v2194_v61 }
0x2a5a   :  { %2787 = vpow2.f32 %v2525_v5 }
0x2a5d   :  { %v2195_v50 = vpop.f32.mrf.mxu3 }
0x2a5e   :  { %v2786_v1 = vpop.eup %2785 }
0x2a5f   :  { %2219 = vrot.lane.b32.xlu2 %v2786_v1, %s3032_s21 }
0x2a60   :  { %v2788_v0 = vpop.eup %2787 }
0x2a61   :  { %v2200_v63 = vadd.f32 1.0, %v2788_v0 }
0x2a63   :  { %2789 = vrcp.f32 %v2200_v63  ;;  %v2212_v56 = vand.u32 2147483648, %v2200_v63  ;;  %vm2206_vm13 = vweird.f32 %v2200_v63  ;;  %v2210_v39 = vand.u32 2147483647, %v2200_v63 }
0x2a65   :  { %v2213_v44 = vor.u32 1.1754944e-38, %v2212_v56  ;;  %vm2211_vm15 = vcmp.eq.f32.partialorder %v2210_v39, 8.507059e+37 }
0x2a69   :  { %v2790_v2 = vpop.eup %2789 }
0x2a6a   :  { %v2202_v4 = vmul.f32 %v2790_v2, %v2200_v63  ;;  %vm2207_vm12 = vweird.f32 %v2790_v2 }
0x2a6b   :  { %vm2208_vm14 = vmor %vm2206_vm13, %vm2207_vm12 }
0x2a6c   :  { %v2203_v6 = vsub.f32 1.0, %v2202_v4 }
0x2a6e   :  { %v2204_v7 = vmul.f32 %v2790_v2, %v2203_v6 }
0x2a70   :  { %v2205_v38 = vadd.f32 %v2790_v2, %v2204_v7 }
0x2a72   :  { %v2209_v19 = vsel %vm2208_vm14, %v2790_v2, %v2205_v38 }
0x2a73   :  { %v2214_v9 = vsel %vm2211_vm15, %v2213_v44, %v2209_v19 }
0x2a74   :  { %v2217_v49 = vmul.f32 %v2214_v9, %v3641_v3  ;;  %v2802_v3 = vld [vmem:[%s3707_s11] ss:$0 sm:$0xff]  ;;  %s3043_s11 = smov [#allocation16]  }
0x2a75   :  { %s2341_s3 = sshll.u32 %s3043_s11, 4  ;;  %s2342_s3 = int_to_ptr.vmem [resolvable:$true] %s2341_s3 }
0x2ab9   :  { %v2220_v14 = vpop.permute.xlu2 %2219 }
0x2aba   :  { %v2222_v10 = vmul.f32 %v2220_v14, %v2214_v9 }
0x2abc   :  { %2224 = vrot.lane.b32.xlu0 %v2222_v10, %s3042_s2 }
0x2ac4   :  { %2238 = vrot.lane.b32.xlu0 %v3661_v58, %s3032_s21 }
0x2b2e   :  { %v2225_v16 = vpop.permute.xlu0 %2224 }
0x2b2f   :  { %v2227_v62 = vadd.f32 %v2225_v16, %v2217_v49 }
0x2b31   :  { %2791 = vtanh.f32 %v2227_v62 }
0x2b36   :  { %v2239_v15 = vpop.permute.xlu0 %2238 }
0x2b37   :  { %v2792_v11 = vpop.eup %2791 }
0x2b38   :  { %2230 = vrot.lane.b32.xlu1 %v2792_v11, %s3032_s21 }
0x2baa   :  { %v2231_v12 = vpop.permute.xlu1 %2230 }
0x2bab   :  { %v2233_v13 = vmul.f32 %v2231_v12, %v2214_v9 }
0x2bad   :  { %2235 = vrot.lane.b32.xlu2 %v2233_v13, %s3042_s2 }
0x2c07   :  { %v2236_v40 = vpop.permute.xlu2 %2235 }
0x2c08   :  { %v2241_v17 = vsel %vm289_vm4, %v2236_v40, %v2239_v15 }
0x2c09   :  { %v2242_v18 = vpack.c.bf16 %v2241_v17, %v2241_v17 }
0x2c0b   :  { %2526 = vmatmul.msk.bf16.vlgmr.msrb.gmra.mxu0 %vm377_vm5, %v2242_v18 }
0x2c88   :  { %v2255_v20 = vpop.f32.mrf.mxu0 }
0x2c89   :  { %v2256_v22 = vadd.f32 %v2802_v3, %v2255_v20 }
0x2c8b   :  { %2793 = vtanh.f32 %v2256_v22  ;;  %v2527_v26 = vmul.f32 -1.442695, %v2256_v22 }
0x2c8d   :  { %2795 = vpow2.f32 %v2527_v26 }
0x2c90   :  { %v2257_v24 = vpop.f32.mrf.mxu0 }
0x2c91   :  { %v2794_v25 = vpop.eup %2793 }
0x2c92   :  { %2281 = vrot.lane.b32.xlu1 %v2794_v25, %s3032_s21 }
0x2c93   :  { %v2796_v8 = vpop.eup %2795 }
0x2c94   :  { %v2262_v27 = vadd.f32 1.0, %v2796_v8 }
0x2c96   :  { %2797 = vrcp.f32 %v2262_v27  ;;  %v2274_v43 = vand.u32 2147483648, %v2262_v27  ;;  %vm2268_vm0 = vweird.f32 %v2262_v27  ;;  %v2272_v35 = vand.u32 2147483647, %v2262_v27 }
0x2c98   :  { %v2275_v48 = vor.u32 1.1754944e-38, %v2274_v43  ;;  %vm2273_vm2 = vcmp.eq.f32.partialorder %v2272_v35, 8.507059e+37 }
0x2c9c   :  { %v2798_v29 = vpop.eup %2797 }
0x2c9d   :  { %v2264_v34 = vmul.f32 %v2798_v29, %v2262_v27  ;;  %vm2269_vm5 = vweird.f32 %v2798_v29 }
0x2c9e   :  { %vm2270_vm1 = vmor %vm2268_vm0, %vm2269_vm5 }
0x2c9f   :  { %v2265_v41 = vsub.f32 1.0, %v2264_v34 }
0x2ca1   :  { %v2266_v54 = vmul.f32 %v2798_v29, %v2265_v41 }
0x2ca3   :  { %v2267_v21 = vadd.f32 %v2798_v29, %v2266_v54 }
0x2ca5   :  { %v2271_v42 = vsel %vm2270_vm1, %v2798_v29, %v2267_v21 }
0x2ca6   :  { %v2276_v47 = vsel %vm2273_vm2, %v2275_v48, %v2271_v42 }
0x2ca7   :  { %v2279_v46 = vmul.f32 %v2276_v47, %v3654_v52 }
0x2d04   :  { %v2282_v33 = vpop.permute.xlu1 %2281 }
0x2d05   :  { %v2284_v37 = vmul.f32 %v2282_v33, %v2276_v47 }
0x2d07   :  { %2286 = vrot.lane.b32.xlu2 %v2284_v37, %s3042_s2 }
0x2d0f   :  { %2154 = vrot.lane.b32.xlu2 %v2152_v23, %s3042_s2 }
0x2d61   :  { %v2287_v55 = vpop.permute.xlu2 %2286 }
0x2d62   :  { %v2289_v28 = vadd.f32 %v2287_v55, %v2279_v46 }
0x2d64   :  { %2799 = vtanh.f32 %v2289_v28 }
0x2d69   :  { %v2155_v31 = vpop.permute.xlu2 %2154 }
0x2d6a   :  { %v2800_v57 = vpop.eup %2799  ;;  %2523 = vmatmul.msk.bf16.vlgmr.msra.gmra.mxu1 %vm289_vm4, %v2155_v31 }
0x2d6b   :  { %2292 = vrot.lane.b32.xlu0 %v2800_v57, %s3032_s21  ;;  %s3044_s21 = smov 128  }
0x2ddd   :  { %v2293_v53 = vpop.permute.xlu0 %2292 }
0x2dde   :  { %v2295_v45 = vmul.f32 %v2293_v53, %v2276_v47 }
0x2de0   :  { %v2296_v59 = vpack.c.bf16 %v2295_v45, %v2295_v45 }
0x2de2   :  { %2298 = vrot.lane.b32.xlu1 %v2296_v59, %s3042_s2 }
0x2de7   :  { %v2168_v36 = vpop.f32.mrf.mxu1 }
0x2de8   :  { %v2169_v51 = vadd.f32 %v3589_v30, %v2168_v36 }
0x2def   :  { %v2170_v58 = vpop.f32.mrf.mxu1 }
0x2e54   :  { %v2299_v32 = vpop.permute.xlu1 %2298 }
0x2e55   :  { %2528 = vmatmul.msk.bf16.vlgmr.msra.gmra.mxu2 %vm289_vm4, %v2299_v32 }
0x2ed8   :  { %v2312_v52 = vpop.f32.mrf.mxu2 }
0x2ed9   :  { %v2313_v60 = vadd.f32 %v3589_v30, %v2312_v52 }
0x2edb   :  { %v2326_v61 = vrot.slane %v2313_v60, 6 }
0x2edd   :  { %v2334_v50 = vsel %vm2328_vm6, %v2169_v51, %v2326_v61 }
0x2ede   :  { %2336 = vst [vmem:[#allocation16 + $0x8] sm:$0xf] %v2334_v50 }
0x2edf   :  { %2349 = dma.vmem_to_hbm [thread:$0]  %s2342_s3, 256, %s2344_s4, [#allocation4], %s3044_s21, %s3044_s21, %s3045_s6  }
0x2ee0   :  { %v2314_v1 = vpop.f32.mrf.mxu2 }
0x2ee1   :  { %3029 = dma.done.wait [#allocation4], 256  }
0x2ee2   :  { %3030 = vsyncadd [#allocation4], 4294967040 }
0x2ee3   :  { %2354 = vsyncpa [#allocation3], 1 }
0x2ee4   :  { %2355 = vsyncpa [#allocation6], 1 }
0x2ee5   :  { %2356 = vsyncpa [#allocation9], 1 }
0x2ee6   :  { %2357 = vsyncpa [#allocation12], 1 }
0x2ee7   :  { %2358 = vsyncpa [#allocation15], 1 }
0x2ee8   :  { %2359 = vsyncpa [#allocation4], 1 }

</bundles_post_ra>
